<compile_context>
chip_gen: v7x
topology: tpu7x:2x2x1
jax: 0.10.0
libtpu: 0.0.40
codegen_flags: <defaults>
</compile_context>

<pallas_src>
import functools

import numpy as np
import jax
import jax.numpy as jnp
from jax import lax
from jax.experimental import pallas as pl
from jax.experimental.pallas import tpu as pltpu

BATCH_DIM = 2

_EXPM_TAYLOR_ORDER = 16      # degree-16 Taylor: error ~1/17! once ||A||/2**s <= 1
_MAX_SQUARINGS = 12
_SMALL_CONTRACT = 16         # contraction dims <= this bypass the MXU
_LANE = 128

_INV_FACT = [1.0]
_f = 1.0
for _k in range(1, _EXPM_TAYLOR_ORDER + 1):
    _f *= float(_k)
    _INV_FACT.append(1.0 / _f)


# ---------------------------------------------------------------------------
# in-kernel complex helpers (split re/im float32 planes)
# ---------------------------------------------------------------------------
def _eye_f32(d):
    r = lax.broadcasted_iota(jnp.int32, (d, d), 0)
    c = lax.broadcasted_iota(jnp.int32, (d, d), 1)
    return (r == c).astype(jnp.float32)


def _make_mm(compute_dtype):
    """Real matmul used inside the complex products.

    Contraction dims <= _SMALL_CONTRACT are done as an unrolled VPU
    broadcast-MAC: a k<=16-wide contraction would waste >=8-64x of the
    128/256-wide MXU and expose full MXU pipeline latency per tiny matmul of
    the serial Taylor/squaring chain.  Larger contractions use the MXU; an
    optional bf16 cast (accuracy-gated, off by default) halves operand width.
    """
    def mm(a, b):
        k = a.shape[-1]
        if k <= _SMALL_CONTRACT:
            acc = a[:, 0:1] * b[0:1, :]
            for i in range(1, k):
                acc = acc + a[:, i:i + 1] * b[i:i + 1, :]
            return acc
        if compute_dtype != jnp.float32:
            a = a.astype(compute_dtype)
            b = b.astype(compute_dtype)
        return jnp.dot(a, b, preferred_element_type=jnp.float32)
    return mm


def _cdot3(ar, ai, br, bi, mm):
    """Complex matmul, exact Gauss 3-real-matmul form (order preserving).

    Also used for squaring (a == b); the previous 2-matmul "square" dropped the
    commutator [Mr, Mi] and was wrong for generic Hermitian generators.
    """
    t1 = mm(ar, br)
    t2 = mm(ai, bi)
    t3 = mm(ar + ai, br + bi)
    return t1 - t2, t3 - t1 - t2


def _cscale(sr, si, mr, mi):
    """(complex scalar) * (complex matrix) on the VPU (no matmuls)."""
    return sr * mr - si * mi, sr * mi + si * mr


def _expm_apply_one(cr, ci, hpows, xr, xi, eye, squarings, repeated_apply,
                    state_on_left, mm):
    """Apply expm(c*H) to one state slab (split re/im planes).

    `hpows` are the shared H, H^2, H^3, H^4 planes; (cr, ci) is the already
    scaled complex scalar c' = -i*t / 2**squarings.  A'^m = c'^m * H^m is a
    per-batch VPU scalar scale, the degree-16 Taylor of exp(A') is evaluated
    with Paterson-Stockmeyer (3 complex Horner matmuls), then either explicit
    squarings + one state apply, or 2**squarings repeated state applies
    (cheaper when the state slab is narrow).
    """
    (h1r, h1i), (h2r, h2i), (h3r, h3i), (h4r, h4i) = hpows

    # complex scalar powers c'^m  (scalar unit / VPU splats)
    c2r, c2i = cr * cr - ci * ci, 2.0 * cr * ci
    c3r, c3i = c2r * cr - c2i * ci, c2r * ci + c2i * cr
    c4r, c4i = c2r * c2r - c2i * c2i, 2.0 * c2r * c2i

    # A'^m = c'^m * H^m  (scalar * matrix, no matmuls)
    a1r, a1i = _cscale(cr, ci, h1r, h1i)
    a2r, a2i = _cscale(c2r, c2i, h2r, h2i)
    a3r, a3i = _cscale(c3r, c3i, h3r, h3i)
    a4r, a4i = _cscale(c4r, c4i, h4r, h4i)

    def blk(m):
        k0, k1, k2, k3 = _INV_FACT[4 * m: 4 * m + 4]
        br_ = k0 * eye + k1 * a1r + k2 * a2r + k3 * a3r
        bi_ = k1 * a1i + k2 * a2i + k3 * a3i
        return br_, bi_

    b0 = blk(0)
    b1 = blk(1)
    b2 = blk(2)
    b3 = blk(3)
    c16 = _INV_FACT[16]

    # Horner over A'^4: p = (((c16*M + B3)*M + B2)*M + B1)*M + B0
    pr = c16 * a4r + b3[0]
    pi = c16 * a4i + b3[1]
    for br_, bi_ in (b2, b1, b0):
        pr, pi = _cdot3(pr, pi, a4r, a4i, mm)
        pr = pr + br_
        pi = pi + bi_

    def apply(sr, si, qr, qi):
        if state_on_left:                       # state slab (R, Dk): y = x @ P
            return _cdot3(sr, si, qr, qi, mm)
        return _cdot3(qr, qi, sr, si, mm)       # state slab (Dk, R): y = P @ x

    if repeated_apply:
        n_apply = 2 ** squarings
        if n_apply <= 4:
            yr, yi = xr, xi
            for _ in range(n_apply):
                yr, yi = apply(yr, yi, pr, pi)
        else:
            def body(_, carry):
                yr_, yi_ = carry
                return apply(yr_, yi_, pr, pi)
            yr, yi = lax.fori_loop(0, n_apply, body, (xr, xi))
        return yr, yi

    if squarings <= 4:
        for _ in range(squarings):
            pr, pi = _cdot3(pr, pi, pr, pi, mm)
    else:
        def body(_, carry):
            qr, qi = carry
            return _cdot3(qr, qi, qr, qi, mm)
        pr, pi = lax.fori_loop(0, squarings, body, (pr, pi))
    return apply(xr, xi, pr, pi)


# ---------------------------------------------------------------------------
# Pallas kernels
# ---------------------------------------------------------------------------
def _dense_evolve_apply_kernel(cr_ref, ci_ref, h_ref, s_ref, o_ref, *,
                               b_tile, h_batched, squarings, repeated_apply,
                               state_on_left, compute_dtype):
    """out[b] = expm(-i*t[b]*H[b]) applied to state[b] for b_tile batch elems."""
    pid = pl.program_id(0)
    dk = h_ref.shape[-1]
    eye = _eye_f32(dk)
    inv_scale = 1.0 / float(2 ** squarings)
    mm = _make_mm(compute_dtype)

    def h_powers(hr, hi):
        h2 = _cdot3(hr, hi, hr, hi, mm)
        h3 = _cdot3(h2[0], h2[1], hr, hi, mm)
        h4 = _cdot3(h2[0], h2[1], h2[0], h2[1], mm)
        return (hr, hi), h2, h3, h4

    shared_pows = None
    if not h_batched:
        # shared-H hoist: H^2..H^4 once per grid step, reused by every batch
        # element in the tile (A'^m is just a complex scalar multiple of H^m).
        shared_pows = h_powers(h_ref[0, 0], h_ref[1, 0])

    for j in range(b_tile):
        idx = pid * b_tile + j
        cr = cr_ref[idx] * inv_scale
        ci = ci_ref[idx] * inv_scale
        pows = h_powers(h_ref[0, j], h_ref[1, j]) if h_batched else shared_pows
        xr = s_ref[0, j]
        xi = s_ref[1, j]
        yr, yi = _expm_apply_one(cr, ci, pows, xr, xi, eye, squarings,
                                 repeated_apply, state_on_left, mm)
        o_ref[0, j] = yr
        o_ref[1, j] = yi


def _diag_evolve_apply_kernel(z_ref, s_ref, o_ref):
    """out = exp(z) * state, z = -i*t*diag(H); pure VPU/EUP elementwise."""
    zr = z_ref[0]
    zi = z_ref[1]
    mag = jnp.exp(zr)
    er = mag * jnp.cos(zi)
    ei = mag * jnp.sin(zi)
    xr = s_ref[0]
    xi = s_ref[1]
    o_ref[0] = er * xr - ei * xi
    o_ref[1] = er * xi + ei * xr


# ---------------------------------------------------------------------------
# sizing heuristics (hardware aware)
# ---------------------------------------------------------------------------
def _tpu_vmem_capacity_bytes():
    try:
        return int(pltpu.get_tpu_info().vmem_capacity_bytes)
    except Exception:
        return 64 << 20          # conservative fallback = v7x-sized VMEM


def _pick_b_tile(batch, dk, r, dense, vmem_bytes):
    """Regime-aware batch tile.

    Small-Dk chains are latency bound -> interleave several independent chains;
    large-Dk chains are vreg/VMEM bound -> keep the live set small.  Budgets
    scale with physical VMEM (128 MiB on v5e/v6e, 64 MiB on v7x).
    """
    if dense:
        if dk >= 256:
            b = 1
        elif dk >= 64:
            b = 2
        elif dk >= 32:
            b = 4
        else:
            b = 8
        budget = vmem_bytes // 4                  # ~32 MiB (v5e/v6e) / ~16 MiB (v7x)
        per_elem = 4 * (24 * dk * dk + 8 * dk * r)
    else:
        b = 16
        budget = (3 * vmem_bytes) // 8            # ~48 MiB (v5e/v6e) / ~24 MiB (v7x)
        per_elem = 4 * 8 * dk * r
    b = min(b, int(batch))
    b = min(b, max(1, budget // max(per_elem, 1)))
    if batch >= 2:
        # keep the parallel batch axis >= 2 grid steps so both v7x TensorCores
        # get work; costs only one extra ~0.35us step on single-TC parts.
        b = min(b, -(-int(batch) // 2))
    return max(1, int(b))


def _vmem_limit_bytes(b_tile, bh_blk, dk, d0, d1, vmem_bytes):
    io = 4 * (2 * 2 * bh_blk * dk * dk + 2 * 2 * 2 * b_tile * d0 * d1)
    temps = 4 * (10 * dk * dk + b_tile * (22 * dk * dk + 6 * d0 * d1))
    est = io + temps + (2 << 20)
    hi = (3 * vmem_bytes) // 4                    # 96 MiB v5e/v6e, 48 MiB v7x
    return int(min(max(est, 32 << 20), hi))


# ---------------------------------------------------------------------------
# pallas_call wrappers
# ---------------------------------------------------------------------------
def _pallas_dense_evolve_apply(cr, ci, h_packed, s_packed, *, b_tile, h_batched,
                               squarings, repeated_apply, state_on_left,
                               compute_dtype, vmem_bytes):
    _, b_pad, d0, d1 = s_packed.shape
    dk = h_packed.shape[-1]
    bh_blk = b_tile if h_batched else 1
    grid = (b_pad // b_tile,)
    # index maps receive the scalar-prefetch refs as trailing positional args
    if h_batched:
        h_idx = lambda b, _cr, _ci: (0, b, 0, 0)
    else:
        h_idx = lambda b, _cr, _ci: (0, 0, 0, 0)   # shared H: one HBM copy
    # TODO(synk): pipeline_mode=pl.Buffered(1) on the invariant shared-H block
    # would free its second buffer; skipped to stay on well-trodden API.
    h_spec = pl.BlockSpec((2, bh_blk, dk, dk), h_idx)
    s_spec = pl.BlockSpec((2, b_tile, d0, d1), lambda b, _cr, _ci: (0, b, 0, 0))
    kernel = functools.partial(
        _dense_evolve_apply_kernel, b_tile=b_tile, h_batched=h_batched,
        squarings=squarings, repeated_apply=repeated_apply,
        state_on_left=state_on_left, compute_dtype=compute_dtype)
    return pl.pallas_call(
        kernel,
        out_shape=jax.ShapeDtypeStruct((2, b_pad, d0, d1), jnp.float32),
        grid_spec=pltpu.PrefetchScalarGridSpec(
            num_scalar_prefetch=2,
            grid=grid,
            in_specs=[h_spec, s_spec],
            out_specs=s_spec),
        compiler_params=pltpu.CompilerParams(
            dimension_semantics=("parallel",),
            vmem_limit_bytes=_vmem_limit_bytes(b_tile, bh_blk, dk, d0, d1,
                                               vmem_bytes)),
    )(cr, ci, h_packed, s_packed)


def _pallas_diag_evolve_apply(z_packed, s_packed, *, b_tile, vmem_bytes):
    _, b_pad, d0, d1 = s_packed.shape
    grid = (b_pad // b_tile,)
    z_spec = pl.BlockSpec((2, b_tile) + tuple(z_packed.shape[2:]),
                          lambda b: (0, b, 0, 0))
    s_spec = pl.BlockSpec((2, b_tile, d0, d1), lambda b: (0, b, 0, 0))
    limit = int(min(max(4 * 8 * b_tile * d0 * d1 * 4 + (4 << 20), 16 << 20),
                    (3 * vmem_bytes) // 4))
    return pl.pallas_call(
        _diag_evolve_apply_kernel,
        out_shape=jax.ShapeDtypeStruct((2, b_pad, d0, d1), jnp.float32),
        grid=grid,
        in_specs=[z_spec, s_spec],
        out_specs=s_spec,
        compiler_params=pltpu.CompilerParams(
            dimension_semantics=("parallel",),
            vmem_limit_bytes=limit),
    )(z_packed, s_packed)


# ---------------------------------------------------------------------------
# Module wrapper (glue mirrors pyqtorch semantics)
# ---------------------------------------------------------------------------
def _is_diag_host(mat2d):
    m = np.asarray(mat2d)
    off = ~np.eye(m.shape[0], dtype=bool)
    return bool(np.all(m[off] == 0))


class HamiltonianEvolution:
    """JAX/Pallas port of pyqtorch's HamiltonianEvolution.forward.

    Optional static hints (avoid per-call host syncs, keep dispatch async):
      generator_is_diagonal: force the diagonal / matrix-exp branch.
      norm_bound:            upper bound on max_b ||t_b * H_b||_1 used to pick
                             the scaling-and-squaring depth statically.
      use_bf16_matmuls:      cast MXU operands of the Taylor chain to bf16
                             (accuracy-gated, off by default).
    """

    def __init__(self, qubit_support, n_qubits=None, *,
                 generator_is_diagonal=None, norm_bound=None,
                 use_bf16_matmuls=False):
        self.qubit_support = tuple(qubit_support)
        self.n_qubits = len(qubit_support) if n_qubits is None else n_qubits
        self.generator_is_diagonal = generator_is_diagonal
        self.norm_bound = norm_bound
        self.compute_dtype = jnp.bfloat16 if use_bf16_matmuls else jnp.float32

    def __call__(self, hamiltonian, time_evolution, state):
        if hamiltonian.ndim < 3:
            hamiltonian = hamiltonian[..., None]
        dk = hamiltonian.shape[0]
        bh = hamiltonian.shape[BATCH_DIM]
        time_evolution = jnp.asarray(time_evolution).reshape(-1)
        bt = time_evolution.shape[0]
        batch_size = max(bh, bt)
        self.batch_size = batch_size

        k = len(self.qubit_support)
        n = self.n_qubits
        assert dk == 2 ** k
        r = 2 ** (n - k)
        others = [q for q in range(n) if q not in self.qubit_support]
        perm = list(self.qubit_support) + others + [n]
        inv_perm = [int(p) for p in np.argsort(perm)]

        if self.generator_is_diagonal is not None:
            diag_check = bool(self.generator_is_diagonal)
        else:
            # TODO(synk): mirrors torch's python-level branch, which needs
            # concrete values (host sync); pass generator_is_diagonal= to keep
            # the whole call traceable/async.
            diag_check = all(_is_diag_host(hamiltonian[..., i])
                             for i in range(bh))

        # lane-dense layout: keep the larger of (Dk, R) on the 128-lane axis.
        # When R < Dk the state is stored transposed (B, R, Dk) and H^T is
        # passed to the kernel (expm(A)^T = expm(A^T)); the apply becomes x@P.
        state_on_left = (r < _LANE) and (dk > r)
        # TODO(synk): when both Dk and R are < 128 the output stays lane-sparse;
        # folding B*R into the lane axis would require per-batch lane slicing of
        # the apply inside the kernel and is not done here (tiny problems are
        # overhead-dominated anyway).

        # state (2,)*n + (B,) -> packed re/im (2, B, d0, d1)
        st = jnp.transpose(state, perm).reshape(dk, r, batch_size)
        if state_on_left:
            st_b = jnp.transpose(st, (2, 1, 0))      # (B, R, Dk)
        else:
            st_b = jnp.transpose(st, (2, 0, 1))      # (B, Dk, R)
        s_packed = jnp.stack([jnp.real(st_b), jnp.imag(st_b)]
                             ).astype(jnp.float32)

        tb = jnp.broadcast_to(time_evolution, (batch_size,))
        minus_i_t = (-1j) * tb                       # c = -i*t

        vmem_bytes = _tpu_vmem_capacity_bytes()
        b_tile = _pick_b_tile(batch_size, dk, r, dense=not diag_check,
                              vmem_bytes=vmem_bytes)
        b_pad = ((batch_size + b_tile - 1) // b_tile) * b_tile
        pad_b = b_pad - batch_size
        if pad_b:
            s_packed = jnp.pad(s_packed, ((0, 0), (0, pad_b), (0, 0), (0, 0)))

        if diag_check:
            d = jnp.diagonal(hamiltonian, axis1=0, axis2=1)          # (Bh, Dk)
            z = minus_i_t[:, None] * jnp.broadcast_to(d, (batch_size, dk))
            z_packed = jnp.stack([jnp.real(z), jnp.imag(z)]).astype(jnp.float32)
            if state_on_left:
                z_packed = z_packed[:, :, None, :]                   # (2,B,1,Dk)
            else:
                z_packed = z_packed[:, :, :, None]                   # (2,B,Dk,1)
            if pad_b:
                z_packed = jnp.pad(z_packed,
                                   ((0, 0), (0, pad_b), (0, 0), (0, 0)))
            out_packed = _pallas_diag_evolve_apply(
                z_packed, s_packed, b_tile=b_tile, vmem_bytes=vmem_bytes)
        else:
            if self.norm_bound is not None:
                anorm = float(self.norm_bound)
            else:
                # TODO(synk): host-side norm estimate (device sync); pass
                # norm_bound= for fully asynchronous dispatch.
                hnorm = float(jnp.max(jnp.sum(jnp.abs(hamiltonian), axis=1)))
                tmax = float(jnp.max(jnp.abs(time_evolution)))
                anorm = hnorm * tmax
            squarings = 0 if anorm <= 1.0 else int(
                min(_MAX_SQUARINGS, max(0.0, np.ceil(np.log2(anorm)))))
            # repeated state-apply beats explicit squaring when R << Dk
            cost_rep = 3 * (2 ** squarings) * dk * dk * r
            cost_sq = 3 * squarings * dk ** 3 + 3 * dk * dk * r
            repeated_apply = cost_rep < cost_sq

            h_b = jnp.moveaxis(hamiltonian, -1, 0)                   # (Bh,Dk,Dk)
            if state_on_left:
                h_b = jnp.swapaxes(h_b, -1, -2)                      # pass H^T
            h_packed = jnp.stack([jnp.real(h_b), jnp.imag(h_b)]
                                 ).astype(jnp.float32)               # (2,Bh,Dk,Dk)
            h_batched = bh != 1
            if h_batched:
                assert bh == batch_size, "hamiltonian batch must be 1 or batch"
                if pad_b:
                    h_packed = jnp.pad(h_packed,
                                       ((0, 0), (0, pad_b), (0, 0), (0, 0)))
            cr = jnp.real(minus_i_t).astype(jnp.float32)
            ci = jnp.imag(minus_i_t).astype(jnp.float32)
            if pad_b:
                cr = jnp.pad(cr, (0, pad_b))
                ci = jnp.pad(ci, (0, pad_b))
            out_packed = _pallas_dense_evolve_apply(
                cr, ci, h_packed, s_packed, b_tile=b_tile, h_batched=h_batched,
                squarings=squarings, repeated_apply=repeated_apply,
                state_on_left=state_on_left, compute_dtype=self.compute_dtype,
                vmem_bytes=vmem_bytes)

        out = (out_packed[0, :batch_size] + 1j * out_packed[1, :batch_size]
               ).astype(state.dtype)
        if state_on_left:
            out = jnp.transpose(out, (2, 1, 0))      # (Dk, R, B)
        else:
            out = jnp.transpose(out, (1, 2, 0))      # (Dk, R, B)
        out = out.reshape([2] * n + [batch_size])
        return jnp.transpose(out, inv_perm)


# ---------------------------------------------------------------------------
# Pure-JAX reference (mirrors the torch code path) for a sanity check
# ---------------------------------------------------------------------------
_ABC = list("abcdefghijklmnopqrstuvwxyzABCDEFGHIJKLMNOPQRSTUVWXYZ")


def _matrix_exp_ref(a, squarings=6):
    a = a / (2.0 ** squarings)
    d = a.shape[-1]
    eye = jnp.broadcast_to(jnp.eye(d, dtype=a.dtype), a.shape)
    res, term = eye, eye
    for kk in range(1, _EXPM_TAYLOR_ORDER + 1):
        term = jnp.matmul(term, a, precision="highest") / kk
        res = res + term
    for _ in range(squarings):
        res = jnp.matmul(res, res, precision="highest")
    return res


def _apply_operator_ref(state, operator, qubits, n_qubits, batch_size):
    qubits = list(qubits)
    op = operator.reshape([2] * (2 * len(qubits)) + [operator.shape[-1]])
    in_dims = _ABC[: n_qubits + 1]
    new_dims = _ABC[n_qubits + 1: n_qubits + 1 + len(qubits)]
    op_dims = new_dims + [in_dims[q] for q in qubits] + [in_dims[-1]]
    out_dims = list(in_dims)
    for i, q in enumerate(qubits):
        out_dims[q] = new_dims[i]
    eq = f"{''.join(op_dims)},{''.join(in_dims)}->{''.join(out_dims)}"
    return jnp.einsum(eq, op, state, precision="highest")


def _reference_forward(hamiltonian, time_evolution, state, qubit_support, n_qubits):
    if hamiltonian.ndim < 3:
        hamiltonian = hamiltonian[..., None]
    batch_size = max(hamiltonian.shape[BATCH_DIM], time_evolution.shape[0])
    dk = hamiltonian.shape[0]
    tc = (-1j) * time_evolution.astype(hamiltonian.dtype)
    diag_check = all(_is_diag_host(hamiltonian[..., i])
                     for i in range(hamiltonian.shape[BATCH_DIM]))
    if diag_check:
        ev = jnp.exp(jnp.diagonal(hamiltonian, axis1=0, axis2=1) * tc[:, None])
        op = ev[..., None] * jnp.eye(dk, dtype=hamiltonian.dtype)   # diag_embed
        op = jnp.swapaxes(op, 0, -1)
    else:
        a = jnp.swapaxes(hamiltonian, 0, -1) * tc[:, None, None]
        op = jnp.swapaxes(_matrix_exp_ref(a), 0, -1)
    return _apply_operator_ref(state, op, list(qubit_support), n_qubits, batch_size)


# ---------------------------------------------------------------------------
if __name__ == "__main__":
    key = jax.random.PRNGKey(0)
    n_qubits = 6
    batch = 2
    time_evolution = jnp.array([0.7, 1.3], dtype=jnp.float32)

    k1, k2, k3, k4, k5, k6, k7 = jax.random.split(key, 7)

    # state: (2,)*n_qubits + (batch,), complex64, normalized per batch column
    sre = jax.random.normal(k1, [2] * n_qubits + [batch], dtype=jnp.float32)
    sim = jax.random.normal(k2, [2] * n_qubits + [batch], dtype=jnp.float32)
    state = (sre + 1j * sim).astype(jnp.complex64)
    norm = jnp.sqrt(jnp.sum(jnp.abs(state) ** 2,
                            axis=tuple(range(n_qubits)), keepdims=True))
    state = state / norm

    def hermitian(kr, ki, d, b):
        hre = jax.random.normal(kr, (d, d, b), dtype=jnp.float32)
        him = jax.random.normal(ki, (d, d, b), dtype=jnp.float32)
        h = 0.5 * (hre + 1j * him).astype(jnp.complex64)
        return 0.5 * (h + jnp.conjugate(jnp.swapaxes(h, 0, 1)))

    # --- test 1: dense, batched H, Dk=4, R=16, static hints (no host sync) ---
    qs1 = (1, 3)
    h_dense = hermitian(k3, k4, 2 ** len(qs1), batch)
    mod1 = HamiltonianEvolution(qs1, n_qubits,
                                generator_is_diagonal=False, norm_bound=16.0)
    out_dense = jax.block_until_ready(mod1(h_dense, time_evolution, state))
    ref_dense = _reference_forward(h_dense, time_evolution, state, qs1, n_qubits)

    # --- test 2: diagonal H, Dk=4, auto diag detection (host fallback) -------
    dvals = jax.random.normal(k5, (2 ** len(qs1), batch), dtype=jnp.float32)
    h_diag = jnp.einsum("ij,jb->ijb", jnp.eye(2 ** len(qs1), dtype=jnp.float32),
                        dvals).astype(jnp.complex64)
    mod2 = HamiltonianEvolution(qs1, n_qubits)
    out_diag = jax.block_until_ready(mod2(h_diag, time_evolution, state))
    ref_diag = _reference_forward(h_diag, time_evolution, state, qs1, n_qubits)

    # --- test 3: dense shared H (Bh=1), Dk=32, R=2 -> transposed lane layout --
    qs3 = (0, 1, 2, 3, 4)
    h_shared = hermitian(k6, k7, 2 ** len(qs3), 1)
    mod3 = HamiltonianEvolution(qs3, n_qubits)
    out_shared = jax.block_until_ready(mod3(h_shared, time_evolution, state))
    ref_shared = _reference_forward(h_shared, time_evolution, state, qs3, n_qubits)

    for out, ref in ((out_dense, ref_dense), (out_diag, ref_diag),
                     (out_shared, ref_shared)):
        assert out.shape == state.shape and out.dtype == state.dtype
        np.testing.assert_allclose(np.asarray(out), np.asarray(ref),
                                   atol=1e-2, rtol=1e-2)

    print("KERNEL_OK")
</pallas_src>

<mosaic_0001>
module attributes {stable_mosaic.version = 11 : i64} {
  func.func @_dense_evolve_apply_kernel(%arg0: i32, %arg1: memref<2xf32, #tpu.memory_space<smem>>, %arg2: memref<2xf32, #tpu.memory_space<smem>>, %arg3: memref<2x1x4x4xf32, #tpu.memory_space<vmem>>, %arg4: memref<2x1x4x16xf32, #tpu.memory_space<vmem>>, %arg5: memref<2x1x4x16xf32, #tpu.memory_space<vmem>>) attributes {dimension_semantics = [#tpu.dimension_semantics<parallel>], iteration_bounds = array<i64: 2>, scalar_prefetch = 2 : i64, scratch_operands = 0 : i64, tpu.core_type = #tpu.core_type<tc>, window_params = [{transform_indices = @transform_0, window_bounds = array<i64: 2, 1, 4, 4>}, {transform_indices = @transform_1, window_bounds = array<i64: 2, 1, 4, 16>}, {transform_indices = @transform_2, window_bounds = array<i64: 2, 1, 4, 16>}]} {
    %0 = tpu.iota {dimensions = array<i32: 0>} : vector<4x4xi32>
    %1 = tpu.iota {dimensions = array<i32: 1>} : vector<4x4xi32>
    %2 = arith.cmpi eq, %0, %1 : vector<4x4xi32>
    %3 = arith.extui %2 : vector<4x4xi1> to vector<4x4xi32>
    %4 = arith.sitofp %3 : vector<4x4xi32> to vector<4x4xf32>
    %c1_i32 = arith.constant 1 : i32
    %5 = arith.muli %arg0, %c1_i32 : i32
    %c0_i32 = arith.constant 0 : i32
    %6 = arith.addi %5, %c0_i32 : i32
    %7 = arith.index_cast %6 : i32 to index
    %8 = memref.load %arg1[%7] : memref<2xf32, #tpu.memory_space<smem>>
    %cst = arith.constant 6.250000e-02 : f32
    %9 = arith.mulf %8, %cst : f32
    %10 = arith.index_cast %6 : i32 to index
    %11 = memref.load %arg2[%10] : memref<2xf32, #tpu.memory_space<smem>>
    %cst_0 = arith.constant 6.250000e-02 : f32
    %12 = arith.mulf %11, %cst_0 : f32
    %c0 = arith.constant 0 : index
    %c0_1 = arith.constant 0 : index
    %c0_2 = arith.constant 0 : index
    %c0_3 = arith.constant 0 : index
    %13 = vector.load %arg3[%c0, %c0_1, %c0_2, %c0_3] : memref<2x1x4x4xf32, #tpu.memory_space<vmem>>, vector<1x1x4x4xf32>
    %14 = vector.shape_cast %13 : vector<1x1x4x4xf32> to vector<4x4xf32>
    %c1 = arith.constant 1 : index
    %c0_4 = arith.constant 0 : index
    %c0_5 = arith.constant 0 : index
    %c0_6 = arith.constant 0 : index
    %15 = vector.load %arg3[%c1, %c0_4, %c0_5, %c0_6] : memref<2x1x4x4xf32, #tpu.memory_space<vmem>>, vector<1x1x4x4xf32>
    %16 = vector.shape_cast %15 : vector<1x1x4x4xf32> to vector<4x4xf32>
    %17 = vector.extract_strided_slice %14 {offsets = [0, 0], sizes = [4, 1], strides = [1, 1]} : vector<4x4xf32> to vector<4x1xf32>
    %18 = vector.extract_strided_slice %14 {offsets = [0, 0], sizes = [1, 4], strides = [1, 1]} : vector<4x4xf32> to vector<1x4xf32>
    %19 = vector.broadcast %17 : vector<4x1xf32> to vector<4x4xf32>
    %20 = vector.broadcast %18 : vector<1x4xf32> to vector<4x4xf32>
    %21 = arith.mulf %19, %20 : vector<4x4xf32>
    %22 = vector.extract_strided_slice %14 {offsets = [0, 1], sizes = [4, 1], strides = [1, 1]} : vector<4x4xf32> to vector<4x1xf32>
    %23 = vector.extract_strided_slice %14 {offsets = [1, 0], sizes = [1, 4], strides = [1, 1]} : vector<4x4xf32> to vector<1x4xf32>
    %24 = vector.broadcast %22 : vector<4x1xf32> to vector<4x4xf32>
    %25 = vector.broadcast %23 : vector<1x4xf32> to vector<4x4xf32>
    %26 = arith.mulf %24, %25 : vector<4x4xf32>
    %27 = arith.addf %21, %26 : vector<4x4xf32>
    %28 = vector.extract_strided_slice %14 {offsets = [0, 2], sizes = [4, 1], strides = [1, 1]} : vector<4x4xf32> to vector<4x1xf32>
    %29 = vector.extract_strided_slice %14 {offsets = [2, 0], sizes = [1, 4], strides = [1, 1]} : vector<4x4xf32> to vector<1x4xf32>
    %30 = vector.broadcast %28 : vector<4x1xf32> to vector<4x4xf32>
    %31 = vector.broadcast %29 : vector<1x4xf32> to vector<4x4xf32>
    %32 = arith.mulf %30, %31 : vector<4x4xf32>
    %33 = arith.addf %27, %32 : vector<4x4xf32>
    %34 = vector.extract_strided_slice %14 {offsets = [0, 3], sizes = [4, 1], strides = [1, 1]} : vector<4x4xf32> to vector<4x1xf32>
    %35 = vector.extract_strided_slice %14 {offsets = [3, 0], sizes = [1, 4], strides = [1, 1]} : vector<4x4xf32> to vector<1x4xf32>
    %36 = vector.broadcast %34 : vector<4x1xf32> to vector<4x4xf32>
    %37 = vector.broadcast %35 : vector<1x4xf32> to vector<4x4xf32>
    %38 = arith.mulf %36, %37 : vector<4x4xf32>
    %39 = arith.addf %33, %38 : vector<4x4xf32>
    %40 = vector.extract_strided_slice %16 {offsets = [0, 0], sizes = [4, 1], strides = [1, 1]} : vector<4x4xf32> to vector<4x1xf32>
    %41 = vector.extract_strided_slice %16 {offsets = [0, 0], sizes = [1, 4], strides = [1, 1]} : vector<4x4xf32> to vector<1x4xf32>
    %42 = vector.broadcast %40 : vector<4x1xf32> to vector<4x4xf32>
    %43 = vector.broadcast %41 : vector<1x4xf32> to vector<4x4xf32>
    %44 = arith.mulf %42, %43 : vector<4x4xf32>
    %45 = vector.extract_strided_slice %16 {offsets = [0, 1], sizes = [4, 1], strides = [1, 1]} : vector<4x4xf32> to vector<4x1xf32>
    %46 = vector.extract_strided_slice %16 {offsets = [1, 0], sizes = [1, 4], strides = [1, 1]} : vector<4x4xf32> to vector<1x4xf32>
    %47 = vector.broadcast %45 : vector<4x1xf32> to vector<4x4xf32>
    %48 = vector.broadcast %46 : vector<1x4xf32> to vector<4x4xf32>
    %49 = arith.mulf %47, %48 : vector<4x4xf32>
    %50 = arith.addf %44, %49 : vector<4x4xf32>
    %51 = vector.extract_strided_slice %16 {offsets = [0, 2], sizes = [4, 1], strides = [1, 1]} : vector<4x4xf32> to vector<4x1xf32>
    %52 = vector.extract_strided_slice %16 {offsets = [2, 0], sizes = [1, 4], strides = [1, 1]} : vector<4x4xf32> to vector<1x4xf32>
    %53 = vector.broadcast %51 : vector<4x1xf32> to vector<4x4xf32>
    %54 = vector.broadcast %52 : vector<1x4xf32> to vector<4x4xf32>
    %55 = arith.mulf %53, %54 : vector<4x4xf32>
    %56 = arith.addf %50, %55 : vector<4x4xf32>
    %57 = vector.extract_strided_slice %16 {offsets = [0, 3], sizes = [4, 1], strides = [1, 1]} : vector<4x4xf32> to vector<4x1xf32>
    %58 = vector.extract_strided_slice %16 {offsets = [3, 0], sizes = [1, 4], strides = [1, 1]} : vector<4x4xf32> to vector<1x4xf32>
    %59 = vector.broadcast %57 : vector<4x1xf32> to vector<4x4xf32>
    %60 = vector.broadcast %58 : vector<1x4xf32> to vector<4x4xf32>
    %61 = arith.mulf %59, %60 : vector<4x4xf32>
    %62 = arith.addf %56, %61 : vector<4x4xf32>
    %63 = arith.addf %14, %16 : vector<4x4xf32>
    %64 = arith.addf %14, %16 : vector<4x4xf32>
    %65 = vector.extract_strided_slice %63 {offsets = [0, 0], sizes = [4, 1], strides = [1, 1]} : vector<4x4xf32> to vector<4x1xf32>
    %66 = vector.extract_strided_slice %64 {offsets = [0, 0], sizes = [1, 4], strides = [1, 1]} : vector<4x4xf32> to vector<1x4xf32>
    %67 = vector.broadcast %65 : vector<4x1xf32> to vector<4x4xf32>
    %68 = vector.broadcast %66 : vector<1x4xf32> to vector<4x4xf32>
    %69 = arith.mulf %67, %68 : vector<4x4xf32>
    %70 = vector.extract_strided_slice %63 {offsets = [0, 1], sizes = [4, 1], strides = [1, 1]} : vector<4x4xf32> to vector<4x1xf32>
    %71 = vector.extract_strided_slice %64 {offsets = [1, 0], sizes = [1, 4], strides = [1, 1]} : vector<4x4xf32> to vector<1x4xf32>
    %72 = vector.broadcast %70 : vector<4x1xf32> to vector<4x4xf32>
    %73 = vector.broadcast %71 : vector<1x4xf32> to vector<4x4xf32>
    %74 = arith.mulf %72, %73 : vector<4x4xf32>
    %75 = arith.addf %69, %74 : vector<4x4xf32>
    %76 = vector.extract_strided_slice %63 {offsets = [0, 2], sizes = [4, 1], strides = [1, 1]} : vector<4x4xf32> to vector<4x1xf32>
    %77 = vector.extract_strided_slice %64 {offsets = [2, 0], sizes = [1, 4], strides = [1, 1]} : vector<4x4xf32> to vector<1x4xf32>
    %78 = vector.broadcast %76 : vector<4x1xf32> to vector<4x4xf32>
    %79 = vector.broadcast %77 : vector<1x4xf32> to vector<4x4xf32>
    %80 = arith.mulf %78, %79 : vector<4x4xf32>
    %81 = arith.addf %75, %80 : vector<4x4xf32>
    %82 = vector.extract_strided_slice %63 {offsets = [0, 3], sizes = [4, 1], strides = [1, 1]} : vector<4x4xf32> to vector<4x1xf32>
    %83 = vector.extract_strided_slice %64 {offsets = [3, 0], sizes = [1, 4], strides = [1, 1]} : vector<4x4xf32> to vector<1x4xf32>
    %84 = vector.broadcast %82 : vector<4x1xf32> to vector<4x4xf32>
    %85 = vector.broadcast %83 : vector<1x4xf32> to vector<4x4xf32>
    %86 = arith.mulf %84, %85 : vector<4x4xf32>
    %87 = arith.addf %81, %86 : vector<4x4xf32>
    %88 = arith.subf %39, %62 : vector<4x4xf32>
    %89 = arith.subf %87, %39 : vector<4x4xf32>
    %90 = arith.subf %89, %62 : vector<4x4xf32>
    %91 = vector.extract_strided_slice %88 {offsets = [0, 0], sizes = [4, 1], strides = [1, 1]} : vector<4x4xf32> to vector<4x1xf32>
    %92 = vector.extract_strided_slice %14 {offsets = [0, 0], sizes = [1, 4], strides = [1, 1]} : vector<4x4xf32> to vector<1x4xf32>
    %93 = vector.broadcast %91 : vector<4x1xf32> to vector<4x4xf32>
    %94 = vector.broadcast %92 : vector<1x4xf32> to vector<4x4xf32>
    %95 = arith.mulf %93, %94 : vector<4x4xf32>
    %96 = vector.extract_strided_slice %88 {offsets = [0, 1], sizes = [4, 1], strides = [1, 1]} : vector<4x4xf32> to vector<4x1xf32>
    %97 = vector.extract_strided_slice %14 {offsets = [1, 0], sizes = [1, 4], strides = [1, 1]} : vector<4x4xf32> to vector<1x4xf32>
    %98 = vector.broadcast %96 : vector<4x1xf32> to vector<4x4xf32>
    %99 = vector.broadcast %97 : vector<1x4xf32> to vector<4x4xf32>
    %100 = arith.mulf %98, %99 : vector<4x4xf32>
    %101 = arith.addf %95, %100 : vector<4x4xf32>
    %102 = vector.extract_strided_slice %88 {offsets = [0, 2], sizes = [4, 1], strides = [1, 1]} : vector<4x4xf32> to vector<4x1xf32>
    %103 = vector.extract_strided_slice %14 {offsets = [2, 0], sizes = [1, 4], strides = [1, 1]} : vector<4x4xf32> to vector<1x4xf32>
    %104 = vector.broadcast %102 : vector<4x1xf32> to vector<4x4xf32>
    %105 = vector.broadcast %103 : vector<1x4xf32> to vector<4x4xf32>
    %106 = arith.mulf %104, %105 : vector<4x4xf32>
    %107 = arith.addf %101, %106 : vector<4x4xf32>
    %108 = vector.extract_strided_slice %88 {offsets = [0, 3], sizes = [4, 1], strides = [1, 1]} : vector<4x4xf32> to vector<4x1xf32>
    %109 = vector.extract_strided_slice %14 {offsets = [3, 0], sizes = [1, 4], strides = [1, 1]} : vector<4x4xf32> to vector<1x4xf32>
    %110 = vector.broadcast %108 : vector<4x1xf32> to vector<4x4xf32>
    %111 = vector.broadcast %109 : vector<1x4xf32> to vector<4x4xf32>
    %112 = arith.mulf %110, %111 : vector<4x4xf32>
    %113 = arith.addf %107, %112 : vector<4x4xf32>
    %114 = vector.extract_strided_slice %90 {offsets = [0, 0], sizes = [4, 1], strides = [1, 1]} : vector<4x4xf32> to vector<4x1xf32>
    %115 = vector.extract_strided_slice %16 {offsets = [0, 0], sizes = [1, 4], strides = [1, 1]} : vector<4x4xf32> to vector<1x4xf32>
    %116 = vector.broadcast %114 : vector<4x1xf32> to vector<4x4xf32>
    %117 = vector.broadcast %115 : vector<1x4xf32> to vector<4x4xf32>
    %118 = arith.mulf %116, %117 : vector<4x4xf32>
    %119 = vector.extract_strided_slice %90 {offsets = [0, 1], sizes = [4, 1], strides = [1, 1]} : vector<4x4xf32> to vector<4x1xf32>
    %120 = vector.extract_strided_slice %16 {offsets = [1, 0], sizes = [1, 4], strides = [1, 1]} : vector<4x4xf32> to vector<1x4xf32>
    %121 = vector.broadcast %119 : vector<4x1xf32> to vector<4x4xf32>
    %122 = vector.broadcast %120 : vector<1x4xf32> to vector<4x4xf32>
    %123 = arith.mulf %121, %122 : vector<4x4xf32>
    %124 = arith.addf %118, %123 : vector<4x4xf32>
    %125 = vector.extract_strided_slice %90 {offsets = [0, 2], sizes = [4, 1], strides = [1, 1]} : vector<4x4xf32> to vector<4x1xf32>
    %126 = vector.extract_strided_slice %16 {offsets = [2, 0], sizes = [1, 4], strides = [1, 1]} : vector<4x4xf32> to vector<1x4xf32>
    %127 = vector.broadcast %125 : vector<4x1xf32> to vector<4x4xf32>
    %128 = vector.broadcast %126 : vector<1x4xf32> to vector<4x4xf32>
    %129 = arith.mulf %127, %128 : vector<4x4xf32>
    %130 = arith.addf %124, %129 : vector<4x4xf32>
    %131 = vector.extract_strided_slice %90 {offsets = [0, 3], sizes = [4, 1], strides = [1, 1]} : vector<4x4xf32> to vector<4x1xf32>
    %132 = vector.extract_strided_slice %16 {offsets = [3, 0], sizes = [1, 4], strides = [1, 1]} : vector<4x4xf32> to vector<1x4xf32>
    %133 = vector.broadcast %131 : vector<4x1xf32> to vector<4x4xf32>
    %134 = vector.broadcast %132 : vector<1x4xf32> to vector<4x4xf32>
    %135 = arith.mulf %133, %134 : vector<4x4xf32>
    %136 = arith.addf %130, %135 : vector<4x4xf32>
    %137 = arith.addf %88, %90 : vector<4x4xf32>
    %138 = arith.addf %14, %16 : vector<4x4xf32>
    %139 = vector.extract_strided_slice %137 {offsets = [0, 0], sizes = [4, 1], strides = [1, 1]} : vector<4x4xf32> to vector<4x1xf32>
    %140 = vector.extract_strided_slice %138 {offsets = [0, 0], sizes = [1, 4], strides = [1, 1]} : vector<4x4xf32> to vector<1x4xf32>
    %141 = vector.broadcast %139 : vector<4x1xf32> to vector<4x4xf32>
    %142 = vector.broadcast %140 : vector<1x4xf32> to vector<4x4xf32>
    %143 = arith.mulf %141, %142 : vector<4x4xf32>
    %144 = vector.extract_strided_slice %137 {offsets = [0, 1], sizes = [4, 1], strides = [1, 1]} : vector<4x4xf32> to vector<4x1xf32>
    %145 = vector.extract_strided_slice %138 {offsets = [1, 0], sizes = [1, 4], strides = [1, 1]} : vector<4x4xf32> to vector<1x4xf32>
    %146 = vector.broadcast %144 : vector<4x1xf32> to vector<4x4xf32>
    %147 = vector.broadcast %145 : vector<1x4xf32> to vector<4x4xf32>
    %148 = arith.mulf %146, %147 : vector<4x4xf32>
    %149 = arith.addf %143, %148 : vector<4x4xf32>
    %150 = vector.extract_strided_slice %137 {offsets = [0, 2], sizes = [4, 1], strides = [1, 1]} : vector<4x4xf32> to vector<4x1xf32>
    %151 = vector.extract_strided_slice %138 {offsets = [2, 0], sizes = [1, 4], strides = [1, 1]} : vector<4x4xf32> to vector<1x4xf32>
    %152 = vector.broadcast %150 : vector<4x1xf32> to vector<4x4xf32>
    %153 = vector.broadcast %151 : vector<1x4xf32> to vector<4x4xf32>
    %154 = arith.mulf %152, %153 : vector<4x4xf32>
    %155 = arith.addf %149, %154 : vector<4x4xf32>
    %156 = vector.extract_strided_slice %137 {offsets = [0, 3], sizes = [4, 1], strides = [1, 1]} : vector<4x4xf32> to vector<4x1xf32>
    %157 = vector.extract_strided_slice %138 {offsets = [3, 0], sizes = [1, 4], strides = [1, 1]} : vector<4x4xf32> to vector<1x4xf32>
    %158 = vector.broadcast %156 : vector<4x1xf32> to vector<4x4xf32>
    %159 = vector.broadcast %157 : vector<1x4xf32> to vector<4x4xf32>
    %160 = arith.mulf %158, %159 : vector<4x4xf32>
    %161 = arith.addf %155, %160 : vector<4x4xf32>
    %162 = arith.subf %113, %136 : vector<4x4xf32>
    %163 = arith.subf %161, %113 : vector<4x4xf32>
    %164 = arith.subf %163, %136 : vector<4x4xf32>
    %165 = vector.extract_strided_slice %88 {offsets = [0, 0], sizes = [4, 1], strides = [1, 1]} : vector<4x4xf32> to vector<4x1xf32>
    %166 = vector.extract_strided_slice %88 {offsets = [0, 0], sizes = [1, 4], strides = [1, 1]} : vector<4x4xf32> to vector<1x4xf32>
    %167 = vector.broadcast %165 : vector<4x1xf32> to vector<4x4xf32>
    %168 = vector.broadcast %166 : vector<1x4xf32> to vector<4x4xf32>
    %169 = arith.mulf %167, %168 : vector<4x4xf32>
    %170 = vector.extract_strided_slice %88 {offsets = [0, 1], sizes = [4, 1], strides = [1, 1]} : vector<4x4xf32> to vector<4x1xf32>
    %171 = vector.extract_strided_slice %88 {offsets = [1, 0], sizes = [1, 4], strides = [1, 1]} : vector<4x4xf32> to vector<1x4xf32>
    %172 = vector.broadcast %170 : vector<4x1xf32> to vector<4x4xf32>
    %173 = vector.broadcast %171 : vector<1x4xf32> to vector<4x4xf32>
    %174 = arith.mulf %172, %173 : vector<4x4xf32>
    %175 = arith.addf %169, %174 : vector<4x4xf32>
    %176 = vector.extract_strided_slice %88 {offsets = [0, 2], sizes = [4, 1], strides = [1, 1]} : vector<4x4xf32> to vector<4x1xf32>
    %177 = vector.extract_strided_slice %88 {offsets = [2, 0], sizes = [1, 4], strides = [1, 1]} : vector<4x4xf32> to vector<1x4xf32>
    %178 = vector.broadcast %176 : vector<4x1xf32> to vector<4x4xf32>
    %179 = vector.broadcast %177 : vector<1x4xf32> to vector<4x4xf32>
    %180 = arith.mulf %178, %179 : vector<4x4xf32>
    %181 = arith.addf %175, %180 : vector<4x4xf32>
    %182 = vector.extract_strided_slice %88 {offsets = [0, 3], sizes = [4, 1], strides = [1, 1]} : vector<4x4xf32> to vector<4x1xf32>
    %183 = vector.extract_strided_slice %88 {offsets = [3, 0], sizes = [1, 4], strides = [1, 1]} : vector<4x4xf32> to vector<1x4xf32>
    %184 = vector.broadcast %182 : vector<4x1xf32> to vector<4x4xf32>
    %185 = vector.broadcast %183 : vector<1x4xf32> to vector<4x4xf32>
    %186 = arith.mulf %184, %185 : vector<4x4xf32>
    %187 = arith.addf %181, %186 : vector<4x4xf32>
    %188 = vector.extract_strided_slice %90 {offsets = [0, 0], sizes = [4, 1], strides = [1, 1]} : vector<4x4xf32> to vector<4x1xf32>
    %189 = vector.extract_strided_slice %90 {offsets = [0, 0], sizes = [1, 4], strides = [1, 1]} : vector<4x4xf32> to vector<1x4xf32>
    %190 = vector.broadcast %188 : vector<4x1xf32> to vector<4x4xf32>
    %191 = vector.broadcast %189 : vector<1x4xf32> to vector<4x4xf32>
    %192 = arith.mulf %190, %191 : vector<4x4xf32>
    %193 = vector.extract_strided_slice %90 {offsets = [0, 1], sizes = [4, 1], strides = [1, 1]} : vector<4x4xf32> to vector<4x1xf32>
    %194 = vector.extract_strided_slice %90 {offsets = [1, 0], sizes = [1, 4], strides = [1, 1]} : vector<4x4xf32> to vector<1x4xf32>
    %195 = vector.broadcast %193 : vector<4x1xf32> to vector<4x4xf32>
    %196 = vector.broadcast %194 : vector<1x4xf32> to vector<4x4xf32>
    %197 = arith.mulf %195, %196 : vector<4x4xf32>
    %198 = arith.addf %192, %197 : vector<4x4xf32>
    %199 = vector.extract_strided_slice %90 {offsets = [0, 2], sizes = [4, 1], strides = [1, 1]} : vector<4x4xf32> to vector<4x1xf32>
    %200 = vector.extract_strided_slice %90 {offsets = [2, 0], sizes = [1, 4], strides = [1, 1]} : vector<4x4xf32> to vector<1x4xf32>
    %201 = vector.broadcast %199 : vector<4x1xf32> to vector<4x4xf32>
    %202 = vector.broadcast %200 : vector<1x4xf32> to vector<4x4xf32>
    %203 = arith.mulf %201, %202 : vector<4x4xf32>
    %204 = arith.addf %198, %203 : vector<4x4xf32>
    %205 = vector.extract_strided_slice %90 {offsets = [0, 3], sizes = [4, 1], strides = [1, 1]} : vector<4x4xf32> to vector<4x1xf32>
    %206 = vector.extract_strided_slice %90 {offsets = [3, 0], sizes = [1, 4], strides = [1, 1]} : vector<4x4xf32> to vector<1x4xf32>
    %207 = vector.broadcast %205 : vector<4x1xf32> to vector<4x4xf32>
    %208 = vector.broadcast %206 : vector<1x4xf32> to vector<4x4xf32>
    %209 = arith.mulf %207, %208 : vector<4x4xf32>
    %210 = arith.addf %204, %209 : vector<4x4xf32>
    %211 = arith.addf %88, %90 : vector<4x4xf32>
    %212 = arith.addf %88, %90 : vector<4x4xf32>
    %213 = vector.extract_strided_slice %211 {offsets = [0, 0], sizes = [4, 1], strides = [1, 1]} : vector<4x4xf32> to vector<4x1xf32>
    %214 = vector.extract_strided_slice %212 {offsets = [0, 0], sizes = [1, 4], strides = [1, 1]} : vector<4x4xf32> to vector<1x4xf32>
    %215 = vector.broadcast %213 : vector<4x1xf32> to vector<4x4xf32>
    %216 = vector.broadcast %214 : vector<1x4xf32> to vector<4x4xf32>
    %217 = arith.mulf %215, %216 : vector<4x4xf32>
    %218 = vector.extract_strided_slice %211 {offsets = [0, 1], sizes = [4, 1], strides = [1, 1]} : vector<4x4xf32> to vector<4x1xf32>
    %219 = vector.extract_strided_slice %212 {offsets = [1, 0], sizes = [1, 4], strides = [1, 1]} : vector<4x4xf32> to vector<1x4xf32>
    %220 = vector.broadcast %218 : vector<4x1xf32> to vector<4x4xf32>
    %221 = vector.broadcast %219 : vector<1x4xf32> to vector<4x4xf32>
    %222 = arith.mulf %220, %221 : vector<4x4xf32>
    %223 = arith.addf %217, %222 : vector<4x4xf32>
    %224 = vector.extract_strided_slice %211 {offsets = [0, 2], sizes = [4, 1], strides = [1, 1]} : vector<4x4xf32> to vector<4x1xf32>
    %225 = vector.extract_strided_slice %212 {offsets = [2, 0], sizes = [1, 4], strides = [1, 1]} : vector<4x4xf32> to vector<1x4xf32>
    %226 = vector.broadcast %224 : vector<4x1xf32> to vector<4x4xf32>
    %227 = vector.broadcast %225 : vector<1x4xf32> to vector<4x4xf32>
    %228 = arith.mulf %226, %227 : vector<4x4xf32>
    %229 = arith.addf %223, %228 : vector<4x4xf32>
    %230 = vector.extract_strided_slice %211 {offsets = [0, 3], sizes = [4, 1], strides = [1, 1]} : vector<4x4xf32> to vector<4x1xf32>
    %231 = vector.extract_strided_slice %212 {offsets = [3, 0], sizes = [1, 4], strides = [1, 1]} : vector<4x4xf32> to vector<1x4xf32>
    %232 = vector.broadcast %230 : vector<4x1xf32> to vector<4x4xf32>
    %233 = vector.broadcast %231 : vector<1x4xf32> to vector<4x4xf32>
    %234 = arith.mulf %232, %233 : vector<4x4xf32>
    %235 = arith.addf %229, %234 : vector<4x4xf32>
    %236 = arith.subf %187, %210 : vector<4x4xf32>
    %237 = arith.subf %235, %187 : vector<4x4xf32>
    %238 = arith.subf %237, %210 : vector<4x4xf32>
    %c0_7 = arith.constant 0 : index
    %c0_8 = arith.constant 0 : index
    %c0_9 = arith.constant 0 : index
    %c0_10 = arith.constant 0 : index
    %239 = vector.load %arg4[%c0_7, %c0_8, %c0_9, %c0_10] : memref<2x1x4x16xf32, #tpu.memory_space<vmem>>, vector<1x1x4x16xf32>
    %240 = vector.shape_cast %239 : vector<1x1x4x16xf32> to vector<4x16xf32>
    %c1_11 = arith.constant 1 : index
    %c0_12 = arith.constant 0 : index
    %c0_13 = arith.constant 0 : index
    %c0_14 = arith.constant 0 : index
    %241 = vector.load %arg4[%c1_11, %c0_12, %c0_13, %c0_14] : memref<2x1x4x16xf32, #tpu.memory_space<vmem>>, vector<1x1x4x16xf32>
    %242 = vector.shape_cast %241 : vector<1x1x4x16xf32> to vector<4x16xf32>
    %243 = arith.mulf %9, %9 : f32
    %244 = arith.mulf %12, %12 : f32
    %245 = arith.subf %243, %244 : f32
    %cst_15 = arith.constant 2.000000e+00 : f32
    %246 = arith.mulf %cst_15, %9 : f32
    %247 = arith.mulf %246, %12 : f32
    %248 = arith.mulf %245, %9 : f32
    %249 = arith.mulf %247, %12 : f32
    %250 = arith.subf %248, %249 : f32
    %251 = arith.mulf %245, %12 : f32
    %252 = arith.mulf %247, %9 : f32
    %253 = arith.addf %251, %252 : f32
    %254 = arith.mulf %245, %245 : f32
    %255 = arith.mulf %247, %247 : f32
    %256 = arith.subf %254, %255 : f32
    %cst_16 = arith.constant 2.000000e+00 : f32
    %257 = arith.mulf %cst_16, %245 : f32
    %258 = arith.mulf %257, %247 : f32
    %259 = vector.broadcast %9 : f32 to vector<4x4xf32>
    %260 = arith.mulf %259, %14 : vector<4x4xf32>
    %261 = vector.broadcast %12 : f32 to vector<4x4xf32>
    %262 = arith.mulf %261, %16 : vector<4x4xf32>
    %263 = arith.subf %260, %262 : vector<4x4xf32>
    %264 = vector.broadcast %9 : f32 to vector<4x4xf32>
    %265 = arith.mulf %264, %16 : vector<4x4xf32>
    %266 = vector.broadcast %12 : f32 to vector<4x4xf32>
    %267 = arith.mulf %266, %14 : vector<4x4xf32>
    %268 = arith.addf %265, %267 : vector<4x4xf32>
    %269 = vector.broadcast %245 : f32 to vector<4x4xf32>
    %270 = arith.mulf %269, %88 : vector<4x4xf32>
    %271 = vector.broadcast %247 : f32 to vector<4x4xf32>
    %272 = arith.mulf %271, %90 : vector<4x4xf32>
    %273 = arith.subf %270, %272 : vector<4x4xf32>
    %274 = vector.broadcast %245 : f32 to vector<4x4xf32>
    %275 = arith.mulf %274, %90 : vector<4x4xf32>
    %276 = vector.broadcast %247 : f32 to vector<4x4xf32>
    %277 = arith.mulf %276, %88 : vector<4x4xf32>
    %278 = arith.addf %275, %277 : vector<4x4xf32>
    %279 = vector.broadcast %250 : f32 to vector<4x4xf32>
    %280 = arith.mulf %279, %162 : vector<4x4xf32>
    %281 = vector.broadcast %253 : f32 to vector<4x4xf32>
    %282 = arith.mulf %281, %164 : vector<4x4xf32>
    %283 = arith.subf %280, %282 : vector<4x4xf32>
    %284 = vector.broadcast %250 : f32 to vector<4x4xf32>
    %285 = arith.mulf %284, %164 : vector<4x4xf32>
    %286 = vector.broadcast %253 : f32 to vector<4x4xf32>
    %287 = arith.mulf %286, %162 : vector<4x4xf32>
    %288 = arith.addf %285, %287 : vector<4x4xf32>
    %289 = vector.broadcast %256 : f32 to vector<4x4xf32>
    %290 = arith.mulf %289, %236 : vector<4x4xf32>
    %291 = vector.broadcast %258 : f32 to vector<4x4xf32>
    %292 = arith.mulf %291, %238 : vector<4x4xf32>
    %293 = arith.subf %290, %292 : vector<4x4xf32>
    %294 = vector.broadcast %256 : f32 to vector<4x4xf32>
    %295 = arith.mulf %294, %238 : vector<4x4xf32>
    %296 = vector.broadcast %258 : f32 to vector<4x4xf32>
    %297 = arith.mulf %296, %236 : vector<4x4xf32>
    %298 = arith.addf %295, %297 : vector<4x4xf32>
    %cst_17 = arith.constant 1.000000e+00 : f32
    %299 = vector.broadcast %cst_17 : f32 to vector<4x4xf32>
    %300 = arith.mulf %299, %4 : vector<4x4xf32>
    %cst_18 = arith.constant 1.000000e+00 : f32
    %301 = vector.broadcast %cst_18 : f32 to vector<4x4xf32>
    %302 = arith.mulf %301, %263 : vector<4x4xf32>
    %303 = arith.addf %300, %302 : vector<4x4xf32>
    %cst_19 = arith.constant 5.000000e-01 : f32
    %304 = vector.broadcast %cst_19 : f32 to vector<4x4xf32>
    %305 = arith.mulf %304, %273 : vector<4x4xf32>
    %306 = arith.addf %303, %305 : vector<4x4xf32>
    %cst_20 = arith.constant 0.166666672 : f32
    %307 = vector.broadcast %cst_20 : f32 to vector<4x4xf32>
    %308 = arith.mulf %307, %283 : vector<4x4xf32>
    %309 = arith.addf %306, %308 : vector<4x4xf32>
    %cst_21 = arith.constant 1.000000e+00 : f32
    %310 = vector.broadcast %cst_21 : f32 to vector<4x4xf32>
    %311 = arith.mulf %310, %268 : vector<4x4xf32>
    %cst_22 = arith.constant 5.000000e-01 : f32
    %312 = vector.broadcast %cst_22 : f32 to vector<4x4xf32>
    %313 = arith.mulf %312, %278 : vector<4x4xf32>
    %314 = arith.addf %311, %313 : vector<4x4xf32>
    %cst_23 = arith.constant 0.166666672 : f32
    %315 = vector.broadcast %cst_23 : f32 to vector<4x4xf32>
    %316 = arith.mulf %315, %288 : vector<4x4xf32>
    %317 = arith.addf %314, %316 : vector<4x4xf32>
    %cst_24 = arith.constant 0.0416666679 : f32
    %318 = vector.broadcast %cst_24 : f32 to vector<4x4xf32>
    %319 = arith.mulf %318, %4 : vector<4x4xf32>
    %cst_25 = arith.constant 0.00833333377 : f32
    %320 = vector.broadcast %cst_25 : f32 to vector<4x4xf32>
    %321 = arith.mulf %320, %263 : vector<4x4xf32>
    %322 = arith.addf %319, %321 : vector<4x4xf32>
    %cst_26 = arith.constant 0.00138888892 : f32
    %323 = vector.broadcast %cst_26 : f32 to vector<4x4xf32>
    %324 = arith.mulf %323, %273 : vector<4x4xf32>
    %325 = arith.addf %322, %324 : vector<4x4xf32>
    %cst_27 = arith.constant 1.98412701E-4 : f32
    %326 = vector.broadcast %cst_27 : f32 to vector<4x4xf32>
    %327 = arith.mulf %326, %283 : vector<4x4xf32>
    %328 = arith.addf %325, %327 : vector<4x4xf32>
    %cst_28 = arith.constant 0.00833333377 : f32
    %329 = vector.broadcast %cst_28 : f32 to vector<4x4xf32>
    %330 = arith.mulf %329, %268 : vector<4x4xf32>
    %cst_29 = arith.constant 0.00138888892 : f32
    %331 = vector.broadcast %cst_29 : f32 to vector<4x4xf32>
    %332 = arith.mulf %331, %278 : vector<4x4xf32>
    %333 = arith.addf %330, %332 : vector<4x4xf32>
    %cst_30 = arith.constant 1.98412701E-4 : f32
    %334 = vector.broadcast %cst_30 : f32 to vector<4x4xf32>
    %335 = arith.mulf %334, %288 : vector<4x4xf32>
    %336 = arith.addf %333, %335 : vector<4x4xf32>
    %cst_31 = arith.constant 2.48015876E-5 : f32
    %337 = vector.broadcast %cst_31 : f32 to vector<4x4xf32>
    %338 = arith.mulf %337, %4 : vector<4x4xf32>
    %cst_32 = arith.constant 2.75573188E-6 : f32
    %339 = vector.broadcast %cst_32 : f32 to vector<4x4xf32>
    %340 = arith.mulf %339, %263 : vector<4x4xf32>
    %341 = arith.addf %338, %340 : vector<4x4xf32>
    %cst_33 = arith.constant 2.755732E-7 : f32
    %342 = vector.broadcast %cst_33 : f32 to vector<4x4xf32>
    %343 = arith.mulf %342, %273 : vector<4x4xf32>
    %344 = arith.addf %341, %343 : vector<4x4xf32>
    %cst_34 = arith.constant 2.50521079E-8 : f32
    %345 = vector.broadcast %cst_34 : f32 to vector<4x4xf32>
    %346 = arith.mulf %345, %283 : vector<4x4xf32>
    %347 = arith.addf %344, %346 : vector<4x4xf32>
    %cst_35 = arith.constant 2.75573188E-6 : f32
    %348 = vector.broadcast %cst_35 : f32 to vector<4x4xf32>
    %349 = arith.mulf %348, %268 : vector<4x4xf32>
    %cst_36 = arith.constant 2.755732E-7 : f32
    %350 = vector.broadcast %cst_36 : f32 to vector<4x4xf32>
    %351 = arith.mulf %350, %278 : vector<4x4xf32>
    %352 = arith.addf %349, %351 : vector<4x4xf32>
    %cst_37 = arith.constant 2.50521079E-8 : f32
    %353 = vector.broadcast %cst_37 : f32 to vector<4x4xf32>
    %354 = arith.mulf %353, %288 : vector<4x4xf32>
    %355 = arith.addf %352, %354 : vector<4x4xf32>
    %cst_38 = arith.constant 2.08767559E-9 : f32
    %356 = vector.broadcast %cst_38 : f32 to vector<4x4xf32>
    %357 = arith.mulf %356, %4 : vector<4x4xf32>
    %cst_39 = arith.constant 1.60590444E-10 : f32
    %358 = vector.broadcast %cst_39 : f32 to vector<4x4xf32>
    %359 = arith.mulf %358, %263 : vector<4x4xf32>
    %360 = arith.addf %357, %359 : vector<4x4xf32>
    %cst_40 = arith.constant 1.14707454E-11 : f32
    %361 = vector.broadcast %cst_40 : f32 to vector<4x4xf32>
    %362 = arith.mulf %361, %273 : vector<4x4xf32>
    %363 = arith.addf %360, %362 : vector<4x4xf32>
    %cst_41 = arith.constant 7.6471636E-13 : f32
    %364 = vector.broadcast %cst_41 : f32 to vector<4x4xf32>
    %365 = arith.mulf %364, %283 : vector<4x4xf32>
    %366 = arith.addf %363, %365 : vector<4x4xf32>
    %cst_42 = arith.constant 1.60590444E-10 : f32
    %367 = vector.broadcast %cst_42 : f32 to vector<4x4xf32>
    %368 = arith.mulf %367, %268 : vector<4x4xf32>
    %cst_43 = arith.constant 1.14707454E-11 : f32
    %369 = vector.broadcast %cst_43 : f32 to vector<4x4xf32>
    %370 = arith.mulf %369, %278 : vector<4x4xf32>
    %371 = arith.addf %368, %370 : vector<4x4xf32>
    %cst_44 = arith.constant 7.6471636E-13 : f32
    %372 = vector.broadcast %cst_44 : f32 to vector<4x4xf32>
    %373 = arith.mulf %372, %288 : vector<4x4xf32>
    %374 = arith.addf %371, %373 : vector<4x4xf32>
    %cst_45 = arith.constant 4.77947726E-14 : f32
    %375 = vector.broadcast %cst_45 : f32 to vector<4x4xf32>
    %376 = arith.mulf %375, %293 : vector<4x4xf32>
    %377 = arith.addf %376, %366 : vector<4x4xf32>
    %cst_46 = arith.constant 4.77947726E-14 : f32
    %378 = vector.broadcast %cst_46 : f32 to vector<4x4xf32>
    %379 = arith.mulf %378, %298 : vector<4x4xf32>
    %380 = arith.addf %379, %374 : vector<4x4xf32>
    %381 = vector.extract_strided_slice %377 {offsets = [0, 0], sizes = [4, 1], strides = [1, 1]} : vector<4x4xf32> to vector<4x1xf32>
    %382 = vector.extract_strided_slice %293 {offsets = [0, 0], sizes = [1, 4], strides = [1, 1]} : vector<4x4xf32> to vector<1x4xf32>
    %383 = vector.broadcast %381 : vector<4x1xf32> to vector<4x4xf32>
    %384 = vector.broadcast %382 : vector<1x4xf32> to vector<4x4xf32>
    %385 = arith.mulf %383, %384 : vector<4x4xf32>
    %386 = vector.extract_strided_slice %377 {offsets = [0, 1], sizes = [4, 1], strides = [1, 1]} : vector<4x4xf32> to vector<4x1xf32>
    %387 = vector.extract_strided_slice %293 {offsets = [1, 0], sizes = [1, 4], strides = [1, 1]} : vector<4x4xf32> to vector<1x4xf32>
    %388 = vector.broadcast %386 : vector<4x1xf32> to vector<4x4xf32>
    %389 = vector.broadcast %387 : vector<1x4xf32> to vector<4x4xf32>
    %390 = arith.mulf %388, %389 : vector<4x4xf32>
    %391 = arith.addf %385, %390 : vector<4x4xf32>
    %392 = vector.extract_strided_slice %377 {offsets = [0, 2], sizes = [4, 1], strides = [1, 1]} : vector<4x4xf32> to vector<4x1xf32>
    %393 = vector.extract_strided_slice %293 {offsets = [2, 0], sizes = [1, 4], strides = [1, 1]} : vector<4x4xf32> to vector<1x4xf32>
    %394 = vector.broadcast %392 : vector<4x1xf32> to vector<4x4xf32>
    %395 = vector.broadcast %393 : vector<1x4xf32> to vector<4x4xf32>
    %396 = arith.mulf %394, %395 : vector<4x4xf32>
    %397 = arith.addf %391, %396 : vector<4x4xf32>
    %398 = vector.extract_strided_slice %377 {offsets = [0, 3], sizes = [4, 1], strides = [1, 1]} : vector<4x4xf32> to vector<4x1xf32>
    %399 = vector.extract_strided_slice %293 {offsets = [3, 0], sizes = [1, 4], strides = [1, 1]} : vector<4x4xf32> to vector<1x4xf32>
    %400 = vector.broadcast %398 : vector<4x1xf32> to vector<4x4xf32>
    %401 = vector.broadcast %399 : vector<1x4xf32> to vector<4x4xf32>
    %402 = arith.mulf %400, %401 : vector<4x4xf32>
    %403 = arith.addf %397, %402 : vector<4x4xf32>
    %404 = vector.extract_strided_slice %380 {offsets = [0, 0], sizes = [4, 1], strides = [1, 1]} : vector<4x4xf32> to vector<4x1xf32>
    %405 = vector.extract_strided_slice %298 {offsets = [0, 0], sizes = [1, 4], strides = [1, 1]} : vector<4x4xf32> to vector<1x4xf32>
    %406 = vector.broadcast %404 : vector<4x1xf32> to vector<4x4xf32>
    %407 = vector.broadcast %405 : vector<1x4xf32> to vector<4x4xf32>
    %408 = arith.mulf %406, %407 : vector<4x4xf32>
    %409 = vector.extract_strided_slice %380 {offsets = [0, 1], sizes = [4, 1], strides = [1, 1]} : vector<4x4xf32> to vector<4x1xf32>
    %410 = vector.extract_strided_slice %298 {offsets = [1, 0], sizes = [1, 4], strides = [1, 1]} : vector<4x4xf32> to vector<1x4xf32>
    %411 = vector.broadcast %409 : vector<4x1xf32> to vector<4x4xf32>
    %412 = vector.broadcast %410 : vector<1x4xf32> to vector<4x4xf32>
    %413 = arith.mulf %411, %412 : vector<4x4xf32>
    %414 = arith.addf %408, %413 : vector<4x4xf32>
    %415 = vector.extract_strided_slice %380 {offsets = [0, 2], sizes = [4, 1], strides = [1, 1]} : vector<4x4xf32> to vector<4x1xf32>
    %416 = vector.extract_strided_slice %298 {offsets = [2, 0], sizes = [1, 4], strides = [1, 1]} : vector<4x4xf32> to vector<1x4xf32>
    %417 = vector.broadcast %415 : vector<4x1xf32> to vector<4x4xf32>
    %418 = vector.broadcast %416 : vector<1x4xf32> to vector<4x4xf32>
    %419 = arith.mulf %417, %418 : vector<4x4xf32>
    %420 = arith.addf %414, %419 : vector<4x4xf32>
    %421 = vector.extract_strided_slice %380 {offsets = [0, 3], sizes = [4, 1], strides = [1, 1]} : vector<4x4xf32> to vector<4x1xf32>
    %422 = vector.extract_strided_slice %298 {offsets = [3, 0], sizes = [1, 4], strides = [1, 1]} : vector<4x4xf32> to vector<1x4xf32>
    %423 = vector.broadcast %421 : vector<4x1xf32> to vector<4x4xf32>
    %424 = vector.broadcast %422 : vector<1x4xf32> to vector<4x4xf32>
    %425 = arith.mulf %423, %424 : vector<4x4xf32>
    %426 = arith.addf %420, %425 : vector<4x4xf32>
    %427 = arith.addf %377, %380 : vector<4x4xf32>
    %428 = arith.addf %293, %298 : vector<4x4xf32>
    %429 = vector.extract_strided_slice %427 {offsets = [0, 0], sizes = [4, 1], strides = [1, 1]} : vector<4x4xf32> to vector<4x1xf32>
    %430 = vector.extract_strided_slice %428 {offsets = [0, 0], sizes = [1, 4], strides = [1, 1]} : vector<4x4xf32> to vector<1x4xf32>
    %431 = vector.broadcast %429 : vector<4x1xf32> to vector<4x4xf32>
    %432 = vector.broadcast %430 : vector<1x4xf32> to vector<4x4xf32>
    %433 = arith.mulf %431, %432 : vector<4x4xf32>
    %434 = vector.extract_strided_slice %427 {offsets = [0, 1], sizes = [4, 1], strides = [1, 1]} : vector<4x4xf32> to vector<4x1xf32>
    %435 = vector.extract_strided_slice %428 {offsets = [1, 0], sizes = [1, 4], strides = [1, 1]} : vector<4x4xf32> to vector<1x4xf32>
    %436 = vector.broadcast %434 : vector<4x1xf32> to vector<4x4xf32>
    %437 = vector.broadcast %435 : vector<1x4xf32> to vector<4x4xf32>
    %438 = arith.mulf %436, %437 : vector<4x4xf32>
    %439 = arith.addf %433, %438 : vector<4x4xf32>
    %440 = vector.extract_strided_slice %427 {offsets = [0, 2], sizes = [4, 1], strides = [1, 1]} : vector<4x4xf32> to vector<4x1xf32>
    %441 = vector.extract_strided_slice %428 {offsets = [2, 0], sizes = [1, 4], strides = [1, 1]} : vector<4x4xf32> to vector<1x4xf32>
    %442 = vector.broadcast %440 : vector<4x1xf32> to vector<4x4xf32>
    %443 = vector.broadcast %441 : vector<1x4xf32> to vector<4x4xf32>
    %444 = arith.mulf %442, %443 : vector<4x4xf32>
    %445 = arith.addf %439, %444 : vector<4x4xf32>
    %446 = vector.extract_strided_slice %427 {offsets = [0, 3], sizes = [4, 1], strides = [1, 1]} : vector<4x4xf32> to vector<4x1xf32>
    %447 = vector.extract_strided_slice %428 {offsets = [3, 0], sizes = [1, 4], strides = [1, 1]} : vector<4x4xf32> to vector<1x4xf32>
    %448 = vector.broadcast %446 : vector<4x1xf32> to vector<4x4xf32>
    %449 = vector.broadcast %447 : vector<1x4xf32> to vector<4x4xf32>
    %450 = arith.mulf %448, %449 : vector<4x4xf32>
    %451 = arith.addf %445, %450 : vector<4x4xf32>
    %452 = arith.subf %403, %426 : vector<4x4xf32>
    %453 = arith.subf %451, %403 : vector<4x4xf32>
    %454 = arith.subf %453, %426 : vector<4x4xf32>
    %455 = arith.addf %452, %347 : vector<4x4xf32>
    %456 = arith.addf %454, %355 : vector<4x4xf32>
    %457 = vector.extract_strided_slice %455 {offsets = [0, 0], sizes = [4, 1], strides = [1, 1]} : vector<4x4xf32> to vector<4x1xf32>
    %458 = vector.extract_strided_slice %293 {offsets = [0, 0], sizes = [1, 4], strides = [1, 1]} : vector<4x4xf32> to vector<1x4xf32>
    %459 = vector.broadcast %457 : vector<4x1xf32> to vector<4x4xf32>
    %460 = vector.broadcast %458 : vector<1x4xf32> to vector<4x4xf32>
    %461 = arith.mulf %459, %460 : vector<4x4xf32>
    %462 = vector.extract_strided_slice %455 {offsets = [0, 1], sizes = [4, 1], strides = [1, 1]} : vector<4x4xf32> to vector<4x1xf32>
    %463 = vector.extract_strided_slice %293 {offsets = [1, 0], sizes = [1, 4], strides = [1, 1]} : vector<4x4xf32> to vector<1x4xf32>
    %464 = vector.broadcast %462 : vector<4x1xf32> to vector<4x4xf32>
    %465 = vector.broadcast %463 : vector<1x4xf32> to vector<4x4xf32>
    %466 = arith.mulf %464, %465 : vector<4x4xf32>
    %467 = arith.addf %461, %466 : vector<4x4xf32>
    %468 = vector.extract_strided_slice %455 {offsets = [0, 2], sizes = [4, 1], strides = [1, 1]} : vector<4x4xf32> to vector<4x1xf32>
    %469 = vector.extract_strided_slice %293 {offsets = [2, 0], sizes = [1, 4], strides = [1, 1]} : vector<4x4xf32> to vector<1x4xf32>
    %470 = vector.broadcast %468 : vector<4x1xf32> to vector<4x4xf32>
    %471 = vector.broadcast %469 : vector<1x4xf32> to vector<4x4xf32>
    %472 = arith.mulf %470, %471 : vector<4x4xf32>
    %473 = arith.addf %467, %472 : vector<4x4xf32>
    %474 = vector.extract_strided_slice %455 {offsets = [0, 3], sizes = [4, 1], strides = [1, 1]} : vector<4x4xf32> to vector<4x1xf32>
    %475 = vector.extract_strided_slice %293 {offsets = [3, 0], sizes = [1, 4], strides = [1, 1]} : vector<4x4xf32> to vector<1x4xf32>
    %476 = vector.broadcast %474 : vector<4x1xf32> to vector<4x4xf32>
    %477 = vector.broadcast %475 : vector<1x4xf32> to vector<4x4xf32>
    %478 = arith.mulf %476, %477 : vector<4x4xf32>
    %479 = arith.addf %473, %478 : vector<4x4xf32>
    %480 = vector.extract_strided_slice %456 {offsets = [0, 0], sizes = [4, 1], strides = [1, 1]} : vector<4x4xf32> to vector<4x1xf32>
    %481 = vector.extract_strided_slice %298 {offsets = [0, 0], sizes = [1, 4], strides = [1, 1]} : vector<4x4xf32> to vector<1x4xf32>
    %482 = vector.broadcast %480 : vector<4x1xf32> to vector<4x4xf32>
    %483 = vector.broadcast %481 : vector<1x4xf32> to vector<4x4xf32>
    %484 = arith.mulf %482, %483 : vector<4x4xf32>
    %485 = vector.extract_strided_slice %456 {offsets = [0, 1], sizes = [4, 1], strides = [1, 1]} : vector<4x4xf32> to vector<4x1xf32>
    %486 = vector.extract_strided_slice %298 {offsets = [1, 0], sizes = [1, 4], strides = [1, 1]} : vector<4x4xf32> to vector<1x4xf32>
    %487 = vector.broadcast %485 : vector<4x1xf32> to vector<4x4xf32>
    %488 = vector.broadcast %486 : vector<1x4xf32> to vector<4x4xf32>
    %489 = arith.mulf %487, %488 : vector<4x4xf32>
    %490 = arith.addf %484, %489 : vector<4x4xf32>
    %491 = vector.extract_strided_slice %456 {offsets = [0, 2], sizes = [4, 1], strides = [1, 1]} : vector<4x4xf32> to vector<4x1xf32>
    %492 = vector.extract_strided_slice %298 {offsets = [2, 0], sizes = [1, 4], strides = [1, 1]} : vector<4x4xf32> to vector<1x4xf32>
    %493 = vector.broadcast %491 : vector<4x1xf32> to vector<4x4xf32>
    %494 = vector.broadcast %492 : vector<1x4xf32> to vector<4x4xf32>
    %495 = arith.mulf %493, %494 : vector<4x4xf32>
    %496 = arith.addf %490, %495 : vector<4x4xf32>
    %497 = vector.extract_strided_slice %456 {offsets = [0, 3], sizes = [4, 1], strides = [1, 1]} : vector<4x4xf32> to vector<4x1xf32>
    %498 = vector.extract_strided_slice %298 {offsets = [3, 0], sizes = [1, 4], strides = [1, 1]} : vector<4x4xf32> to vector<1x4xf32>
    %499 = vector.broadcast %497 : vector<4x1xf32> to vector<4x4xf32>
    %500 = vector.broadcast %498 : vector<1x4xf32> to vector<4x4xf32>
    %501 = arith.mulf %499, %500 : vector<4x4xf32>
    %502 = arith.addf %496, %501 : vector<4x4xf32>
    %503 = arith.addf %455, %456 : vector<4x4xf32>
    %504 = arith.addf %293, %298 : vector<4x4xf32>
    %505 = vector.extract_strided_slice %503 {offsets = [0, 0], sizes = [4, 1], strides = [1, 1]} : vector<4x4xf32> to vector<4x1xf32>
    %506 = vector.extract_strided_slice %504 {offsets = [0, 0], sizes = [1, 4], strides = [1, 1]} : vector<4x4xf32> to vector<1x4xf32>
    %507 = vector.broadcast %505 : vector<4x1xf32> to vector<4x4xf32>
    %508 = vector.broadcast %506 : vector<1x4xf32> to vector<4x4xf32>
    %509 = arith.mulf %507, %508 : vector<4x4xf32>
    %510 = vector.extract_strided_slice %503 {offsets = [0, 1], sizes = [4, 1], strides = [1, 1]} : vector<4x4xf32> to vector<4x1xf32>
    %511 = vector.extract_strided_slice %504 {offsets = [1, 0], sizes = [1, 4], strides = [1, 1]} : vector<4x4xf32> to vector<1x4xf32>
    %512 = vector.broadcast %510 : vector<4x1xf32> to vector<4x4xf32>
    %513 = vector.broadcast %511 : vector<1x4xf32> to vector<4x4xf32>
    %514 = arith.mulf %512, %513 : vector<4x4xf32>
    %515 = arith.addf %509, %514 : vector<4x4xf32>
    %516 = vector.extract_strided_slice %503 {offsets = [0, 2], sizes = [4, 1], strides = [1, 1]} : vector<4x4xf32> to vector<4x1xf32>
    %517 = vector.extract_strided_slice %504 {offsets = [2, 0], sizes = [1, 4], strides = [1, 1]} : vector<4x4xf32> to vector<1x4xf32>
    %518 = vector.broadcast %516 : vector<4x1xf32> to vector<4x4xf32>
    %519 = vector.broadcast %517 : vector<1x4xf32> to vector<4x4xf32>
    %520 = arith.mulf %518, %519 : vector<4x4xf32>
    %521 = arith.addf %515, %520 : vector<4x4xf32>
    %522 = vector.extract_strided_slice %503 {offsets = [0, 3], sizes = [4, 1], strides = [1, 1]} : vector<4x4xf32> to vector<4x1xf32>
    %523 = vector.extract_strided_slice %504 {offsets = [3, 0], sizes = [1, 4], strides = [1, 1]} : vector<4x4xf32> to vector<1x4xf32>
    %524 = vector.broadcast %522 : vector<4x1xf32> to vector<4x4xf32>
    %525 = vector.broadcast %523 : vector<1x4xf32> to vector<4x4xf32>
    %526 = arith.mulf %524, %525 : vector<4x4xf32>
    %527 = arith.addf %521, %526 : vector<4x4xf32>
    %528 = arith.subf %479, %502 : vector<4x4xf32>
    %529 = arith.subf %527, %479 : vector<4x4xf32>
    %530 = arith.subf %529, %502 : vector<4x4xf32>
    %531 = arith.addf %528, %328 : vector<4x4xf32>
    %532 = arith.addf %530, %336 : vector<4x4xf32>
    %533 = vector.extract_strided_slice %531 {offsets = [0, 0], sizes = [4, 1], strides = [1, 1]} : vector<4x4xf32> to vector<4x1xf32>
    %534 = vector.extract_strided_slice %293 {offsets = [0, 0], sizes = [1, 4], strides = [1, 1]} : vector<4x4xf32> to vector<1x4xf32>
    %535 = vector.broadcast %533 : vector<4x1xf32> to vector<4x4xf32>
    %536 = vector.broadcast %534 : vector<1x4xf32> to vector<4x4xf32>
    %537 = arith.mulf %535, %536 : vector<4x4xf32>
    %538 = vector.extract_strided_slice %531 {offsets = [0, 1], sizes = [4, 1], strides = [1, 1]} : vector<4x4xf32> to vector<4x1xf32>
    %539 = vector.extract_strided_slice %293 {offsets = [1, 0], sizes = [1, 4], strides = [1, 1]} : vector<4x4xf32> to vector<1x4xf32>
    %540 = vector.broadcast %538 : vector<4x1xf32> to vector<4x4xf32>
    %541 = vector.broadcast %539 : vector<1x4xf32> to vector<4x4xf32>
    %542 = arith.mulf %540, %541 : vector<4x4xf32>
    %543 = arith.addf %537, %542 : vector<4x4xf32>
    %544 = vector.extract_strided_slice %531 {offsets = [0, 2], sizes = [4, 1], strides = [1, 1]} : vector<4x4xf32> to vector<4x1xf32>
    %545 = vector.extract_strided_slice %293 {offsets = [2, 0], sizes = [1, 4], strides = [1, 1]} : vector<4x4xf32> to vector<1x4xf32>
    %546 = vector.broadcast %544 : vector<4x1xf32> to vector<4x4xf32>
    %547 = vector.broadcast %545 : vector<1x4xf32> to vector<4x4xf32>
    %548 = arith.mulf %546, %547 : vector<4x4xf32>
    %549 = arith.addf %543, %548 : vector<4x4xf32>
    %550 = vector.extract_strided_slice %531 {offsets = [0, 3], sizes = [4, 1], strides = [1, 1]} : vector<4x4xf32> to vector<4x1xf32>
    %551 = vector.extract_strided_slice %293 {offsets = [3, 0], sizes = [1, 4], strides = [1, 1]} : vector<4x4xf32> to vector<1x4xf32>
    %552 = vector.broadcast %550 : vector<4x1xf32> to vector<4x4xf32>
    %553 = vector.broadcast %551 : vector<1x4xf32> to vector<4x4xf32>
    %554 = arith.mulf %552, %553 : vector<4x4xf32>
    %555 = arith.addf %549, %554 : vector<4x4xf32>
    %556 = vector.extract_strided_slice %532 {offsets = [0, 0], sizes = [4, 1], strides = [1, 1]} : vector<4x4xf32> to vector<4x1xf32>
    %557 = vector.extract_strided_slice %298 {offsets = [0, 0], sizes = [1, 4], strides = [1, 1]} : vector<4x4xf32> to vector<1x4xf32>
    %558 = vector.broadcast %556 : vector<4x1xf32> to vector<4x4xf32>
    %559 = vector.broadcast %557 : vector<1x4xf32> to vector<4x4xf32>
    %560 = arith.mulf %558, %559 : vector<4x4xf32>
    %561 = vector.extract_strided_slice %532 {offsets = [0, 1], sizes = [4, 1], strides = [1, 1]} : vector<4x4xf32> to vector<4x1xf32>
    %562 = vector.extract_strided_slice %298 {offsets = [1, 0], sizes = [1, 4], strides = [1, 1]} : vector<4x4xf32> to vector<1x4xf32>
    %563 = vector.broadcast %561 : vector<4x1xf32> to vector<4x4xf32>
    %564 = vector.broadcast %562 : vector<1x4xf32> to vector<4x4xf32>
    %565 = arith.mulf %563, %564 : vector<4x4xf32>
    %566 = arith.addf %560, %565 : vector<4x4xf32>
    %567 = vector.extract_strided_slice %532 {offsets = [0, 2], sizes = [4, 1], strides = [1, 1]} : vector<4x4xf32> to vector<4x1xf32>
    %568 = vector.extract_strided_slice %298 {offsets = [2, 0], sizes = [1, 4], strides = [1, 1]} : vector<4x4xf32> to vector<1x4xf32>
    %569 = vector.broadcast %567 : vector<4x1xf32> to vector<4x4xf32>
    %570 = vector.broadcast %568 : vector<1x4xf32> to vector<4x4xf32>
    %571 = arith.mulf %569, %570 : vector<4x4xf32>
    %572 = arith.addf %566, %571 : vector<4x4xf32>
    %573 = vector.extract_strided_slice %532 {offsets = [0, 3], sizes = [4, 1], strides = [1, 1]} : vector<4x4xf32> to vector<4x1xf32>
    %574 = vector.extract_strided_slice %298 {offsets = [3, 0], sizes = [1, 4], strides = [1, 1]} : vector<4x4xf32> to vector<1x4xf32>
    %575 = vector.broadcast %573 : vector<4x1xf32> to vector<4x4xf32>
    %576 = vector.broadcast %574 : vector<1x4xf32> to vector<4x4xf32>
    %577 = arith.mulf %575, %576 : vector<4x4xf32>
    %578 = arith.addf %572, %577 : vector<4x4xf32>
    %579 = arith.addf %531, %532 : vector<4x4xf32>
    %580 = arith.addf %293, %298 : vector<4x4xf32>
    %581 = vector.extract_strided_slice %579 {offsets = [0, 0], sizes = [4, 1], strides = [1, 1]} : vector<4x4xf32> to vector<4x1xf32>
    %582 = vector.extract_strided_slice %580 {offsets = [0, 0], sizes = [1, 4], strides = [1, 1]} : vector<4x4xf32> to vector<1x4xf32>
    %583 = vector.broadcast %581 : vector<4x1xf32> to vector<4x4xf32>
    %584 = vector.broadcast %582 : vector<1x4xf32> to vector<4x4xf32>
    %585 = arith.mulf %583, %584 : vector<4x4xf32>
    %586 = vector.extract_strided_slice %579 {offsets = [0, 1], sizes = [4, 1], strides = [1, 1]} : vector<4x4xf32> to vector<4x1xf32>
    %587 = vector.extract_strided_slice %580 {offsets = [1, 0], sizes = [1, 4], strides = [1, 1]} : vector<4x4xf32> to vector<1x4xf32>
    %588 = vector.broadcast %586 : vector<4x1xf32> to vector<4x4xf32>
    %589 = vector.broadcast %587 : vector<1x4xf32> to vector<4x4xf32>
    %590 = arith.mulf %588, %589 : vector<4x4xf32>
    %591 = arith.addf %585, %590 : vector<4x4xf32>
    %592 = vector.extract_strided_slice %579 {offsets = [0, 2], sizes = [4, 1], strides = [1, 1]} : vector<4x4xf32> to vector<4x1xf32>
    %593 = vector.extract_strided_slice %580 {offsets = [2, 0], sizes = [1, 4], strides = [1, 1]} : vector<4x4xf32> to vector<1x4xf32>
    %594 = vector.broadcast %592 : vector<4x1xf32> to vector<4x4xf32>
    %595 = vector.broadcast %593 : vector<1x4xf32> to vector<4x4xf32>
    %596 = arith.mulf %594, %595 : vector<4x4xf32>
    %597 = arith.addf %591, %596 : vector<4x4xf32>
    %598 = vector.extract_strided_slice %579 {offsets = [0, 3], sizes = [4, 1], strides = [1, 1]} : vector<4x4xf32> to vector<4x1xf32>
    %599 = vector.extract_strided_slice %580 {offsets = [3, 0], sizes = [1, 4], strides = [1, 1]} : vector<4x4xf32> to vector<1x4xf32>
    %600 = vector.broadcast %598 : vector<4x1xf32> to vector<4x4xf32>
    %601 = vector.broadcast %599 : vector<1x4xf32> to vector<4x4xf32>
    %602 = arith.mulf %600, %601 : vector<4x4xf32>
    %603 = arith.addf %597, %602 : vector<4x4xf32>
    %604 = arith.subf %555, %578 : vector<4x4xf32>
    %605 = arith.subf %603, %555 : vector<4x4xf32>
    %606 = arith.subf %605, %578 : vector<4x4xf32>
    %607 = arith.addf %604, %309 : vector<4x4xf32>
    %608 = arith.addf %606, %317 : vector<4x4xf32>
    %609 = vector.extract_strided_slice %607 {offsets = [0, 0], sizes = [4, 1], strides = [1, 1]} : vector<4x4xf32> to vector<4x1xf32>
    %610 = vector.extract_strided_slice %607 {offsets = [0, 0], sizes = [1, 4], strides = [1, 1]} : vector<4x4xf32> to vector<1x4xf32>
    %611 = vector.broadcast %609 : vector<4x1xf32> to vector<4x4xf32>
    %612 = vector.broadcast %610 : vector<1x4xf32> to vector<4x4xf32>
    %613 = arith.mulf %611, %612 : vector<4x4xf32>
    %614 = vector.extract_strided_slice %607 {offsets = [0, 1], sizes = [4, 1], strides = [1, 1]} : vector<4x4xf32> to vector<4x1xf32>
    %615 = vector.extract_strided_slice %607 {offsets = [1, 0], sizes = [1, 4], strides = [1, 1]} : vector<4x4xf32> to vector<1x4xf32>
    %616 = vector.broadcast %614 : vector<4x1xf32> to vector<4x4xf32>
    %617 = vector.broadcast %615 : vector<1x4xf32> to vector<4x4xf32>
    %618 = arith.mulf %616, %617 : vector<4x4xf32>
    %619 = arith.addf %613, %618 : vector<4x4xf32>
    %620 = vector.extract_strided_slice %607 {offsets = [0, 2], sizes = [4, 1], strides = [1, 1]} : vector<4x4xf32> to vector<4x1xf32>
    %621 = vector.extract_strided_slice %607 {offsets = [2, 0], sizes = [1, 4], strides = [1, 1]} : vector<4x4xf32> to vector<1x4xf32>
    %622 = vector.broadcast %620 : vector<4x1xf32> to vector<4x4xf32>
    %623 = vector.broadcast %621 : vector<1x4xf32> to vector<4x4xf32>
    %624 = arith.mulf %622, %623 : vector<4x4xf32>
    %625 = arith.addf %619, %624 : vector<4x4xf32>
    %626 = vector.extract_strided_slice %607 {offsets = [0, 3], sizes = [4, 1], strides = [1, 1]} : vector<4x4xf32> to vector<4x1xf32>
    %627 = vector.extract_strided_slice %607 {offsets = [3, 0], sizes = [1, 4], strides = [1, 1]} : vector<4x4xf32> to vector<1x4xf32>
    %628 = vector.broadcast %626 : vector<4x1xf32> to vector<4x4xf32>
    %629 = vector.broadcast %627 : vector<1x4xf32> to vector<4x4xf32>
    %630 = arith.mulf %628, %629 : vector<4x4xf32>
    %631 = arith.addf %625, %630 : vector<4x4xf32>
    %632 = vector.extract_strided_slice %608 {offsets = [0, 0], sizes = [4, 1], strides = [1, 1]} : vector<4x4xf32> to vector<4x1xf32>
    %633 = vector.extract_strided_slice %608 {offsets = [0, 0], sizes = [1, 4], strides = [1, 1]} : vector<4x4xf32> to vector<1x4xf32>
    %634 = vector.broadcast %632 : vector<4x1xf32> to vector<4x4xf32>
    %635 = vector.broadcast %633 : vector<1x4xf32> to vector<4x4xf32>
    %636 = arith.mulf %634, %635 : vector<4x4xf32>
    %637 = vector.extract_strided_slice %608 {offsets = [0, 1], sizes = [4, 1], strides = [1, 1]} : vector<4x4xf32> to vector<4x1xf32>
    %638 = vector.extract_strided_slice %608 {offsets = [1, 0], sizes = [1, 4], strides = [1, 1]} : vector<4x4xf32> to vector<1x4xf32>
    %639 = vector.broadcast %637 : vector<4x1xf32> to vector<4x4xf32>
    %640 = vector.broadcast %638 : vector<1x4xf32> to vector<4x4xf32>
    %641 = arith.mulf %639, %640 : vector<4x4xf32>
    %642 = arith.addf %636, %641 : vector<4x4xf32>
    %643 = vector.extract_strided_slice %608 {offsets = [0, 2], sizes = [4, 1], strides = [1, 1]} : vector<4x4xf32> to vector<4x1xf32>
    %644 = vector.extract_strided_slice %608 {offsets = [2, 0], sizes = [1, 4], strides = [1, 1]} : vector<4x4xf32> to vector<1x4xf32>
    %645 = vector.broadcast %643 : vector<4x1xf32> to vector<4x4xf32>
    %646 = vector.broadcast %644 : vector<1x4xf32> to vector<4x4xf32>
    %647 = arith.mulf %645, %646 : vector<4x4xf32>
    %648 = arith.addf %642, %647 : vector<4x4xf32>
    %649 = vector.extract_strided_slice %608 {offsets = [0, 3], sizes = [4, 1], strides = [1, 1]} : vector<4x4xf32> to vector<4x1xf32>
    %650 = vector.extract_strided_slice %608 {offsets = [3, 0], sizes = [1, 4], strides = [1, 1]} : vector<4x4xf32> to vector<1x4xf32>
    %651 = vector.broadcast %649 : vector<4x1xf32> to vector<4x4xf32>
    %652 = vector.broadcast %650 : vector<1x4xf32> to vector<4x4xf32>
    %653 = arith.mulf %651, %652 : vector<4x4xf32>
    %654 = arith.addf %648, %653 : vector<4x4xf32>
    %655 = arith.addf %607, %608 : vector<4x4xf32>
    %656 = arith.addf %607, %608 : vector<4x4xf32>
    %657 = vector.extract_strided_slice %655 {offsets = [0, 0], sizes = [4, 1], strides = [1, 1]} : vector<4x4xf32> to vector<4x1xf32>
    %658 = vector.extract_strided_slice %656 {offsets = [0, 0], sizes = [1, 4], strides = [1, 1]} : vector<4x4xf32> to vector<1x4xf32>
    %659 = vector.broadcast %657 : vector<4x1xf32> to vector<4x4xf32>
    %660 = vector.broadcast %658 : vector<1x4xf32> to vector<4x4xf32>
    %661 = arith.mulf %659, %660 : vector<4x4xf32>
    %662 = vector.extract_strided_slice %655 {offsets = [0, 1], sizes = [4, 1], strides = [1, 1]} : vector<4x4xf32> to vector<4x1xf32>
    %663 = vector.extract_strided_slice %656 {offsets = [1, 0], sizes = [1, 4], strides = [1, 1]} : vector<4x4xf32> to vector<1x4xf32>
    %664 = vector.broadcast %662 : vector<4x1xf32> to vector<4x4xf32>
    %665 = vector.broadcast %663 : vector<1x4xf32> to vector<4x4xf32>
    %666 = arith.mulf %664, %665 : vector<4x4xf32>
    %667 = arith.addf %661, %666 : vector<4x4xf32>
    %668 = vector.extract_strided_slice %655 {offsets = [0, 2], sizes = [4, 1], strides = [1, 1]} : vector<4x4xf32> to vector<4x1xf32>
    %669 = vector.extract_strided_slice %656 {offsets = [2, 0], sizes = [1, 4], strides = [1, 1]} : vector<4x4xf32> to vector<1x4xf32>
    %670 = vector.broadcast %668 : vector<4x1xf32> to vector<4x4xf32>
    %671 = vector.broadcast %669 : vector<1x4xf32> to vector<4x4xf32>
    %672 = arith.mulf %670, %671 : vector<4x4xf32>
    %673 = arith.addf %667, %672 : vector<4x4xf32>
    %674 = vector.extract_strided_slice %655 {offsets = [0, 3], sizes = [4, 1], strides = [1, 1]} : vector<4x4xf32> to vector<4x1xf32>
    %675 = vector.extract_strided_slice %656 {offsets = [3, 0], sizes = [1, 4], strides = [1, 1]} : vector<4x4xf32> to vector<1x4xf32>
    %676 = vector.broadcast %674 : vector<4x1xf32> to vector<4x4xf32>
    %677 = vector.broadcast %675 : vector<1x4xf32> to vector<4x4xf32>
    %678 = arith.mulf %676, %677 : vector<4x4xf32>
    %679 = arith.addf %673, %678 : vector<4x4xf32>
    %680 = arith.subf %631, %654 : vector<4x4xf32>
    %681 = arith.subf %679, %631 : vector<4x4xf32>
    %682 = arith.subf %681, %654 : vector<4x4xf32>
    %683 = vector.extract_strided_slice %680 {offsets = [0, 0], sizes = [4, 1], strides = [1, 1]} : vector<4x4xf32> to vector<4x1xf32>
    %684 = vector.extract_strided_slice %680 {offsets = [0, 0], sizes = [1, 4], strides = [1, 1]} : vector<4x4xf32> to vector<1x4xf32>
    %685 = vector.broadcast %683 : vector<4x1xf32> to vector<4x4xf32>
    %686 = vector.broadcast %684 : vector<1x4xf32> to vector<4x4xf32>
    %687 = arith.mulf %685, %686 : vector<4x4xf32>
    %688 = vector.extract_strided_slice %680 {offsets = [0, 1], sizes = [4, 1], strides = [1, 1]} : vector<4x4xf32> to vector<4x1xf32>
    %689 = vector.extract_strided_slice %680 {offsets = [1, 0], sizes = [1, 4], strides = [1, 1]} : vector<4x4xf32> to vector<1x4xf32>
    %690 = vector.broadcast %688 : vector<4x1xf32> to vector<4x4xf32>
    %691 = vector.broadcast %689 : vector<1x4xf32> to vector<4x4xf32>
    %692 = arith.mulf %690, %691 : vector<4x4xf32>
    %693 = arith.addf %687, %692 : vector<4x4xf32>
    %694 = vector.extract_strided_slice %680 {offsets = [0, 2], sizes = [4, 1], strides = [1, 1]} : vector<4x4xf32> to vector<4x1xf32>
    %695 = vector.extract_strided_slice %680 {offsets = [2, 0], sizes = [1, 4], strides = [1, 1]} : vector<4x4xf32> to vector<1x4xf32>
    %696 = vector.broadcast %694 : vector<4x1xf32> to vector<4x4xf32>
    %697 = vector.broadcast %695 : vector<1x4xf32> to vector<4x4xf32>
    %698 = arith.mulf %696, %697 : vector<4x4xf32>
    %699 = arith.addf %693, %698 : vector<4x4xf32>
    %700 = vector.extract_strided_slice %680 {offsets = [0, 3], sizes = [4, 1], strides = [1, 1]} : vector<4x4xf32> to vector<4x1xf32>
    %701 = vector.extract_strided_slice %680 {offsets = [3, 0], sizes = [1, 4], strides = [1, 1]} : vector<4x4xf32> to vector<1x4xf32>
    %702 = vector.broadcast %700 : vector<4x1xf32> to vector<4x4xf32>
    %703 = vector.broadcast %701 : vector<1x4xf32> to vector<4x4xf32>
    %704 = arith.mulf %702, %703 : vector<4x4xf32>
    %705 = arith.addf %699, %704 : vector<4x4xf32>
    %706 = vector.extract_strided_slice %682 {offsets = [0, 0], sizes = [4, 1], strides = [1, 1]} : vector<4x4xf32> to vector<4x1xf32>
    %707 = vector.extract_strided_slice %682 {offsets = [0, 0], sizes = [1, 4], strides = [1, 1]} : vector<4x4xf32> to vector<1x4xf32>
    %708 = vector.broadcast %706 : vector<4x1xf32> to vector<4x4xf32>
    %709 = vector.broadcast %707 : vector<1x4xf32> to vector<4x4xf32>
    %710 = arith.mulf %708, %709 : vector<4x4xf32>
    %711 = vector.extract_strided_slice %682 {offsets = [0, 1], sizes = [4, 1], strides = [1, 1]} : vector<4x4xf32> to vector<4x1xf32>
    %712 = vector.extract_strided_slice %682 {offsets = [1, 0], sizes = [1, 4], strides = [1, 1]} : vector<4x4xf32> to vector<1x4xf32>
    %713 = vector.broadcast %711 : vector<4x1xf32> to vector<4x4xf32>
    %714 = vector.broadcast %712 : vector<1x4xf32> to vector<4x4xf32>
    %715 = arith.mulf %713, %714 : vector<4x4xf32>
    %716 = arith.addf %710, %715 : vector<4x4xf32>
    %717 = vector.extract_strided_slice %682 {offsets = [0, 2], sizes = [4, 1], strides = [1, 1]} : vector<4x4xf32> to vector<4x1xf32>
    %718 = vector.extract_strided_slice %682 {offsets = [2, 0], sizes = [1, 4], strides = [1, 1]} : vector<4x4xf32> to vector<1x4xf32>
    %719 = vector.broadcast %717 : vector<4x1xf32> to vector<4x4xf32>
    %720 = vector.broadcast %718 : vector<1x4xf32> to vector<4x4xf32>
    %721 = arith.mulf %719, %720 : vector<4x4xf32>
    %722 = arith.addf %716, %721 : vector<4x4xf32>
    %723 = vector.extract_strided_slice %682 {offsets = [0, 3], sizes = [4, 1], strides = [1, 1]} : vector<4x4xf32> to vector<4x1xf32>
    %724 = vector.extract_strided_slice %682 {offsets = [3, 0], sizes = [1, 4], strides = [1, 1]} : vector<4x4xf32> to vector<1x4xf32>
    %725 = vector.broadcast %723 : vector<4x1xf32> to vector<4x4xf32>
    %726 = vector.broadcast %724 : vector<1x4xf32> to vector<4x4xf32>
    %727 = arith.mulf %725, %726 : vector<4x4xf32>
    %728 = arith.addf %722, %727 : vector<4x4xf32>
    %729 = arith.addf %680, %682 : vector<4x4xf32>
    %730 = arith.addf %680, %682 : vector<4x4xf32>
    %731 = vector.extract_strided_slice %729 {offsets = [0, 0], sizes = [4, 1], strides = [1, 1]} : vector<4x4xf32> to vector<4x1xf32>
    %732 = vector.extract_strided_slice %730 {offsets = [0, 0], sizes = [1, 4], strides = [1, 1]} : vector<4x4xf32> to vector<1x4xf32>
    %733 = vector.broadcast %731 : vector<4x1xf32> to vector<4x4xf32>
    %734 = vector.broadcast %732 : vector<1x4xf32> to vector<4x4xf32>
    %735 = arith.mulf %733, %734 : vector<4x4xf32>
    %736 = vector.extract_strided_slice %729 {offsets = [0, 1], sizes = [4, 1], strides = [1, 1]} : vector<4x4xf32> to vector<4x1xf32>
    %737 = vector.extract_strided_slice %730 {offsets = [1, 0], sizes = [1, 4], strides = [1, 1]} : vector<4x4xf32> to vector<1x4xf32>
    %738 = vector.broadcast %736 : vector<4x1xf32> to vector<4x4xf32>
    %739 = vector.broadcast %737 : vector<1x4xf32> to vector<4x4xf32>
    %740 = arith.mulf %738, %739 : vector<4x4xf32>
    %741 = arith.addf %735, %740 : vector<4x4xf32>
    %742 = vector.extract_strided_slice %729 {offsets = [0, 2], sizes = [4, 1], strides = [1, 1]} : vector<4x4xf32> to vector<4x1xf32>
    %743 = vector.extract_strided_slice %730 {offsets = [2, 0], sizes = [1, 4], strides = [1, 1]} : vector<4x4xf32> to vector<1x4xf32>
    %744 = vector.broadcast %742 : vector<4x1xf32> to vector<4x4xf32>
    %745 = vector.broadcast %743 : vector<1x4xf32> to vector<4x4xf32>
    %746 = arith.mulf %744, %745 : vector<4x4xf32>
    %747 = arith.addf %741, %746 : vector<4x4xf32>
    %748 = vector.extract_strided_slice %729 {offsets = [0, 3], sizes = [4, 1], strides = [1, 1]} : vector<4x4xf32> to vector<4x1xf32>
    %749 = vector.extract_strided_slice %730 {offsets = [3, 0], sizes = [1, 4], strides = [1, 1]} : vector<4x4xf32> to vector<1x4xf32>
    %750 = vector.broadcast %748 : vector<4x1xf32> to vector<4x4xf32>
    %751 = vector.broadcast %749 : vector<1x4xf32> to vector<4x4xf32>
    %752 = arith.mulf %750, %751 : vector<4x4xf32>
    %753 = arith.addf %747, %752 : vector<4x4xf32>
    %754 = arith.subf %705, %728 : vector<4x4xf32>
    %755 = arith.subf %753, %705 : vector<4x4xf32>
    %756 = arith.subf %755, %728 : vector<4x4xf32>
    %757 = vector.extract_strided_slice %754 {offsets = [0, 0], sizes = [4, 1], strides = [1, 1]} : vector<4x4xf32> to vector<4x1xf32>
    %758 = vector.extract_strided_slice %754 {offsets = [0, 0], sizes = [1, 4], strides = [1, 1]} : vector<4x4xf32> to vector<1x4xf32>
    %759 = vector.broadcast %757 : vector<4x1xf32> to vector<4x4xf32>
    %760 = vector.broadcast %758 : vector<1x4xf32> to vector<4x4xf32>
    %761 = arith.mulf %759, %760 : vector<4x4xf32>
    %762 = vector.extract_strided_slice %754 {offsets = [0, 1], sizes = [4, 1], strides = [1, 1]} : vector<4x4xf32> to vector<4x1xf32>
    %763 = vector.extract_strided_slice %754 {offsets = [1, 0], sizes = [1, 4], strides = [1, 1]} : vector<4x4xf32> to vector<1x4xf32>
    %764 = vector.broadcast %762 : vector<4x1xf32> to vector<4x4xf32>
    %765 = vector.broadcast %763 : vector<1x4xf32> to vector<4x4xf32>
    %766 = arith.mulf %764, %765 : vector<4x4xf32>
    %767 = arith.addf %761, %766 : vector<4x4xf32>
    %768 = vector.extract_strided_slice %754 {offsets = [0, 2], sizes = [4, 1], strides = [1, 1]} : vector<4x4xf32> to vector<4x1xf32>
    %769 = vector.extract_strided_slice %754 {offsets = [2, 0], sizes = [1, 4], strides = [1, 1]} : vector<4x4xf32> to vector<1x4xf32>
    %770 = vector.broadcast %768 : vector<4x1xf32> to vector<4x4xf32>
    %771 = vector.broadcast %769 : vector<1x4xf32> to vector<4x4xf32>
    %772 = arith.mulf %770, %771 : vector<4x4xf32>
    %773 = arith.addf %767, %772 : vector<4x4xf32>
    %774 = vector.extract_strided_slice %754 {offsets = [0, 3], sizes = [4, 1], strides = [1, 1]} : vector<4x4xf32> to vector<4x1xf32>
    %775 = vector.extract_strided_slice %754 {offsets = [3, 0], sizes = [1, 4], strides = [1, 1]} : vector<4x4xf32> to vector<1x4xf32>
    %776 = vector.broadcast %774 : vector<4x1xf32> to vector<4x4xf32>
    %777 = vector.broadcast %775 : vector<1x4xf32> to vector<4x4xf32>
    %778 = arith.mulf %776, %777 : vector<4x4xf32>
    %779 = arith.addf %773, %778 : vector<4x4xf32>
    %780 = vector.extract_strided_slice %756 {offsets = [0, 0], sizes = [4, 1], strides = [1, 1]} : vector<4x4xf32> to vector<4x1xf32>
    %781 = vector.extract_strided_slice %756 {offsets = [0, 0], sizes = [1, 4], strides = [1, 1]} : vector<4x4xf32> to vector<1x4xf32>
    %782 = vector.broadcast %780 : vector<4x1xf32> to vector<4x4xf32>
    %783 = vector.broadcast %781 : vector<1x4xf32> to vector<4x4xf32>
    %784 = arith.mulf %782, %783 : vector<4x4xf32>
    %785 = vector.extract_strided_slice %756 {offsets = [0, 1], sizes = [4, 1], strides = [1, 1]} : vector<4x4xf32> to vector<4x1xf32>
    %786 = vector.extract_strided_slice %756 {offsets = [1, 0], sizes = [1, 4], strides = [1, 1]} : vector<4x4xf32> to vector<1x4xf32>
    %787 = vector.broadcast %785 : vector<4x1xf32> to vector<4x4xf32>
    %788 = vector.broadcast %786 : vector<1x4xf32> to vector<4x4xf32>
    %789 = arith.mulf %787, %788 : vector<4x4xf32>
    %790 = arith.addf %784, %789 : vector<4x4xf32>
    %791 = vector.extract_strided_slice %756 {offsets = [0, 2], sizes = [4, 1], strides = [1, 1]} : vector<4x4xf32> to vector<4x1xf32>
    %792 = vector.extract_strided_slice %756 {offsets = [2, 0], sizes = [1, 4], strides = [1, 1]} : vector<4x4xf32> to vector<1x4xf32>
    %793 = vector.broadcast %791 : vector<4x1xf32> to vector<4x4xf32>
    %794 = vector.broadcast %792 : vector<1x4xf32> to vector<4x4xf32>
    %795 = arith.mulf %793, %794 : vector<4x4xf32>
    %796 = arith.addf %790, %795 : vector<4x4xf32>
    %797 = vector.extract_strided_slice %756 {offsets = [0, 3], sizes = [4, 1], strides = [1, 1]} : vector<4x4xf32> to vector<4x1xf32>
    %798 = vector.extract_strided_slice %756 {offsets = [3, 0], sizes = [1, 4], strides = [1, 1]} : vector<4x4xf32> to vector<1x4xf32>
    %799 = vector.broadcast %797 : vector<4x1xf32> to vector<4x4xf32>
    %800 = vector.broadcast %798 : vector<1x4xf32> to vector<4x4xf32>
    %801 = arith.mulf %799, %800 : vector<4x4xf32>
    %802 = arith.addf %796, %801 : vector<4x4xf32>
    %803 = arith.addf %754, %756 : vector<4x4xf32>
    %804 = arith.addf %754, %756 : vector<4x4xf32>
    %805 = vector.extract_strided_slice %803 {offsets = [0, 0], sizes = [4, 1], strides = [1, 1]} : vector<4x4xf32> to vector<4x1xf32>
    %806 = vector.extract_strided_slice %804 {offsets = [0, 0], sizes = [1, 4], strides = [1, 1]} : vector<4x4xf32> to vector<1x4xf32>
    %807 = vector.broadcast %805 : vector<4x1xf32> to vector<4x4xf32>
    %808 = vector.broadcast %806 : vector<1x4xf32> to vector<4x4xf32>
    %809 = arith.mulf %807, %808 : vector<4x4xf32>
    %810 = vector.extract_strided_slice %803 {offsets = [0, 1], sizes = [4, 1], strides = [1, 1]} : vector<4x4xf32> to vector<4x1xf32>
    %811 = vector.extract_strided_slice %804 {offsets = [1, 0], sizes = [1, 4], strides = [1, 1]} : vector<4x4xf32> to vector<1x4xf32>
    %812 = vector.broadcast %810 : vector<4x1xf32> to vector<4x4xf32>
    %813 = vector.broadcast %811 : vector<1x4xf32> to vector<4x4xf32>
    %814 = arith.mulf %812, %813 : vector<4x4xf32>
    %815 = arith.addf %809, %814 : vector<4x4xf32>
    %816 = vector.extract_strided_slice %803 {offsets = [0, 2], sizes = [4, 1], strides = [1, 1]} : vector<4x4xf32> to vector<4x1xf32>
    %817 = vector.extract_strided_slice %804 {offsets = [2, 0], sizes = [1, 4], strides = [1, 1]} : vector<4x4xf32> to vector<1x4xf32>
    %818 = vector.broadcast %816 : vector<4x1xf32> to vector<4x4xf32>
    %819 = vector.broadcast %817 : vector<1x4xf32> to vector<4x4xf32>
    %820 = arith.mulf %818, %819 : vector<4x4xf32>
    %821 = arith.addf %815, %820 : vector<4x4xf32>
    %822 = vector.extract_strided_slice %803 {offsets = [0, 3], sizes = [4, 1], strides = [1, 1]} : vector<4x4xf32> to vector<4x1xf32>
    %823 = vector.extract_strided_slice %804 {offsets = [3, 0], sizes = [1, 4], strides = [1, 1]} : vector<4x4xf32> to vector<1x4xf32>
    %824 = vector.broadcast %822 : vector<4x1xf32> to vector<4x4xf32>
    %825 = vector.broadcast %823 : vector<1x4xf32> to vector<4x4xf32>
    %826 = arith.mulf %824, %825 : vector<4x4xf32>
    %827 = arith.addf %821, %826 : vector<4x4xf32>
    %828 = arith.subf %779, %802 : vector<4x4xf32>
    %829 = arith.subf %827, %779 : vector<4x4xf32>
    %830 = arith.subf %829, %802 : vector<4x4xf32>
    %831 = vector.extract_strided_slice %828 {offsets = [0, 0], sizes = [4, 1], strides = [1, 1]} : vector<4x4xf32> to vector<4x1xf32>
    %832 = vector.extract_strided_slice %828 {offsets = [0, 0], sizes = [1, 4], strides = [1, 1]} : vector<4x4xf32> to vector<1x4xf32>
    %833 = vector.broadcast %831 : vector<4x1xf32> to vector<4x4xf32>
    %834 = vector.broadcast %832 : vector<1x4xf32> to vector<4x4xf32>
    %835 = arith.mulf %833, %834 : vector<4x4xf32>
    %836 = vector.extract_strided_slice %828 {offsets = [0, 1], sizes = [4, 1], strides = [1, 1]} : vector<4x4xf32> to vector<4x1xf32>
    %837 = vector.extract_strided_slice %828 {offsets = [1, 0], sizes = [1, 4], strides = [1, 1]} : vector<4x4xf32> to vector<1x4xf32>
    %838 = vector.broadcast %836 : vector<4x1xf32> to vector<4x4xf32>
    %839 = vector.broadcast %837 : vector<1x4xf32> to vector<4x4xf32>
    %840 = arith.mulf %838, %839 : vector<4x4xf32>
    %841 = arith.addf %835, %840 : vector<4x4xf32>
    %842 = vector.extract_strided_slice %828 {offsets = [0, 2], sizes = [4, 1], strides = [1, 1]} : vector<4x4xf32> to vector<4x1xf32>
    %843 = vector.extract_strided_slice %828 {offsets = [2, 0], sizes = [1, 4], strides = [1, 1]} : vector<4x4xf32> to vector<1x4xf32>
    %844 = vector.broadcast %842 : vector<4x1xf32> to vector<4x4xf32>
    %845 = vector.broadcast %843 : vector<1x4xf32> to vector<4x4xf32>
    %846 = arith.mulf %844, %845 : vector<4x4xf32>
    %847 = arith.addf %841, %846 : vector<4x4xf32>
    %848 = vector.extract_strided_slice %828 {offsets = [0, 3], sizes = [4, 1], strides = [1, 1]} : vector<4x4xf32> to vector<4x1xf32>
    %849 = vector.extract_strided_slice %828 {offsets = [3, 0], sizes = [1, 4], strides = [1, 1]} : vector<4x4xf32> to vector<1x4xf32>
    %850 = vector.broadcast %848 : vector<4x1xf32> to vector<4x4xf32>
    %851 = vector.broadcast %849 : vector<1x4xf32> to vector<4x4xf32>
    %852 = arith.mulf %850, %851 : vector<4x4xf32>
    %853 = arith.addf %847, %852 : vector<4x4xf32>
    %854 = vector.extract_strided_slice %830 {offsets = [0, 0], sizes = [4, 1], strides = [1, 1]} : vector<4x4xf32> to vector<4x1xf32>
    %855 = vector.extract_strided_slice %830 {offsets = [0, 0], sizes = [1, 4], strides = [1, 1]} : vector<4x4xf32> to vector<1x4xf32>
    %856 = vector.broadcast %854 : vector<4x1xf32> to vector<4x4xf32>
    %857 = vector.broadcast %855 : vector<1x4xf32> to vector<4x4xf32>
    %858 = arith.mulf %856, %857 : vector<4x4xf32>
    %859 = vector.extract_strided_slice %830 {offsets = [0, 1], sizes = [4, 1], strides = [1, 1]} : vector<4x4xf32> to vector<4x1xf32>
    %860 = vector.extract_strided_slice %830 {offsets = [1, 0], sizes = [1, 4], strides = [1, 1]} : vector<4x4xf32> to vector<1x4xf32>
    %861 = vector.broadcast %859 : vector<4x1xf32> to vector<4x4xf32>
    %862 = vector.broadcast %860 : vector<1x4xf32> to vector<4x4xf32>
    %863 = arith.mulf %861, %862 : vector<4x4xf32>
    %864 = arith.addf %858, %863 : vector<4x4xf32>
    %865 = vector.extract_strided_slice %830 {offsets = [0, 2], sizes = [4, 1], strides = [1, 1]} : vector<4x4xf32> to vector<4x1xf32>
    %866 = vector.extract_strided_slice %830 {offsets = [2, 0], sizes = [1, 4], strides = [1, 1]} : vector<4x4xf32> to vector<1x4xf32>
    %867 = vector.broadcast %865 : vector<4x1xf32> to vector<4x4xf32>
    %868 = vector.broadcast %866 : vector<1x4xf32> to vector<4x4xf32>
    %869 = arith.mulf %867, %868 : vector<4x4xf32>
    %870 = arith.addf %864, %869 : vector<4x4xf32>
    %871 = vector.extract_strided_slice %830 {offsets = [0, 3], sizes = [4, 1], strides = [1, 1]} : vector<4x4xf32> to vector<4x1xf32>
    %872 = vector.extract_strided_slice %830 {offsets = [3, 0], sizes = [1, 4], strides = [1, 1]} : vector<4x4xf32> to vector<1x4xf32>
    %873 = vector.broadcast %871 : vector<4x1xf32> to vector<4x4xf32>
    %874 = vector.broadcast %872 : vector<1x4xf32> to vector<4x4xf32>
    %875 = arith.mulf %873, %874 : vector<4x4xf32>
    %876 = arith.addf %870, %875 : vector<4x4xf32>
    %877 = arith.addf %828, %830 : vector<4x4xf32>
    %878 = arith.addf %828, %830 : vector<4x4xf32>
    %879 = vector.extract_strided_slice %877 {offsets = [0, 0], sizes = [4, 1], strides = [1, 1]} : vector<4x4xf32> to vector<4x1xf32>
    %880 = vector.extract_strided_slice %878 {offsets = [0, 0], sizes = [1, 4], strides = [1, 1]} : vector<4x4xf32> to vector<1x4xf32>
    %881 = vector.broadcast %879 : vector<4x1xf32> to vector<4x4xf32>
    %882 = vector.broadcast %880 : vector<1x4xf32> to vector<4x4xf32>
    %883 = arith.mulf %881, %882 : vector<4x4xf32>
    %884 = vector.extract_strided_slice %877 {offsets = [0, 1], sizes = [4, 1], strides = [1, 1]} : vector<4x4xf32> to vector<4x1xf32>
    %885 = vector.extract_strided_slice %878 {offsets = [1, 0], sizes = [1, 4], strides = [1, 1]} : vector<4x4xf32> to vector<1x4xf32>
    %886 = vector.broadcast %884 : vector<4x1xf32> to vector<4x4xf32>
    %887 = vector.broadcast %885 : vector<1x4xf32> to vector<4x4xf32>
    %888 = arith.mulf %886, %887 : vector<4x4xf32>
    %889 = arith.addf %883, %888 : vector<4x4xf32>
    %890 = vector.extract_strided_slice %877 {offsets = [0, 2], sizes = [4, 1], strides = [1, 1]} : vector<4x4xf32> to vector<4x1xf32>
    %891 = vector.extract_strided_slice %878 {offsets = [2, 0], sizes = [1, 4], strides = [1, 1]} : vector<4x4xf32> to vector<1x4xf32>
    %892 = vector.broadcast %890 : vector<4x1xf32> to vector<4x4xf32>
    %893 = vector.broadcast %891 : vector<1x4xf32> to vector<4x4xf32>
    %894 = arith.mulf %892, %893 : vector<4x4xf32>
    %895 = arith.addf %889, %894 : vector<4x4xf32>
    %896 = vector.extract_strided_slice %877 {offsets = [0, 3], sizes = [4, 1], strides = [1, 1]} : vector<4x4xf32> to vector<4x1xf32>
    %897 = vector.extract_strided_slice %878 {offsets = [3, 0], sizes = [1, 4], strides = [1, 1]} : vector<4x4xf32> to vector<1x4xf32>
    %898 = vector.broadcast %896 : vector<4x1xf32> to vector<4x4xf32>
    %899 = vector.broadcast %897 : vector<1x4xf32> to vector<4x4xf32>
    %900 = arith.mulf %898, %899 : vector<4x4xf32>
    %901 = arith.addf %895, %900 : vector<4x4xf32>
    %902 = arith.subf %853, %876 : vector<4x4xf32>
    %903 = arith.subf %901, %853 : vector<4x4xf32>
    %904 = arith.subf %903, %876 : vector<4x4xf32>
    %905 = vector.extract_strided_slice %902 {offsets = [0, 0], sizes = [4, 1], strides = [1, 1]} : vector<4x4xf32> to vector<4x1xf32>
    %906 = vector.extract_strided_slice %240 {offsets = [0, 0], sizes = [1, 16], strides = [1, 1]} : vector<4x16xf32> to vector<1x16xf32>
    %907 = vector.broadcast %905 : vector<4x1xf32> to vector<4x16xf32>
    %908 = vector.broadcast %906 : vector<1x16xf32> to vector<4x16xf32>
    %909 = arith.mulf %907, %908 : vector<4x16xf32>
    %910 = vector.extract_strided_slice %902 {offsets = [0, 1], sizes = [4, 1], strides = [1, 1]} : vector<4x4xf32> to vector<4x1xf32>
    %911 = vector.extract_strided_slice %240 {offsets = [1, 0], sizes = [1, 16], strides = [1, 1]} : vector<4x16xf32> to vector<1x16xf32>
    %912 = vector.broadcast %910 : vector<4x1xf32> to vector<4x16xf32>
    %913 = vector.broadcast %911 : vector<1x16xf32> to vector<4x16xf32>
    %914 = arith.mulf %912, %913 : vector<4x16xf32>
    %915 = arith.addf %909, %914 : vector<4x16xf32>
    %916 = vector.extract_strided_slice %902 {offsets = [0, 2], sizes = [4, 1], strides = [1, 1]} : vector<4x4xf32> to vector<4x1xf32>
    %917 = vector.extract_strided_slice %240 {offsets = [2, 0], sizes = [1, 16], strides = [1, 1]} : vector<4x16xf32> to vector<1x16xf32>
    %918 = vector.broadcast %916 : vector<4x1xf32> to vector<4x16xf32>
    %919 = vector.broadcast %917 : vector<1x16xf32> to vector<4x16xf32>
    %920 = arith.mulf %918, %919 : vector<4x16xf32>
    %921 = arith.addf %915, %920 : vector<4x16xf32>
    %922 = vector.extract_strided_slice %902 {offsets = [0, 3], sizes = [4, 1], strides = [1, 1]} : vector<4x4xf32> to vector<4x1xf32>
    %923 = vector.extract_strided_slice %240 {offsets = [3, 0], sizes = [1, 16], strides = [1, 1]} : vector<4x16xf32> to vector<1x16xf32>
    %924 = vector.broadcast %922 : vector<4x1xf32> to vector<4x16xf32>
    %925 = vector.broadcast %923 : vector<1x16xf32> to vector<4x16xf32>
    %926 = arith.mulf %924, %925 : vector<4x16xf32>
    %927 = arith.addf %921, %926 : vector<4x16xf32>
    %928 = vector.extract_strided_slice %904 {offsets = [0, 0], sizes = [4, 1], strides = [1, 1]} : vector<4x4xf32> to vector<4x1xf32>
    %929 = vector.extract_strided_slice %242 {offsets = [0, 0], sizes = [1, 16], strides = [1, 1]} : vector<4x16xf32> to vector<1x16xf32>
    %930 = vector.broadcast %928 : vector<4x1xf32> to vector<4x16xf32>
    %931 = vector.broadcast %929 : vector<1x16xf32> to vector<4x16xf32>
    %932 = arith.mulf %930, %931 : vector<4x16xf32>
    %933 = vector.extract_strided_slice %904 {offsets = [0, 1], sizes = [4, 1], strides = [1, 1]} : vector<4x4xf32> to vector<4x1xf32>
    %934 = vector.extract_strided_slice %242 {offsets = [1, 0], sizes = [1, 16], strides = [1, 1]} : vector<4x16xf32> to vector<1x16xf32>
    %935 = vector.broadcast %933 : vector<4x1xf32> to vector<4x16xf32>
    %936 = vector.broadcast %934 : vector<1x16xf32> to vector<4x16xf32>
    %937 = arith.mulf %935, %936 : vector<4x16xf32>
    %938 = arith.addf %932, %937 : vector<4x16xf32>
    %939 = vector.extract_strided_slice %904 {offsets = [0, 2], sizes = [4, 1], strides = [1, 1]} : vector<4x4xf32> to vector<4x1xf32>
    %940 = vector.extract_strided_slice %242 {offsets = [2, 0], sizes = [1, 16], strides = [1, 1]} : vector<4x16xf32> to vector<1x16xf32>
    %941 = vector.broadcast %939 : vector<4x1xf32> to vector<4x16xf32>
    %942 = vector.broadcast %940 : vector<1x16xf32> to vector<4x16xf32>
    %943 = arith.mulf %941, %942 : vector<4x16xf32>
    %944 = arith.addf %938, %943 : vector<4x16xf32>
    %945 = vector.extract_strided_slice %904 {offsets = [0, 3], sizes = [4, 1], strides = [1, 1]} : vector<4x4xf32> to vector<4x1xf32>
    %946 = vector.extract_strided_slice %242 {offsets = [3, 0], sizes = [1, 16], strides = [1, 1]} : vector<4x16xf32> to vector<1x16xf32>
    %947 = vector.broadcast %945 : vector<4x1xf32> to vector<4x16xf32>
    %948 = vector.broadcast %946 : vector<1x16xf32> to vector<4x16xf32>
    %949 = arith.mulf %947, %948 : vector<4x16xf32>
    %950 = arith.addf %944, %949 : vector<4x16xf32>
    %951 = arith.addf %902, %904 : vector<4x4xf32>
    %952 = arith.addf %240, %242 : vector<4x16xf32>
    %953 = vector.extract_strided_slice %951 {offsets = [0, 0], sizes = [4, 1], strides = [1, 1]} : vector<4x4xf32> to vector<4x1xf32>
    %954 = vector.extract_strided_slice %952 {offsets = [0, 0], sizes = [1, 16], strides = [1, 1]} : vector<4x16xf32> to vector<1x16xf32>
    %955 = vector.broadcast %953 : vector<4x1xf32> to vector<4x16xf32>
    %956 = vector.broadcast %954 : vector<1x16xf32> to vector<4x16xf32>
    %957 = arith.mulf %955, %956 : vector<4x16xf32>
    %958 = vector.extract_strided_slice %951 {offsets = [0, 1], sizes = [4, 1], strides = [1, 1]} : vector<4x4xf32> to vector<4x1xf32>
    %959 = vector.extract_strided_slice %952 {offsets = [1, 0], sizes = [1, 16], strides = [1, 1]} : vector<4x16xf32> to vector<1x16xf32>
    %960 = vector.broadcast %958 : vector<4x1xf32> to vector<4x16xf32>
    %961 = vector.broadcast %959 : vector<1x16xf32> to vector<4x16xf32>
    %962 = arith.mulf %960, %961 : vector<4x16xf32>
    %963 = arith.addf %957, %962 : vector<4x16xf32>
    %964 = vector.extract_strided_slice %951 {offsets = [0, 2], sizes = [4, 1], strides = [1, 1]} : vector<4x4xf32> to vector<4x1xf32>
    %965 = vector.extract_strided_slice %952 {offsets = [2, 0], sizes = [1, 16], strides = [1, 1]} : vector<4x16xf32> to vector<1x16xf32>
    %966 = vector.broadcast %964 : vector<4x1xf32> to vector<4x16xf32>
    %967 = vector.broadcast %965 : vector<1x16xf32> to vector<4x16xf32>
    %968 = arith.mulf %966, %967 : vector<4x16xf32>
    %969 = arith.addf %963, %968 : vector<4x16xf32>
    %970 = vector.extract_strided_slice %951 {offsets = [0, 3], sizes = [4, 1], strides = [1, 1]} : vector<4x4xf32> to vector<4x1xf32>
    %971 = vector.extract_strided_slice %952 {offsets = [3, 0], sizes = [1, 16], strides = [1, 1]} : vector<4x16xf32> to vector<1x16xf32>
    %972 = vector.broadcast %970 : vector<4x1xf32> to vector<4x16xf32>
    %973 = vector.broadcast %971 : vector<1x16xf32> to vector<4x16xf32>
    %974 = arith.mulf %972, %973 : vector<4x16xf32>
    %975 = arith.addf %969, %974 : vector<4x16xf32>
    %976 = arith.subf %927, %950 : vector<4x16xf32>
    %977 = arith.subf %975, %927 : vector<4x16xf32>
    %978 = arith.subf %977, %950 : vector<4x16xf32>
    %c0_47 = arith.constant 0 : index
    %c0_48 = arith.constant 0 : index
    %c0_49 = arith.constant 0 : index
    %c0_50 = arith.constant 0 : index
    %979 = vector.load %arg5[%c0_47, %c0_48, %c0_49, %c0_50] : memref<2x1x4x16xf32, #tpu.memory_space<vmem>>, vector<1x1x4x16xf32>
    %980 = vector.shape_cast %979 : vector<1x1x4x16xf32> to vector<4x16xf32>
    %981 = vector.shape_cast %976 : vector<4x16xf32> to vector<1x1x4x16xf32>
    tpu.vector_store %arg5[%c0_47, %c0_48, %c0_49, %c0_50], %981 {strides = array<i32>} : memref<2x1x4x16xf32, #tpu.memory_space<vmem>>, vector<1x1x4x16xf32>,
    %c1_51 = arith.constant 1 : index
    %c0_52 = arith.constant 0 : index
    %c0_53 = arith.constant 0 : index
    %c0_54 = arith.constant 0 : index
    %982 = vector.load %arg5[%c1_51, %c0_52, %c0_53, %c0_54] : memref<2x1x4x16xf32, #tpu.memory_space<vmem>>, vector<1x1x4x16xf32>
    %983 = vector.shape_cast %982 : vector<1x1x4x16xf32> to vector<4x16xf32>
    %984 = vector.shape_cast %978 : vector<4x16xf32> to vector<1x1x4x16xf32>
    tpu.vector_store %arg5[%c1_51, %c0_52, %c0_53, %c0_54], %984 {strides = array<i32>} : memref<2x1x4x16xf32, #tpu.memory_space<vmem>>, vector<1x1x4x16xf32>,
    return
  }
  func.func @transform_0(%arg0: i32, %arg1: memref<2xf32, #tpu.memory_space<smem>>, %arg2: memref<2xf32, #tpu.memory_space<smem>>) -> (i32, i32, i32, i32) {
    %c0_i32 = arith.constant 0 : i32
    %c0_i32_0 = arith.constant 0 : i32
    %c0_i32_1 = arith.constant 0 : i32
    %c0_i32_2 = arith.constant 0 : i32
    return %c0_i32, %arg0, %c0_i32_0, %c0_i32_1 : i32, i32, i32, i32
  }
  func.func @transform_1(%arg0: i32, %arg1: memref<2xf32, #tpu.memory_space<smem>>, %arg2: memref<2xf32, #tpu.memory_space<smem>>) -> (i32, i32, i32, i32) {
    %c0_i32 = arith.constant 0 : i32
    %c0_i32_0 = arith.constant 0 : i32
    %c0_i32_1 = arith.constant 0 : i32
    %c0_i32_2 = arith.constant 0 : i32
    return %c0_i32, %arg0, %c0_i32_0, %c0_i32_1 : i32, i32, i32, i32
  }
  func.func @transform_2(%arg0: i32, %arg1: memref<2xf32, #tpu.memory_space<smem>>, %arg2: memref<2xf32, #tpu.memory_space<smem>>) -> (i32, i32, i32, i32) {
    %c0_i32 = arith.constant 0 : i32
    %c0_i32_0 = arith.constant 0 : i32
    %c0_i32_1 = arith.constant 0 : i32
    %c0_i32_2 = arith.constant 0 : i32
    return %c0_i32, %arg0, %c0_i32_0, %c0_i32_1 : i32, i32, i32, i32
  }
}

</mosaic_0001>

<bundles_post_ra>
// kernel: tpu_custom_call.1
= control target key start
LH: loop header
LB: loop body
LE: loop exit
PB: predicated region body
PF: predicated region fallthrough
CT: control target
= control target key end

     0   :  { %s2808_s0 = inlined_call_operand.hbm [shape: f32[2], index: 0, kind: input, shape index: {}]   ;;  %s2809_s2 = inlined_call_operand.hbm [shape: f32[2,2,4,4], index: 2, kind: input, shape index: {}]   ;;  %s2810_s3 = inlined_call_operand.hbm [shape: f32[2,2,4,16], index: 3, kind: input, shape index: {}]   ;;  %s2811_s4 = inlined_call_operand.hbm [shape: f32[2,2,4,16], index: 4, kind: output, shape index: {}]   ;;  %s2812_s1 = inlined_call_operand.vmem [shape: f32[2], index: 1, kind: input, shape index: {}]  }
   0x1   :  { %s1796_s17 = scalar_lea.hbm %s2808_s0, 16 }
   0x2   :  { %p1797_p0 = scmp.ne.s32.totalorder %s2808_s0, %s1796_s17  ;;  %p1800_p1 = scmp.lt.u32.totalorder %s1796_s17, %s2808_s0 }
   0x4   :  { %p1802_p2 = pnand %p1800_p1, %p1797_p0 }
   0x6   :  { %1805 = shalt.err (!%p1802_p2)  }
   0x7   :  { %s1952_s22 = smov [#allocation3]   ;;  %s11_s27 = sshll.u32 %s2812_s1, 4  ;;  %s12_s27 = int_to_ptr.vmem [resolvable:$true] %s11_s27 }
   0x8   :  { %10 = dma.hbm_to_smem %s2808_s0, 16, %s1952_s22, [#allocation2] }
   0x9   :  { %s1806_s28 = scalar_lea.vmem %s12_s27, 16  ;;  %p1811_p4 = scmp.lt.s32.totalorder %s12_s27, %s12_s27 }
   0xa   :  { %p1807_p3 = scmp.ne.s32.totalorder %s12_s27, %s1806_s28  ;;  %p1812_p5 = scmp.lt.s32.totalorder %s1806_s28, %s1806_s28 }
   0xc   :  { %p1813_p6 = por %p1812_p5, %p1811_p4 }
   0xe   :  { %p1814_p7 = pnand %p1813_p6, %p1807_p3 }
  0x10   :  { %1817 = shalt.err (!%p1814_p7)  }
  0x11   :  { %s1953_s29 = smov [#allocation4]  }
  0x12   :  { %14 = dma.vmem_to_smem %s12_s27, 16, %s1953_s29, [#allocation2] }
  0x13   :  { %1922 = dma.done.wait [#allocation2], 32 }
  0x14   :  { %1923 = vsyncadd [#allocation2], 4294967264 }
  0x15   :  { %16 = sfence }
  0x16   :  { %17 = vsyncpa [#allocation6], 0 }
  0x17   :  { %19 = vsyncpa [#allocation6 + $0x1], 0 }
  0x18   :  { %20 = vsyncpa [#allocation9], 0 }
  0x19   :  { %22 = vsyncpa [#allocation9 + $0x1], 0 }
  0x1a   :  { %23 = vsyncpa [#allocation7], 0 }
  0x1b   :  { %25 = vsyncpa [#allocation7 + $0x1], 0  ;;  %s2008_s0 = smov 0   ;;  %s2010_s1 = smov 0  }
  0x1c   :  { %s2012_s30 = smov 0   ;;  %s2014_s5 = smov 0  }
  0x1d LB: > { %s2029_s6 = sadd.s32 4294967295, %s1950_s5   ;;  %s1613_s7 = sadd.s32 4294967294, %s1950_s5   ;;  %s1950_s5 = sphi %s2014_s5, %s2829_s5   ;;  %s1946_s30 = sphi %s2012_s30, %s2828_s30   ;;  %s1942_s1 = sphi %s2010_s1, %s2827_s1   ;;  %s1938_s0 = sphi %s2008_s0, %s2826_s0  }
  0x1e   : > { %s2033_s8 = sadd.s32 1, %s1950_s5   ;;  %s38_s9 = sadd.s32 1, %s1946_s30 }
  0x1f   : > { %s35_s10 = ssub.s32 %s1950_s5, %s2033_s8  ;;  %p45_p8 = scmp.ne.s32.totalorder %s1946_s30, %s1942_s1 }
  0x20   : > { %p36_p9 = scmp.eq.s32.totalorder %s35_s10, 0  ;;  %p46_p10 = scmp.eq.s32.totalorder %s1950_s5, 0 }
  0x21   : > { %p51_p11 = scmp.ne.s32.totalorder %s1942_s1, %s1938_s0  ;;  %p52_p12 = scmp.eq.s32.totalorder %s2029_s6, 0 }
  0x22   : > { %s2045_s11 = scalar_select %p36_p9, %s1946_s30, %s38_s9  }
  0x23   : > { %p2047_p13 = por %p46_p10, %p45_p8  ;;  %p2051_p0 = por %p52_p12, %p51_p11 }
  0x24   : > { %p101_p1 = scmp.eq.s32.totalorder %s2029_s6, 1  ;;  %p107_p2 = scmp.eq.s32.totalorder %s1613_s7, 1 }
  0x25   : > { %s2816_s13 = scalar_select %p2051_p0, 1, 0 }
  0x26   : > { %p1649_p4 = scmp.lt.s32.totalorder %s1950_s5, 2  ;;  %p2058_p5 = por %p101_p1, %p45_p8 }
  0x27   : > { %p2062_p6 = por %p107_p2, %p51_p11  ;;  %s2067_s16 = sand.u32 1, %s1946_s30  }
  0x28   : > { %s2817_s14 = scalar_select %p2058_p5, 1, 0 }
  0x29   : > { %s2818_s15 = scalar_select %p2062_p6, 1, 0 }
  0x2a   : > { %s1617_s17 = sshll.u32 %s1950_s5, 6  ;;  %s1616_s18 = sshll.u32 %s2067_s16, 3 }
  0x2b   : > { %s2076_s21 = scalar_lea.hbm %s2809_s2, %s1617_s17  ;;  %s131_s22 = scalar_lea.vmem [#allocation5], %s1616_s18 }
  0x2c   : > { %s137_s23 = sshll.u32 %s131_s22, 4  ;;  %p2082_p7 = pnand %p1649_p4, %p2047_p13  ;;  %s2086_s23 = int_to_ptr.vmem [resolvable:$true] %s137_s23 }
  0x2d   : > { %s128_s25 = scalar_lea.sflag [#allocation6], %s2067_s16  ;;  %s1818_s26 = scalar_lea.hbm %s2076_s21, 128 }
  0x2e   : > { %p1819_p9 = scmp.ne.s32.totalorder %s2076_s21, %s1818_s26  ;;  %p1820_p10 = pneg %p2082_p7 }
  0x2f   : > { %s1823_s29 = scalar_lea.hbm %s2809_s2, 256  ;;  %p1824_p13 = scmp.lt.u32.totalorder %s2076_s21, %s2809_s2 }
  0x30   : > { %p1821_p11 = pnand %p1820_p10, %p1819_p9  ;;  %p1825_p1 = scmp.lt.u32.totalorder %s1823_s29, %s1818_s26 }
  0x31   : > { %p1827_p4 = scmp.lt.u32.totalorder %s1818_s26, %s2076_s21 }
  0x32   : > { %p1822_p12 = pneg %p1821_p11  ;;  %p1826_p2 = por %p1825_p1, %p1824_p13 }
  0x34   : > { %p1828_p3 = por %p1827_p4, %p1826_p2 }
  0x36   : > { %p1829_p8 = pnand %p1828_p3, %p1822_p12 }
  0x38   : > { %1832 = shalt.err (!%p1829_p8)
}
  0x39   : > { %s1833_s10 = scalar_lea.vmem %s2086_s23, 128  ;;  %s1954_s12 = smov [#allocation5]  }
  0x3a   : > { %p1834_p9 = scmp.ne.s32.totalorder %s2086_s23, %s1833_s10  ;;  %s1838_s19 = sshll.u32 %s1954_s12, 4  ;;  %s1839_s19 = int_to_ptr.vmem [resolvable:$false] %s1838_s19 }
  0x3b   : > { %s1840_s20 = scalar_lea.vmem %s1839_s19, 256  ;;  %p1841_p5 = scmp.lt.s32.totalorder %s2086_s23, %s1839_s19 }
  0x3c   : > { %p1836_p11 = pnand %p1834_p9, %p1820_p10  ;;  %p1842_p13 = scmp.lt.s32.totalorder %s1840_s20, %s1833_s10 }
  0x3e   : > { %p1837_p6 = pneg %p1836_p11  ;;  %p1843_p1 = por %p1842_p13, %p1841_p5 }
  0x40   : > { %p1844_p2 = pnand %p1843_p1, %p1837_p6 }
  0x42   : > { %1847 = shalt.err (!%p1844_p2)
}
  0x43   : > { %s1955_s22 = smov 128   ;;  %s1956_s26 = smov 64  }
  0x44   : > { %s1957_s27 = smov 4   ;;  %p165_p3 = scmp.lt.s32.totalorder %s1950_s5, 3 }
  0x45   : > { %1641 = dma.hbm_to_vmem [thread:$0]  (!%p2082_p7), %s2076_s21, 128, %s2086_s23, %s128_s25, %s1955_s22, %s1956_s26, %s1957_s27  }
  0x46   : > { %s2126_s7 = scalar_lea.hbm %s2810_s3, %s1617_s17  ;;  %p2820_p5 = scmp.ge.s32.totalorder %s1950_s5, 1 }
  0x47   : > { %s151_s10 = scalar_lea.vmem [#allocation8], %s1616_s18  ;;  %s148_s21 = scalar_lea.sflag [#allocation9], %s2067_s16 }
  0x48   : > { %p2130_p6 = pnand %p2820_p5, %p165_p3  ;;  %s157_s12 = sshll.u32 %s151_s10, 4  ;;  %s2136_s12 = int_to_ptr.vmem [resolvable:$true] %s157_s12 }
  0x49   : > { %s1848_s23 = scalar_lea.hbm %s2126_s7, 128  ;;  %s1853_s19 = scalar_lea.hbm %s2810_s3, 256 }
  0x4a   : > { %p1849_p8 = scmp.ne.s32.totalorder %s2126_s7, %s1848_s23  ;;  %p1854_p9 = scmp.lt.u32.totalorder %s2126_s7, %s2810_s3 }
  0x4b   : > { %p1855_p11 = scmp.lt.u32.totalorder %s1853_s19, %s1848_s23  ;;  %p1857_p1 = scmp.lt.u32.totalorder %s1848_s23, %s2126_s7 }
  0x4c   : > { %p1851_p12 = pnand %p1849_p8, %p1820_p10 }
  0x4d   : > { %p1856_p13 = por %p1855_p11, %p1854_p9 }
  0x4e   : > { %p1852_p4 = pneg %p1851_p12 }
  0x4f   : > { %p1858_p2 = por %p1857_p1, %p1856_p13 }
  0x51   : > { %p1859_p3 = pnand %p1858_p2, %p1852_p4 }
  0x53   : > { %1862 = shalt.err (!%p1859_p3)
}
  0x54   : > { %s1863_s18 = scalar_lea.vmem %s2136_s12, 128  ;;  %s1958_s29 = smov [#allocation8]  }
  0x55   : > { %p1864_p5 = scmp.ne.s32.totalorder %s2136_s12, %s1863_s18  ;;  %s1868_s10 = sshll.u32 %s1958_s29, 4  ;;  %s1869_s10 = int_to_ptr.vmem [resolvable:$false] %s1868_s10 }
  0x56   : > { %s1870_s17 = scalar_lea.vmem %s1869_s10, 256  ;;  %p1871_p0 = scmp.lt.s32.totalorder %s2136_s12, %s1869_s10 }
  0x57   : > { %p1866_p8 = pnand %p1864_p5, %p1820_p10  ;;  %p1872_p9 = scmp.lt.s32.totalorder %s1870_s17, %s1863_s18 }
  0x59   : > { %p1867_p12 = pneg %p1866_p8  ;;  %p1873_p11 = por %p1872_p9, %p1871_p0 }
  0x5b   : > { %p1874_p13 = pnand %p1873_p11, %p1867_p12 }
  0x5d   : > { %1877 = shalt.err (!%p1874_p13)
}
  0x5e   : > { %1644 = dma.hbm_to_vmem [thread:$0]  (!%p2082_p7), %s2126_s7, 128, %s2136_s12, %s148_s21, %s1955_s22, %s1956_s26, %s1957_s27  }
  0x5f   : > { %169 = sbr.rel (%p2130_p6) target bundleno = 1762 (0x6e2), region = 28  ;;  %s2170_s23 = sand.u32 (!%p2130_p6), 1, %s1942_s1  }
  0x60   : > { %s2173_s25 = sshll.u32 (!%p2130_p6), %s2170_s23, 3  ;;  %s172_s24 = scalar_lea.sflag (!%p2130_p6), [#allocation6], %s2170_s23 }
  0x61   : > { %s175_s19 = scalar_lea.vmem (!%p2130_p6), [#allocation5], %s2173_s25  ;;  %p2822_p0 = scmp.ne.s32.totalorder (!%p2130_p6), %s2816_s13, 0 }
  0x66   : > { %1925 = dma.done.wait (%p2822_p0), %s172_s24, 128  }
  0x67   : > { %1927 = vsyncadd (%p2822_p0), %s172_s24, 4294967168  ;;  %s181_s16 = scalar_lea.sflag [#allocation9], %s2170_s23  ;;  %s184_s22 = scalar_lea.vmem [#allocation8], %s2173_s25 }
  0x68   : > { %1929 = dma.done.wait (%p2822_p0), %s181_s16, 128  }
  0x69   : > { %1931 = vsyncadd (%p2822_p0), %s181_s16, 4294967168  ;;  %v1959_v0 = vmov 2   ;;  %v1960_v1 = vmov 0   ;;  %v2189_v2 = vld [vmem:[%s175_s19] sm:$0xf]  ;;  %v1961_v5 = vmov 1   ;;  %v210_v7 = vlaneseq }
  0x6a   : > { %1698 = vset.pattern.permute.xlu1 %v1959_v0  ;;  %1696 = vset.pattern.permute.xlu0 %v1960_v1  ;;  %v2191_v3 = vld [vmem:[%s175_s19 + $0x4] sm:$0xf]  ;;  %v1962_v6 = vmov 3   ;;  %s217_s13 = sld [smem:[#allocation3 + %s2029_s6]]  ;;  %v1963_v16 = vmov 0.0   ;;  %vm1500_vm1 = vcmask 125952  }
  0x6b   : > { %245 = vperm.xlu1 %1698, %v2189_v2   ;;  %226 = vperm.xlu0 %1696, %v2189_v2   ;;  %v2197_v4 = vadd.f32 %v2191_v3, %v2189_v2  ;;  %s219_s26 = sld [smem:[#allocation4 + %s2029_s6]]  ;;  %v211_v10 = vshrl.u32 %v210_v7, 7  ;;  %v213_v11 = vand.u32 127, %v210_v7  ;;  %p2823_p10 = scmp.ne.s32.totalorder %s2817_s14, 0 }
  0x6d   : > { %vm214_vm0 = vcmp.eq.s32.totalorder %v211_v10, %v213_v11  ;;  %v2240_v34 = vsub.s32 0, %v211_v10  ;;  %v2242_v35 = vsub.s32 1, %v211_v10  ;;  %v2252_v41 = vsub.s32 2, %v211_v10 }
  0x6e   : > { %v1624_v17 = vsel %vm214_vm0, 1.0, %v1963_v16  ;;  %v2262_v44 = vsub.s32 3, %v211_v10 }
  0x6f   : > { %1700 = vset.pattern.permute.xlu1 %v1960_v1  ;;  %1697 = vset.pattern.permute.xlu0 %v1961_v5  ;;  %v580_v20 = vmul.f32 2.0876756e-09, %v1624_v17  ;;  %v568_v23 = vmul.f32 2.4801588e-05, %v1624_v17  ;;  %v556_v25 = vmul.f32 0.041666668, %v1624_v17  ;;  %v2246_v38 = vrot.slane %v2189_v2, %v2240_v34 }
  0x70   : > { %235 = vperm.xlu0 %1697, %v2189_v2   ;;  %307 = vperm.xlu1 %1700, %v2197_v4   ;;  %s2219_s27 = smul.f32 0.0625, %s217_s13  ;;  %v2250_v39 = vrot.slane %v2189_v2, %v2242_v35  ;;  %v2256_v42 = vrot.slane %v2191_v3, %v2240_v34  ;;  %v2260_v43 = vrot.slane %v2191_v3, %v2242_v35 }
  0x71   : > { %s2221_s7 = smul.f32 0.0625, %s219_s26  ;;  %v2268_v47 = vrot.slane %v2189_v2, %v2252_v41  ;;  %v2272_v48 = vrot.slane %v2197_v4, %v2242_v35  ;;  %v2278_v53 = vrot.slane %v2189_v2, %v2262_v44  ;;  %v2282_v54 = vrot.slane %v2191_v3, %v2252_v41 }
  0x72   : > { %v515_v8 = vstv %s2219_s27  ;;  %v2286_v55 = vrot.slane %v2197_v4, %v2240_v34  ;;  %v2290_v56 = vrot.slane %v2197_v4, %v2252_v41  ;;  %v2294_v58 = vrot.slane %v2191_v3, %v2262_v44  ;;  %s499_s9 = smul.f32 %s2219_s27, %s2219_s27 }
  0x73   : > { %v517_v9 = vstv %s2221_s7  ;;  %v516_v12 = vmul.f32 %v515_v8, %v2189_v2  ;;  %v520_v14 = vmul.f32 %v2191_v3, %v515_v8  ;;  %s500_s12 = smul.f32 %s2221_s7, %s2221_s7 }
  0x74   : > { %1699 = vset.pattern.permute.xlu0 %v1960_v1  ;;  %1701 = vset.pattern.permute.xlu1 %v1961_v5  ;;  %v518_v13 = vmul.f32 %v2191_v3, %v517_v9  ;;  %v521_v15 = vmul.f32 %v517_v9, %v2189_v2  ;;  %s502_s21 = smul.f32 2.0, %s2219_s27 }
  0x75   : > { %266 = vperm.xlu0 %1699, %v2191_v3   ;;  %316 = vperm.xlu1 %1701, %v2197_v4   ;;  %s2315_s20 = ssub.f32 %s499_s9, %s500_s12  ;;  %s1629_s12 = sshll.u32 %s2029_s6, 6 }
  0x76   : > { %v519_v18 = vsub.f32 %v516_v12, %v518_v13  ;;  %v2230_v19 = vadd.f32 %v521_v15, %v520_v14  ;;  %s2318_s28 = smul.f32 %s502_s21, %s2221_s7  ;;  %s1964_s6 = smov [#allocation10]  }
  0x77   : > { %s504_s18 = smul.f32 %s2315_s20, %s2219_s27 }
  0x78   : > { %v581_v21 = vmul.f32 1.6059044e-10, %v519_v18  ;;  %v569_v24 = vmul.f32 2.7557319e-06, %v519_v18  ;;  %v557_v26 = vmul.f32 0.008333334, %v519_v18  ;;  %v2238_v29 = vadd.f32 %v1624_v17, %v519_v18  ;;  %s505_s29 = smul.f32 %s2318_s28, %s2221_s7 }
  0x79   : > { %1703 = vset.pattern.permute.xlu0 %v1962_v6  ;;  %275 = vperm.xlu1 %1701, %v2191_v3   ;;  %s507_s10 = smul.f32 %s2315_s20, %s2221_s7 }
  0x7a   : > { %255 = vperm.xlu0 %1703, %v2189_v2   ;;  %v2232_v22 = vadd.f32 %v581_v21, %v580_v20  ;;  %v2234_v27 = vadd.f32 %v569_v24, %v568_v23  ;;  %v2236_v28 = vadd.f32 %v557_v26, %v556_v25  ;;  %v523_v24 = vstv %s2315_s20  ;;  %s508_s17 = smul.f32 %s2318_s28, %s2219_s27  ;;  %s2418_s13 = ssub.f32 %s504_s18, %s505_s29 }
  0x7b   : > { %v525_v25 = vstv %s2318_s28  ;;  %s510_s24 = smul.f32 %s2315_s20, %s2315_s20  ;;  %s1882_s29 = sshll.u32 %s1964_s6, 4  ;;  %s1883_s29 = int_to_ptr.vmem [resolvable:$false] %s1882_s29 }
  0x7c   : > { %s511_s19 = smul.f32 %s2318_s28, %s2318_s28  ;;  %s509_s26 = sadd.f32 %s508_s17, %s507_s10 }
  0x7d   : > { %1702 = vset.pattern.permute.xlu1 %v1959_v0  ;;  %s513_s16 = smul.f32 2.0, %s2315_s20  ;;  %s2763_s20 = scalar_lea.hbm %s2811_s4, %s1629_s12 }
  0x7e   : > { %326 = vperm.xlu1 %1702, %v2197_v4   ;;  %295 = vperm.xlu0 %1703, %v2191_v3   ;;  %s512_s7 = ssub.f32 %s510_s24, %s511_s19  ;;  %s1884_s10 = scalar_lea.vmem %s1883_s29, 256 }
  0x7f   : > { %s514_s9 = smul.f32 %s513_s16, %s2318_s28  ;;  %s1505_s28 = scalar_lea.sflag [#allocation7], %s2170_s23 }
  0x82   : > { %285 = vperm.xlu1 %1702, %v2191_v3   ;;  %1706 = vset.pattern.permute.xlu0 %v1961_v5  ;;  %v2304_v3 = vrot.slane %v2197_v4, %v2262_v44 }
  0x86   : > { %1704 = vset.pattern.permute.xlu1 %v1962_v6 }
  0x87   : > { %336 = vperm.xlu1 %1704, %v2197_v4  }
  0x8b   : > { %1705 = vset.pattern.permute.xlu1 %v1960_v1 }
  0xea   : > { %v246_v30 = vpop.permute.xlu1 %245  ;;  %v227_v31 = vpop.permute.xlu0 %226 }
  0xeb   : > { %v233_v45 = vmul.f32 %v2246_v38, %v227_v31  ;;  %v252_v62 = vmul.f32 %v2268_v47, %v246_v30 }
  0xef   : > { %v308_v32 = vpop.permute.xlu1 %307  ;;  %v236_v33 = vpop.permute.xlu0 %235 }
  0xf0   : > { %v242_v46 = vmul.f32 %v2250_v39, %v236_v33  ;;  %v314_v8 = vmul.f32 %v2286_v55, %v308_v32 }
  0xf2   : > { %v243_v57 = vadd.f32 %v242_v46, %v233_v45 }
  0xf4   : > { %v317_v36 = vpop.permute.xlu1 %316  ;;  %v267_v37 = vpop.permute.xlu0 %266  ;;  %v253_v10 = vadd.f32 %v252_v62, %v243_v57 }
  0xf5   : > { %v273_v51 = vmul.f32 %v2256_v42, %v267_v37  ;;  %v323_v59 = vmul.f32 %v2272_v48, %v317_v36 }
  0xf7   : > { %v324_v13 = vadd.f32 %v323_v59, %v314_v8 }
  0xf8   : > { %v276_v40 = vpop.permute.xlu1 %275 }
  0xf9   : > { %v256_v49 = vpop.permute.xlu0 %255  ;;  %v282_v52 = vmul.f32 %v2260_v43, %v276_v40 }
  0xfa   : > { %v262_v2 = vmul.f32 %v2278_v53, %v256_v49 }
  0xfb   : > { %v283_v63 = vadd.f32 %v282_v52, %v273_v51 }
  0xfc   : > { %v263_v14 = vadd.f32 %v262_v2, %v253_v10 }
  0xfd   : > { %v327_v50 = vpop.permute.xlu1 %326  ;;  %v296_v60 = vpop.permute.xlu0 %295 }
  0xfe   : > { %v333_v9 = vmul.f32 %v2290_v56, %v327_v50  ;;  %v302_v11 = vmul.f32 %v2294_v58, %v296_v60 }
 0x100   : > { %v334_v17 = vadd.f32 %v333_v9, %v324_v13 }
 0x101   : > { %v286_v61 = vpop.permute.xlu1 %285 }
 0x102   : > { %v292_v7 = vmul.f32 %v2282_v54, %v286_v61 }
 0x104   : > { %v293_v12 = vadd.f32 %v292_v7, %v283_v63 }
 0x106   : > { %v303_v15 = vadd.f32 %v302_v11, %v293_v12  ;;  %v337_v16 = vpop.permute.xlu1 %336 }
 0x107   : > { %v343_v18 = vmul.f32 %v2304_v3, %v337_v16 }
 0x108   : > { %v2313_v20 = vsub.f32 %v263_v14, %v303_v15 }
 0x109   : > { %v344_v4 = vadd.f32 %v343_v18, %v334_v17 }
 0x10a   : > { %355 = vperm.xlu0 %1706, %v2313_v20   ;;  %350 = vperm.xlu1 %1705, %v2313_v20   ;;  %v529_v30 = vmul.f32 %v525_v25, %v2313_v20  ;;  %v524_v31 = vmul.f32 %v523_v24, %v2313_v20  ;;  %v432_v60 = vrot.slane %v2313_v20, %v2242_v35 }
 0x10b   : > { %v346_v21 = vsub.f32 %v344_v4, %v263_v14  ;;  %v427_v61 = vrot.slane %v2313_v20, %v2240_v34  ;;  %v438_v7 = vrot.slane %v2313_v20, %v2252_v41  ;;  %v444_v17 = vrot.slane %v2313_v20, %v2262_v44 }
 0x10d   : > { %v2322_v23 = vsub.f32 %v346_v21, %v303_v15 }
 0x10e   : > { %1707 = vset.pattern.permute.xlu0 %v1959_v0  ;;  %1708 = vset.pattern.permute.xlu1 %v1962_v6 }
 0x10f   : > { %361 = vperm.xlu0 %1707, %v2313_v20   ;;  %367 = vperm.xlu1 %1708, %v2313_v20   ;;  %v528_v26 = vmul.f32 %v523_v24, %v2322_v23  ;;  %v526_v32 = vmul.f32 %v525_v25, %v2322_v23  ;;  %v2341_v45 = vadd.f32 %v2322_v23, %v2313_v20 }
 0x110   : > { %v450_v10 = vrot.slane %v2322_v23, %v2240_v34  ;;  %v455_v11 = vrot.slane %v2322_v23, %v2242_v35  ;;  %v461_v14 = vrot.slane %v2322_v23, %v2252_v41  ;;  %v467_v18 = vrot.slane %v2322_v23, %v2262_v44 }
 0x111   : > { %v2334_v33 = vadd.f32 %v529_v30, %v528_v26  ;;  %v527_v36 = vsub.f32 %v524_v31, %v526_v32 }
 0x113   : > { %385 = vperm.xlu0 %1707, %v2322_v23   ;;  %1709 = vset.pattern.permute.xlu1 %v1960_v1  ;;  %v583_v37 = vmul.f32 1.1470745e-11, %v527_v36  ;;  %v571_v40 = vmul.f32 2.755732e-07, %v527_v36  ;;  %v559_v46 = vmul.f32 0.0013888889, %v527_v36 }
 0x114   : > { %374 = vperm.xlu1 %1709, %v2322_v23   ;;  %v548_v51 = vmul.f32 0.5, %v527_v36 }
 0x115   : > { %v2344_v49 = vadd.f32 %v583_v37, %v2232_v22  ;;  %v2347_v50 = vadd.f32 %v571_v40, %v2234_v27  ;;  %v2351_v52 = vadd.f32 %v559_v46, %v2236_v28 }
 0x116   : > { %v2355_v57 = vadd.f32 %v548_v51, %v2238_v29 }
 0x117   : > { %410 = vperm.xlu0 %1707, %v2341_v45  }
 0x118   : > { %1710 = vset.pattern.permute.xlu1 %v1961_v5 }
 0x119   : > { %379 = vperm.xlu1 %1710, %v2322_v23  }
 0x11b   : > { %1714 = vset.pattern.permute.xlu0 %v1962_v6 }
 0x11c   : > { %391 = vperm.xlu0 %1714, %v2322_v23  }
 0x11d   : > { %1711 = vset.pattern.permute.xlu1 %v1960_v1 }
 0x11e   : > { %399 = vperm.xlu1 %1711, %v2341_v45  }
 0x120   : > { %1718 = vset.pattern.permute.xlu0 %v1960_v1 }
 0x122   : > { %1712 = vset.pattern.permute.xlu1 %v1961_v5 }
 0x123   : > { %404 = vperm.xlu1 %1712, %v2341_v45  }
 0x127   : > { %1713 = vset.pattern.permute.xlu1 %v1962_v6 }
 0x128   : > { %416 = vperm.xlu1 %1713, %v2341_v45  }
 0x12c   : > { %1715 = vset.pattern.permute.xlu1 %v1960_v1 }
 0x189   : > { %v356_v22 = vpop.permute.xlu0 %355  ;;  %v351_v27 = vpop.permute.xlu1 %350 }
 0x18a   : > { %v433_v63 = vmul.f32 %v432_v60, %v356_v22  ;;  %v428_v2 = vmul.f32 %v427_v61, %v351_v27  ;;  %v358_v23 = vmul.f32 %v356_v22, %v2250_v39  ;;  %v353_v37 = vmul.f32 %v351_v27, %v2246_v38 }
 0x18b   : > { %v473_v39 = vrot.slane %v2341_v45, %v2240_v34  ;;  %v478_v38 = vrot.slane %v2341_v45, %v2242_v35  ;;  %v484_v27 = vrot.slane %v2341_v45, %v2252_v41 }
 0x18c   : > { %v434_v13 = vadd.f32 %v433_v63, %v428_v2  ;;  %v359_v22 = vadd.f32 %v358_v23, %v353_v37 }
 0x18e   : > { %v362_v28 = vpop.permute.xlu0 %361  ;;  %v368_v29 = vpop.permute.xlu1 %367 }
 0x18f   : > { %v439_v9 = vmul.f32 %v438_v7, %v362_v28  ;;  %v445_v31 = vmul.f32 %v444_v17, %v368_v29  ;;  %v364_v51 = vmul.f32 %v362_v28, %v2268_v47  ;;  %v490_v7 = vrot.slane %v2341_v45, %v2262_v44 }
 0x191   : > { %v440_v4 = vadd.f32 %v439_v9, %v434_v13  ;;  %v365_v2 = vadd.f32 %v364_v51, %v359_v22  ;;  %v563_v22 = vmul.f32 0.008333334, %v2230_v19 }
 0x192   : > { %v386_v59 = vpop.permute.xlu0 %385 }
 0x193   : > { %v375_v62 = vpop.permute.xlu1 %374  ;;  %v462_v21 = vmul.f32 %v461_v14, %v386_v59  ;;  %v446_v40 = vadd.f32 %v445_v31, %v440_v4  ;;  %v388_v60 = vmul.f32 %v386_v59, %v2282_v54  ;;  %v533_v4 = vstv %s509_s26 }
 0x194   : > { %v451_v15 = vmul.f32 %v450_v10, %v375_v62  ;;  %v377_v20 = vmul.f32 %v375_v62, %v2256_v42  ;;  %v588_v31 = vmul.f32 1.1470745e-11, %v2334_v33 }
 0x196   : > { %v411_v8 = vpop.permute.xlu0 %410 }
 0x197   : > { %v413_v9 = vmul.f32 %v411_v8, %v2290_v56  ;;  %v485_v10 = vmul.f32 %v484_v27, %v411_v8 }
 0x198   : > { %v380_v12 = vpop.permute.xlu1 %379 }
 0x199   : > { %v456_v16 = vmul.f32 %v455_v11, %v380_v12  ;;  %v382_v24 = vmul.f32 %v380_v12, %v2260_v43 }
 0x19b   : > { %v457_v25 = vadd.f32 %v456_v16, %v451_v15  ;;  %v392_v26 = vpop.permute.xlu0 %391  ;;  %v383_v46 = vadd.f32 %v382_v24, %v377_v20  ;;  %v541_v24 = vstv %s514_s9 }
 0x19c   : > { %v468_v30 = vmul.f32 %v467_v18, %v392_v26  ;;  %v394_v54 = vmul.f32 %v392_v26, %v2294_v58  ;;  %v531_v18 = vstv %s2418_s13 }
 0x19d   : > { %v463_v32 = vadd.f32 %v462_v21, %v457_v25  ;;  %v400_v36 = vpop.permute.xlu1 %399  ;;  %v389_v47 = vadd.f32 %v388_v60, %v383_v46  ;;  %v539_v21 = vstv %s512_s7 }
 0x19e   : > { %v402_v28 = vmul.f32 %v400_v36, %v2286_v55  ;;  %v474_v59 = vmul.f32 %v473_v39, %v400_v36  ;;  %v370_v55 = vmul.f32 %v368_v29, %v2278_v53 }
 0x19f   : > { %v469_v43 = vadd.f32 %v468_v30, %v463_v32  ;;  %v395_v12 = vadd.f32 %v394_v54, %v389_v47  ;;  %v587_v30 = vmul.f32 1.6059044e-10, %v2230_v19 }
 0x1a0   : > { %v371_v56 = vadd.f32 %v370_v55, %v365_v2 }
 0x1a1   : > { %v493_v61 = vsub.f32 %v446_v40, %v469_v43  ;;  %v589_v27 = vadd.f32 %v588_v31, %v587_v30 }
 0x1a2   : > { %v405_v42 = vpop.permute.xlu1 %404  ;;  %v421_v17 = vsub.f32 %v371_v56, %v395_v12 }
 0x1a3   : > { %v407_v62 = vmul.f32 %v405_v42, %v2272_v48  ;;  %v479_v63 = vmul.f32 %v478_v38, %v405_v42  ;;  %v540_v32 = vmul.f32 %v539_v21, %v493_v61  ;;  %v545_v36 = vmul.f32 %v541_v24, %v493_v61 }
 0x1a4   : > { %v532_v20 = vmul.f32 %v531_v18, %v421_v17  ;;  %v564_v61 = vmul.f32 0.0013888889, %v2334_v33 }
 0x1a5   : > { %v408_v58 = vadd.f32 %v407_v62, %v402_v28  ;;  %v480_v11 = vadd.f32 %v479_v63, %v474_v59  ;;  %v552_v59 = vmul.f32 0.5, %v2334_v33 }
 0x1a7   : > { %v417_v13 = vpop.permute.xlu1 %416  ;;  %v414_v48 = vadd.f32 %v413_v9, %v408_v58  ;;  %v486_v45 = vadd.f32 %v485_v10, %v480_v11  ;;  %v565_v11 = vadd.f32 %v564_v61, %v563_v22 }
 0x1a8   : > { %v419_v14 = vmul.f32 %v417_v13, %v2304_v3  ;;  %v491_v15 = vmul.f32 %v490_v7, %v417_v13  ;;  %v537_v3 = vmul.f32 %v533_v4, %v421_v17 }
 0x1aa   : > { %v420_v8 = vadd.f32 %v419_v14, %v414_v48  ;;  %v492_v16 = vadd.f32 %v491_v15, %v486_v45  ;;  %v553_v48 = vadd.f32 %v552_v59, %v2230_v19 }
 0x1ac   : > { %v422_v25 = vsub.f32 %v420_v8, %v371_v56  ;;  %v494_v53 = vsub.f32 %v492_v16, %v446_v40  ;;  %v575_v40 = vmul.f32 2.7557319e-06, %v2230_v19 }
 0x1ae   : > { %v423_v29 = vsub.f32 %v422_v25, %v395_v12  ;;  %v495_v26 = vsub.f32 %v494_v53, %v469_v43  ;;  %v576_v43 = vmul.f32 2.755732e-07, %v2334_v33 }
 0x1b0   : > { %v534_v23 = vmul.f32 %v533_v4, %v423_v29  ;;  %v536_v37 = vmul.f32 %v531_v18, %v423_v29  ;;  %v542_v46 = vmul.f32 %v541_v24, %v495_v26  ;;  %v544_v51 = vmul.f32 %v539_v21, %v495_v26 }
 0x1b1   : > { %v577_v58 = vadd.f32 %v576_v43, %v575_v40 }
 0x1b2   : > { %v535_v60 = vsub.f32 %v532_v20, %v534_v23  ;;  %v538_v39 = vadd.f32 %v537_v3, %v536_v37  ;;  %v2426_v42 = vsub.f32 %v540_v32, %v542_v46  ;;  %v2428_v38 = vadd.f32 %v545_v36, %v544_v51 }
 0x1b4   : > { %v590_v47 = vmul.f32 7.6471636e-13, %v538_v39  ;;  %v585_v54 = vmul.f32 7.6471636e-13, %v535_v60  ;;  %v2436_v28 = vadd.f32 %v2428_v38, %v2426_v42  ;;  %v594_v63 = vmul.f32 4.7794773e-14, %v2428_v38 }
 0x1b5   : > { %v592_v7 = vmul.f32 4.7794773e-14, %v2426_v42  ;;  %v578_v55 = vmul.f32 2.5052108e-08, %v538_v39  ;;  %v573_v12 = vmul.f32 2.5052108e-08, %v535_v60  ;;  %v2480_v31 = vrot.slane %v2426_v42, %v2242_v35 }
 0x1b6   : > { %v591_v62 = vadd.f32 %v590_v47, %v589_v27  ;;  %v586_v2 = vadd.f32 %v585_v54, %v2344_v49  ;;  %v561_v13 = vmul.f32 0.0001984127, %v535_v60  ;;  %v566_v33 = vmul.f32 0.0001984127, %v538_v39 }
 0x1b7   : > { %v554_v45 = vmul.f32 0.16666667, %v538_v39  ;;  %v550_v15 = vmul.f32 0.16666667, %v535_v60  ;;  %v2443_v56 = vadd.f32 %v578_v55, %v577_v58  ;;  %v2446_v49 = vadd.f32 %v573_v12, %v2347_v50 }
 0x1b8   : > { %v595_v9 = vadd.f32 %v594_v63, %v591_v62  ;;  %v593_v10 = vadd.f32 %v592_v7, %v586_v2  ;;  %v2449_v8 = vadd.f32 %v561_v13, %v2351_v52  ;;  %v2451_v16 = vadd.f32 %v566_v33, %v565_v11 }
 0x1b9   : > { %v2453_v17 = vadd.f32 %v554_v45, %v553_v48  ;;  %v2456_v19 = vadd.f32 %v550_v15, %v2355_v57  ;;  %v2471_v53 = vrot.slane %v2436_v28, %v2240_v34  ;;  %v2475_v29 = vrot.slane %v2436_v28, %v2242_v35 }
 0x1ba   : > { %638 = vperm.xlu0 %1718, %v595_v9   ;;  %598 = vperm.xlu1 %1715, %v593_v10   ;;  %v676_v14 = vadd.f32 %v595_v9, %v593_v10  ;;  %v2484_v20 = vrot.slane %v2436_v28, %v2252_v41  ;;  %v2489_v32 = vrot.slane %v2426_v42, %v2240_v34 }
 0x1bb   : > { %v2493_v36 = vrot.slane %v2426_v42, %v2252_v41  ;;  %v2499_v46 = vrot.slane %v2428_v38, %v2242_v35  ;;  %v2503_v60 = vrot.slane %v2428_v38, %v2240_v34  ;;  %v2507_v39 = vrot.slane %v2436_v28, %v2262_v44 }
 0x1bc   : > { %v2511_v43 = vrot.slane %v2426_v42, %v2262_v44  ;;  %v2515_v22 = vrot.slane %v2428_v38, %v2252_v41  ;;  %v2526_v58 = vrot.slane %v2428_v38, %v2262_v44 }
 0x1be   : > { %1716 = vset.pattern.permute.xlu1 %v1961_v5  ;;  %680 = vperm.xlu0 %1718, %v676_v14  }
 0x1bf   : > { %607 = vperm.xlu1 %1716, %v593_v10  }
 0x1c2   : > { %1723 = vset.pattern.permute.xlu0 %v1959_v0 }
 0x1c3   : > { %1717 = vset.pattern.permute.xlu1 %v1959_v0  ;;  %699 = vperm.xlu0 %1723, %v676_v14  }
 0x1c4   : > { %617 = vperm.xlu1 %1717, %v593_v10  }
 0x1c7   : > { %1724 = vset.pattern.permute.xlu0 %v1962_v6 }
 0x1c8   : > { %1719 = vset.pattern.permute.xlu1 %v1961_v5  ;;  %709 = vperm.xlu0 %1724, %v676_v14  }
 0x1c9   : > { %647 = vperm.xlu1 %1719, %v595_v9  }
 0x1cc   : > { %1727 = vset.pattern.permute.xlu0 %v1961_v5 }
 0x1cd   : > { %1720 = vset.pattern.permute.xlu1 %v1962_v6 }
 0x1ce   : > { %627 = vperm.xlu1 %1720, %v593_v10  }
 0x1d2   : > { %1721 = vset.pattern.permute.xlu1 %v1961_v5 }
 0x1d3   : > { %689 = vperm.xlu1 %1721, %v676_v14  }
 0x1d7   : > { %1722 = vset.pattern.permute.xlu1 %v1959_v0 }
 0x1d8   : > { %657 = vperm.xlu1 %1722, %v595_v9  }
 0x1dc   : > { %1725 = vset.pattern.permute.xlu1 %v1962_v6 }
 0x1dd   : > { %667 = vperm.xlu1 %1725, %v595_v9  }
 0x1e1   : > { %1726 = vset.pattern.permute.xlu1 %v1960_v1 }
 0x239   : > { %v599_v50 = vpop.permute.xlu1 %598  ;;  %v639_v18 = vpop.permute.xlu0 %638 }
 0x23a   : > { %v605_v27 = vmul.f32 %v2489_v32, %v599_v50  ;;  %v645_v28 = vmul.f32 %v2503_v60, %v639_v18 }
 0x23d   : > { %v681_v21 = vpop.permute.xlu0 %680 }
 0x23e   : > { %v608_v52 = vpop.permute.xlu1 %607  ;;  %v687_v30 = vmul.f32 %v2471_v53, %v681_v21 }
 0x23f   : > { %v614_v23 = vmul.f32 %v2480_v31, %v608_v52 }
 0x241   : > { %v615_v62 = vadd.f32 %v614_v23, %v605_v27 }
 0x242   : > { %v700_v25 = vpop.permute.xlu0 %699 }
 0x243   : > { %v618_v57 = vpop.permute.xlu1 %617  ;;  %v706_v37 = vmul.f32 %v2484_v20, %v700_v25 }
 0x244   : > { %v624_v47 = vmul.f32 %v2493_v36, %v618_v57 }
 0x246   : > { %v625_v7 = vadd.f32 %v624_v47, %v615_v62 }
 0x247   : > { %v710_v40 = vpop.permute.xlu0 %709 }
 0x248   : > { %v648_v4 = vpop.permute.xlu1 %647  ;;  %v716_v63 = vmul.f32 %v2507_v39, %v710_v40 }
 0x249   : > { %v654_v54 = vmul.f32 %v2499_v46, %v648_v4 }
 0x24b   : > { %v655_v9 = vadd.f32 %v654_v54, %v645_v28 }
 0x24d   : > { %v628_v24 = vpop.permute.xlu1 %627 }
 0x24e   : > { %v634_v42 = vmul.f32 %v2511_v43, %v628_v24 }
 0x250   : > { %v635_v55 = vadd.f32 %v634_v42, %v625_v7 }
 0x252   : > { %v690_v26 = vpop.permute.xlu1 %689 }
 0x253   : > { %v696_v3 = vmul.f32 %v2475_v29, %v690_v26 }
 0x255   : > { %v697_v51 = vadd.f32 %v696_v3, %v687_v30 }
 0x257   : > { %v707_v61 = vadd.f32 %v706_v37, %v697_v51  ;;  %v658_v59 = vpop.permute.xlu1 %657 }
 0x258   : > { %v664_v2 = vmul.f32 %v2515_v22, %v658_v59 }
 0x259   : > { %v717_v10 = vadd.f32 %v716_v63, %v707_v61 }
 0x25a   : > { %v665_v12 = vadd.f32 %v664_v2, %v655_v9 }
 0x25b   : > { %v719_v14 = vsub.f32 %v717_v10, %v635_v55 }
 0x25c   : > { %v668_v11 = vpop.permute.xlu1 %667 }
 0x25d   : > { %v674_v13 = vmul.f32 %v2526_v58, %v668_v11 }
 0x25f   : > { %v675_v48 = vadd.f32 %v674_v13, %v665_v12 }
 0x261   : > { %v718_v33 = vsub.f32 %v635_v55, %v675_v48  ;;  %v720_v45 = vsub.f32 %v719_v14, %v675_v48 }
 0x263   : > { %v721_v15 = vadd.f32 %v718_v33, %v2446_v49  ;;  %v722_v50 = vadd.f32 %v720_v45, %v2443_v56 }
 0x265   : > { %730 = vperm.xlu0 %1727, %v721_v15   ;;  %725 = vperm.xlu1 %1726, %v721_v15   ;;  %v771_v52 = vadd.f32 %v722_v50, %v721_v15 }
 0x269   : > { %1728 = vset.pattern.permute.xlu0 %v1959_v0  ;;  %1729 = vset.pattern.permute.xlu1 %v1962_v6 }
 0x26a   : > { %736 = vperm.xlu0 %1728, %v721_v15   ;;  %742 = vperm.xlu1 %1729, %v721_v15  }
 0x26e   : > { %760 = vperm.xlu0 %1728, %v722_v50   ;;  %1730 = vset.pattern.permute.xlu1 %v1960_v1 }
 0x26f   : > { %749 = vperm.xlu1 %1730, %v722_v50  }
 0x272   : > { %785 = vperm.xlu0 %1728, %v771_v52  }
 0x273   : > { %1731 = vset.pattern.permute.xlu1 %v1961_v5 }
 0x274   : > { %754 = vperm.xlu1 %1731, %v722_v50  }
 0x276   : > { %1735 = vset.pattern.permute.xlu0 %v1962_v6 }
 0x277   : > { %766 = vperm.xlu0 %1735, %v722_v50  }
 0x278   : > { %1732 = vset.pattern.permute.xlu1 %v1960_v1 }
 0x279   : > { %774 = vperm.xlu1 %1732, %v771_v52  }
 0x27b   : > { %1740 = vset.pattern.permute.xlu0 %v1960_v1 }
 0x27d   : > { %1733 = vset.pattern.permute.xlu1 %v1961_v5 }
 0x27e   : > { %779 = vperm.xlu1 %1733, %v771_v52  }
 0x282   : > { %1734 = vset.pattern.permute.xlu1 %v1962_v6 }
 0x283   : > { %791 = vperm.xlu1 %1734, %v771_v52  }
 0x287   : > { %1736 = vset.pattern.permute.xlu1 %v1960_v1 }
 0x2e4   : > { %v731_v38 = vpop.permute.xlu0 %730  ;;  %v726_v56 = vpop.permute.xlu1 %725 }
 0x2e5   : > { %v733_v21 = vmul.f32 %v731_v38, %v2480_v31  ;;  %v728_v24 = vmul.f32 %v726_v56, %v2489_v32 }
 0x2e7   : > { %v734_v3 = vadd.f32 %v733_v21, %v728_v24 }
 0x2e9   : > { %v737_v49 = vpop.permute.xlu0 %736  ;;  %v743_v57 = vpop.permute.xlu1 %742 }
 0x2ea   : > { %v739_v26 = vmul.f32 %v737_v49, %v2493_v36  ;;  %v745_v61 = vmul.f32 %v743_v57, %v2511_v43 }
 0x2ec   : > { %v740_v51 = vadd.f32 %v739_v26, %v734_v3 }
 0x2ed   : > { %v761_v18 = vpop.permute.xlu0 %760 }
 0x2ee   : > { %v750_v4 = vpop.permute.xlu1 %749  ;;  %v763_v40 = vmul.f32 %v761_v18, %v2515_v22  ;;  %v746_v62 = vadd.f32 %v745_v61, %v740_v51 }
 0x2ef   : > { %v752_v23 = vmul.f32 %v750_v4, %v2503_v60 }
 0x2f1   : > { %v786_v25 = vpop.permute.xlu0 %785 }
 0x2f2   : > { %v788_v11 = vmul.f32 %v786_v25, %v2484_v20 }
 0x2f3   : > { %v755_v30 = vpop.permute.xlu1 %754 }
 0x2f4   : > { %v757_v37 = vmul.f32 %v755_v30, %v2499_v46 }
 0x2f6   : > { %v758_v27 = vadd.f32 %v757_v37, %v752_v23  ;;  %v767_v47 = vpop.permute.xlu0 %766 }
 0x2f7   : > { %v769_v54 = vmul.f32 %v767_v47, %v2526_v58 }
 0x2f8   : > { %v764_v59 = vadd.f32 %v763_v40, %v758_v27  ;;  %v775_v28 = vpop.permute.xlu1 %774 }
 0x2f9   : > { %v777_v9 = vmul.f32 %v775_v28, %v2471_v53 }
 0x2fa   : > { %v770_v63 = vadd.f32 %v769_v54, %v764_v59 }
 0x2fc   : > { %v796_v42 = vsub.f32 %v746_v62, %v770_v63 }
 0x2fd   : > { %v780_v2 = vpop.permute.xlu1 %779 }
 0x2fe   : > { %v799_v7 = vadd.f32 %v796_v42, %v2449_v8  ;;  %v782_v10 = vmul.f32 %v780_v2, %v2475_v29 }
 0x300   : > { %v783_v55 = vadd.f32 %v782_v10, %v777_v9  ;;  %803 = vperm.xlu1 %1736, %v799_v7  }
 0x302   : > { %v789_v12 = vadd.f32 %v788_v11, %v783_v55  ;;  %v792_v13 = vpop.permute.xlu1 %791 }
 0x303   : > { %v794_v48 = vmul.f32 %v792_v13, %v2507_v39 }
 0x304   : > { %1737 = vset.pattern.permute.xlu1 %v1961_v5 }
 0x305   : > { %v795_v14 = vadd.f32 %v794_v48, %v789_v12  ;;  %808 = vperm.xlu1 %1737, %v799_v7  }
 0x307   : > { %v797_v33 = vsub.f32 %v795_v14, %v746_v62 }
 0x309   : > { %v798_v45 = vsub.f32 %v797_v33, %v770_v63  ;;  %1738 = vset.pattern.permute.xlu1 %v1959_v0 }
 0x30a   : > { %814 = vperm.xlu1 %1738, %v799_v7  }
 0x30b   : > { %v800_v8 = vadd.f32 %v798_v45, %v2451_v16 }
 0x30d   : > { %827 = vperm.xlu0 %1740, %v800_v8   ;;  %v849_v15 = vadd.f32 %v800_v8, %v799_v7 }
 0x30e   : > { %1739 = vset.pattern.permute.xlu1 %v1962_v6 }
 0x30f   : > { %820 = vperm.xlu1 %1739, %v799_v7  }
 0x311   : > { %852 = vperm.xlu0 %1740, %v849_v15  }
 0x313   : > { %1741 = vset.pattern.permute.xlu1 %v1961_v5 }
 0x314   : > { %832 = vperm.xlu1 %1741, %v800_v8  }
 0x315   : > { %1743 = vset.pattern.permute.xlu0 %v1959_v0 }
 0x316   : > { %863 = vperm.xlu0 %1743, %v849_v15  }
 0x318   : > { %857 = vperm.xlu1 %1741, %v849_v15  }
 0x31a   : > { %1744 = vset.pattern.permute.xlu0 %v1962_v6 }
 0x31b   : > { %869 = vperm.xlu0 %1744, %v849_v15  }
 0x31c   : > { %1742 = vset.pattern.permute.xlu1 %v1959_v0 }
 0x31d   : > { %838 = vperm.xlu1 %1742, %v800_v8  }
 0x31f   : > { %1747 = vset.pattern.permute.xlu0 %v1961_v5 }
 0x321   : > { %1745 = vset.pattern.permute.xlu1 %v1962_v6 }
 0x322   : > { %844 = vperm.xlu1 %1745, %v800_v8  }
 0x326   : > { %1746 = vset.pattern.permute.xlu1 %v1960_v1 }
 0x37f   : > { %v804_v16 = vpop.permute.xlu1 %803 }
 0x380   : > { %v806_v23 = vmul.f32 %v804_v16, %v2489_v32 }
 0x384   : > { %v809_v50 = vpop.permute.xlu1 %808 }
 0x385   : > { %v811_v25 = vmul.f32 %v809_v50, %v2480_v31 }
 0x387   : > { %v812_v54 = vadd.f32 %v811_v25, %v806_v23 }
 0x389   : > { %v815_v52 = vpop.permute.xlu1 %814 }
 0x38a   : > { %v817_v37 = vmul.f32 %v815_v52, %v2493_v36 }
 0x38c   : > { %v828_v38 = vpop.permute.xlu0 %827 }
 0x38e   : > { %v821_v56 = vpop.permute.xlu1 %820 }
 0x390   : > { %v853_v49 = vpop.permute.xlu0 %852 }
 0x391   : > { %v855_v21 = vmul.f32 %v853_v49, %v2471_v53  ;;  %v830_v53 = vmul.f32 %v828_v38, %v2503_v60 }
 0x393   : > { %v833_v57 = vpop.permute.xlu1 %832 }
 0x394   : > { %v835_v51 = vmul.f32 %v833_v57, %v2499_v46 }
 0x395   : > { %v864_v18 = vpop.permute.xlu0 %863 }
 0x396   : > { %v866_v26 = vmul.f32 %v864_v18, %v2484_v20  ;;  %v818_v20 = vadd.f32 %v817_v37, %v812_v54  ;;  %v836_v61 = vadd.f32 %v835_v51, %v830_v53 }
 0x397   : > { %v858_v4 = vpop.permute.xlu1 %857 }
 0x398   : > { %v860_v24 = vmul.f32 %v858_v4, %v2475_v29  ;;  %v823_v29 = vmul.f32 %v821_v56, %v2511_v43 }
 0x39a   : > { %v861_v30 = vadd.f32 %v860_v24, %v855_v21  ;;  %v870_v3 = vpop.permute.xlu0 %869  ;;  %v824_v32 = vadd.f32 %v823_v29, %v818_v20 }
 0x39b   : > { %v872_v27 = vmul.f32 %v870_v3, %v2507_v39 }
 0x39c   : > { %v867_v40 = vadd.f32 %v866_v26, %v861_v30  ;;  %v839_v47 = vpop.permute.xlu1 %838 }
 0x39d   : > { %v841_v31 = vmul.f32 %v839_v47, %v2515_v22 }
 0x39e   : > { %v873_v59 = vadd.f32 %v872_v27, %v867_v40 }
 0x39f   : > { %v842_v62 = vadd.f32 %v841_v31, %v836_v61 }
 0x3a0   : > { %v875_v46 = vsub.f32 %v873_v59, %v824_v32 }
 0x3a1   : > { %v845_v28 = vpop.permute.xlu1 %844 }
 0x3a2   : > { %v847_v36 = vmul.f32 %v845_v28, %v2526_v58 }
 0x3a4   : > { %v848_v63 = vadd.f32 %v847_v36, %v842_v62 }
 0x3a6   : > { %v874_v42 = vsub.f32 %v824_v32, %v848_v63  ;;  %v876_v39 = vsub.f32 %v875_v46, %v848_v63 }
 0x3a8   : > { %v877_v2 = vadd.f32 %v874_v42, %v2456_v19  ;;  %v878_v60 = vadd.f32 %v876_v39, %v2453_v17 }
 0x3aa   : > { %890 = vperm.xlu0 %1747, %v877_v2   ;;  %881 = vperm.xlu1 %1746, %v877_v2   ;;  %v2579_v43 = vadd.f32 %v878_v60, %v877_v2  ;;  %v896_v9 = vrot.slane %v877_v2, %v2242_v35  ;;  %v887_v10 = vrot.slane %v877_v2, %v2240_v34 }
 0x3ab   : > { %v906_v13 = vrot.slane %v877_v2, %v2252_v41  ;;  %v927_v33 = vrot.slane %v878_v60, %v2240_v34  ;;  %v936_v45 = vrot.slane %v878_v60, %v2242_v35  ;;  %v946_v16 = vrot.slane %v878_v60, %v2252_v41 }
 0x3ac   : > { %v956_v38 = vrot.slane %v878_v60, %v2262_v44  ;;  %v916_v49 = vrot.slane %v877_v2, %v2262_v44  ;;  %v968_v37 = vrot.slane %v2579_v43, %v2240_v34  ;;  %v977_v51 = vrot.slane %v2579_v43, %v2242_v35 }
 0x3ad   : > { %v987_v27 = vrot.slane %v2579_v43, %v2252_v41  ;;  %v997_v31 = vrot.slane %v2579_v43, %v2262_v44 }
 0x3ae   : > { %1748 = vset.pattern.permute.xlu0 %v1959_v0  ;;  %1749 = vset.pattern.permute.xlu1 %v1962_v6 }
 0x3af   : > { %900 = vperm.xlu0 %1748, %v877_v2   ;;  %910 = vperm.xlu1 %1749, %v877_v2  }
 0x3b3   : > { %940 = vperm.xlu0 %1748, %v878_v60   ;;  %1750 = vset.pattern.permute.xlu1 %v1960_v1 }
 0x3b4   : > { %921 = vperm.xlu1 %1750, %v878_v60  }
 0x3b7   : > { %981 = vperm.xlu0 %1748, %v2579_v43  }
 0x3b8   : > { %1751 = vset.pattern.permute.xlu1 %v1961_v5 }
 0x3b9   : > { %930 = vperm.xlu1 %1751, %v878_v60  }
 0x3bb   : > { %1755 = vset.pattern.permute.xlu0 %v1962_v6 }
 0x3bc   : > { %950 = vperm.xlu0 %1755, %v878_v60  }
 0x3bd   : > { %1752 = vset.pattern.permute.xlu1 %v1960_v1 }
 0x3be   : > { %962 = vperm.xlu1 %1752, %v2579_v43  }
 0x3c0   : > { %1760 = vset.pattern.permute.xlu0 %v1960_v1 }
 0x3c2   : > { %1753 = vset.pattern.permute.xlu1 %v1961_v5 }
 0x3c3   : > { %971 = vperm.xlu1 %1753, %v2579_v43  }
 0x3c7   : > { %1754 = vset.pattern.permute.xlu1 %v1962_v6 }
 0x3c8   : > { %991 = vperm.xlu1 %1754, %v2579_v43  }
 0x3cc   : > { %1756 = vset.pattern.permute.xlu1 %v1960_v1 }
 0x429   : > { %v891_v17 = vpop.permute.xlu0 %890  ;;  %v882_v19 = vpop.permute.xlu1 %881 }
 0x42a   : > { %v897_v55 = vmul.f32 %v896_v9, %v891_v17  ;;  %v888_v12 = vmul.f32 %v887_v10, %v882_v19 }
 0x42c   : > { %v898_v15 = vadd.f32 %v897_v55, %v888_v12 }
 0x42e   : > { %v901_v22 = vpop.permute.xlu0 %900  ;;  %v911_v58 = vpop.permute.xlu1 %910 }
 0x42f   : > { %v907_v14 = vmul.f32 %v906_v13, %v901_v22  ;;  %v917_v24 = vmul.f32 %v916_v49, %v911_v58 }
 0x431   : > { %v908_v56 = vadd.f32 %v907_v14, %v898_v15 }
 0x432   : > { %v941_v7 = vpop.permute.xlu0 %940 }
 0x433   : > { %v922_v11 = vpop.permute.xlu1 %921  ;;  %v947_v57 = vmul.f32 %v946_v16, %v941_v7  ;;  %v918_v30 = vadd.f32 %v917_v24, %v908_v56 }
 0x434   : > { %v928_v50 = vmul.f32 %v927_v33, %v922_v11 }
 0x436   : > { %v982_v48 = vpop.permute.xlu0 %981 }
 0x437   : > { %v988_v53 = vmul.f32 %v987_v27, %v982_v48 }
 0x438   : > { %v931_v8 = vpop.permute.xlu1 %930 }
 0x439   : > { %v937_v52 = vmul.f32 %v936_v45, %v931_v8 }
 0x43b   : > { %v938_v18 = vadd.f32 %v937_v52, %v928_v50  ;;  %v951_v4 = vpop.permute.xlu0 %950 }
 0x43c   : > { %v957_v21 = vmul.f32 %v956_v38, %v951_v4 }
 0x43d   : > { %v948_v25 = vadd.f32 %v947_v57, %v938_v18  ;;  %v963_v26 = vpop.permute.xlu1 %962 }
 0x43e   : > { %v969_v47 = vmul.f32 %v968_v37, %v963_v26 }
 0x43f   : > { %v958_v3 = vadd.f32 %v957_v21, %v948_v25 }
 0x441   : > { %v2603_v23 = vsub.f32 %v918_v30, %v958_v3 }
 0x442   : > { %v972_v40 = vpop.permute.xlu1 %971 }
 0x443   : > { %v978_v54 = vmul.f32 %v977_v51, %v972_v40  ;;  %1005 = vperm.xlu1 %1756, %v2603_v23   ;;  %v1020_v17 = vrot.slane %v2603_v23, %v2242_v35  ;;  %v1011_v19 = vrot.slane %v2603_v23, %v2240_v34  ;;  %v1030_v7 = vrot.slane %v2603_v23, %v2252_v41 }
 0x444   : > { %v1040_v11 = vrot.slane %v2603_v23, %v2262_v44 }
 0x445   : > { %v979_v29 = vadd.f32 %v978_v54, %v969_v47 }
 0x447   : > { %v992_v20 = vpop.permute.xlu1 %991  ;;  %v989_v61 = vadd.f32 %v988_v53, %v979_v29  ;;  %1757 = vset.pattern.permute.xlu1 %v1961_v5 }
 0x448   : > { %v998_v59 = vmul.f32 %v997_v31, %v992_v20  ;;  %1014 = vperm.xlu1 %1757, %v2603_v23  }
 0x44a   : > { %v999_v28 = vadd.f32 %v998_v59, %v989_v61 }
 0x44c   : > { %v1001_v32 = vsub.f32 %v999_v28, %v918_v30  ;;  %1758 = vset.pattern.permute.xlu1 %v1959_v0 }
 0x44d   : > { %1024 = vperm.xlu1 %1758, %v2603_v23  }
 0x44e   : > { %v2618_v62 = vsub.f32 %v1001_v32, %v958_v3 }
 0x450   : > { %1045 = vperm.xlu0 %1760, %v2618_v62   ;;  %v1083_v36 = vadd.f32 %v2618_v62, %v2603_v23  ;;  %v1060_v45 = vrot.slane %v2618_v62, %v2242_v35  ;;  %v1051_v56 = vrot.slane %v2618_v62, %v2240_v34  ;;  %v1070_v21 = vrot.slane %v2618_v62, %v2252_v41 }
 0x451   : > { %1759 = vset.pattern.permute.xlu1 %v1962_v6  ;;  %v1080_v51 = vrot.slane %v2618_v62, %v2262_v44 }
 0x452   : > { %1034 = vperm.xlu1 %1759, %v2603_v23   ;;  %v1092_v9 = vrot.slane %v1083_v36, %v2240_v34  ;;  %v1101_v10 = vrot.slane %v1083_v36, %v2242_v35  ;;  %v1111_v55 = vrot.slane %v1083_v36, %v2252_v41  ;;  %v1121_v8 = vrot.slane %v1083_v36, %v2262_v44 }
 0x454   : > { %1086 = vperm.xlu0 %1760, %v1083_v36  }
 0x456   : > { %1761 = vset.pattern.permute.xlu1 %v1961_v5 }
 0x457   : > { %1054 = vperm.xlu1 %1761, %v2618_v62  }
 0x458   : > { %1763 = vset.pattern.permute.xlu0 %v1959_v0 }
 0x459   : > { %1105 = vperm.xlu0 %1763, %v1083_v36  }
 0x45b   : > { %1095 = vperm.xlu1 %1761, %v1083_v36  }
 0x45d   : > { %1764 = vset.pattern.permute.xlu0 %v1962_v6 }
 0x45e   : > { %1115 = vperm.xlu0 %1764, %v1083_v36  }
 0x45f   : > { %1762 = vset.pattern.permute.xlu1 %v1959_v0 }
 0x460   : > { %1064 = vperm.xlu1 %1762, %v2618_v62  }
 0x462   : > { %1767 = vset.pattern.permute.xlu0 %v1961_v5 }
 0x464   : > { %1765 = vset.pattern.permute.xlu1 %v1962_v6 }
 0x465   : > { %1074 = vperm.xlu1 %1765, %v2618_v62  }
 0x469   : > { %1766 = vset.pattern.permute.xlu1 %v1960_v1 }
 0x4c2   : > { %v1006_v46 = vpop.permute.xlu1 %1005 }
 0x4c3   : > { %v1012_v13 = vmul.f32 %v1011_v19, %v1006_v46 }
 0x4c7   : > { %v1015_v63 = vpop.permute.xlu1 %1014 }
 0x4c8   : > { %v1021_v58 = vmul.f32 %v1020_v17, %v1015_v63 }
 0x4ca   : > { %v1022_v15 = vadd.f32 %v1021_v58, %v1012_v13 }
 0x4cc   : > { %v1025_v42 = vpop.permute.xlu1 %1024 }
 0x4cd   : > { %v1031_v48 = vmul.f32 %v1030_v7, %v1025_v42 }
 0x4cf   : > { %v1046_v39 = vpop.permute.xlu0 %1045  ;;  %v1032_v57 = vadd.f32 %v1031_v48, %v1022_v15 }
 0x4d0   : > { %v1052_v25 = vmul.f32 %v1051_v56, %v1046_v39 }
 0x4d1   : > { %v1035_v2 = vpop.permute.xlu1 %1034 }
 0x4d2   : > { %v1041_v16 = vmul.f32 %v1040_v11, %v1035_v2 }
 0x4d3   : > { %v1087_v60 = vpop.permute.xlu0 %1086 }
 0x4d4   : > { %v1093_v14 = vmul.f32 %v1092_v9, %v1087_v60  ;;  %v1042_v26 = vadd.f32 %v1041_v16, %v1032_v57 }
 0x4d6   : > { %v1055_v43 = vpop.permute.xlu1 %1054 }
 0x4d7   : > { %v1061_v18 = vmul.f32 %v1060_v45, %v1055_v43 }
 0x4d8   : > { %v1106_v22 = vpop.permute.xlu0 %1105 }
 0x4d9   : > { %v1112_v50 = vmul.f32 %v1111_v55, %v1106_v22  ;;  %v1062_v23 = vadd.f32 %v1061_v18, %v1052_v25 }
 0x4da   : > { %v1096_v12 = vpop.permute.xlu1 %1095 }
 0x4db   : > { %v1102_v33 = vmul.f32 %v1101_v10, %v1096_v12 }
 0x4dd   : > { %v1103_v52 = vadd.f32 %v1102_v33, %v1093_v14  ;;  %v1116_v38 = vpop.permute.xlu0 %1115 }
 0x4de   : > { %v1122_v49 = vmul.f32 %v1121_v8, %v1116_v38 }
 0x4df   : > { %v1113_v4 = vadd.f32 %v1112_v50, %v1103_v52  ;;  %v1065_v24 = vpop.permute.xlu1 %1064 }
 0x4e0   : > { %v1071_v3 = vmul.f32 %v1070_v21, %v1065_v24 }
 0x4e1   : > { %v1123_v30 = vadd.f32 %v1122_v49, %v1113_v4 }
 0x4e2   : > { %v1072_v27 = vadd.f32 %v1071_v3, %v1062_v23 }
 0x4e3   : > { %v1125_v37 = vsub.f32 %v1123_v30, %v1042_v26 }
 0x4e4   : > { %v1075_v40 = vpop.permute.xlu1 %1074 }
 0x4e5   : > { %v1081_v47 = vmul.f32 %v1080_v51, %v1075_v40 }
 0x4e7   : > { %v1082_v54 = vadd.f32 %v1081_v47, %v1072_v27 }
 0x4e9   : > { %v1124_v53 = vsub.f32 %v1042_v26, %v1082_v54  ;;  %v1126_v29 = vsub.f32 %v1125_v37, %v1082_v54 }
 0x4eb   : > { %1138 = vperm.xlu0 %1767, %v1124_v53   ;;  %1129 = vperm.xlu1 %1766, %v1124_v53   ;;  %v2655_v31 = vadd.f32 %v1126_v29, %v1124_v53  ;;  %v1144_v62 = vrot.slane %v1124_v53, %v2242_v35  ;;  %v1135_v36 = vrot.slane %v1124_v53, %v2240_v34 }
 0x4ec   : > { %v1154_v39 = vrot.slane %v1124_v53, %v2252_v41  ;;  %v1175_v43 = vrot.slane %v1126_v29, %v2240_v34  ;;  %v1184_v17 = vrot.slane %v1126_v29, %v2242_v35  ;;  %v1194_v58 = vrot.slane %v1126_v29, %v2252_v41 }
 0x4ed   : > { %v1204_v10 = vrot.slane %v1126_v29, %v2262_v44  ;;  %v1164_v55 = vrot.slane %v1124_v53, %v2262_v44  ;;  %v1216_v52 = vrot.slane %v2655_v31, %v2240_v34  ;;  %v1225_v38 = vrot.slane %v2655_v31, %v2242_v35 }
 0x4ee   : > { %v1235_v49 = vrot.slane %v2655_v31, %v2252_v41  ;;  %v1245_v24 = vrot.slane %v2655_v31, %v2262_v44 }
 0x4ef   : > { %1768 = vset.pattern.permute.xlu0 %v1959_v0  ;;  %1769 = vset.pattern.permute.xlu1 %v1962_v6 }
 0x4f0   : > { %1148 = vperm.xlu0 %1768, %v1124_v53   ;;  %1158 = vperm.xlu1 %1769, %v1124_v53  }
 0x4f4   : > { %1188 = vperm.xlu0 %1768, %v1126_v29   ;;  %1770 = vset.pattern.permute.xlu1 %v1960_v1 }
 0x4f5   : > { %1169 = vperm.xlu1 %1770, %v1126_v29  }
 0x4f8   : > { %1229 = vperm.xlu0 %1768, %v2655_v31  }
 0x4f9   : > { %1771 = vset.pattern.permute.xlu1 %v1961_v5 }
 0x4fa   : > { %1178 = vperm.xlu1 %1771, %v1126_v29  }
 0x4fc   : > { %1775 = vset.pattern.permute.xlu0 %v1962_v6 }
 0x4fd   : > { %1198 = vperm.xlu0 %1775, %v1126_v29  }
 0x4fe   : > { %1772 = vset.pattern.permute.xlu1 %v1960_v1 }
 0x4ff   : > { %1210 = vperm.xlu1 %1772, %v2655_v31  }
 0x501   : > { %1780 = vset.pattern.permute.xlu0 %v1960_v1 }
 0x503   : > { %1773 = vset.pattern.permute.xlu1 %v1961_v5 }
 0x504   : > { %1219 = vperm.xlu1 %1773, %v2655_v31  }
 0x508   : > { %1774 = vset.pattern.permute.xlu1 %v1962_v6 }
 0x509   : > { %1239 = vperm.xlu1 %1774, %v2655_v31  }
 0x50d   : > { %1776 = vset.pattern.permute.xlu1 %v1960_v1 }
 0x56a   : > { %v1139_v20 = vpop.permute.xlu0 %1138  ;;  %v1130_v61 = vpop.permute.xlu1 %1129 }
 0x56b   : > { %v1145_v63 = vmul.f32 %v1144_v62, %v1139_v20  ;;  %v1136_v42 = vmul.f32 %v1135_v36, %v1130_v61 }
 0x56d   : > { %v1146_v22 = vadd.f32 %v1145_v63, %v1136_v42 }
 0x56f   : > { %v1149_v59 = vpop.permute.xlu0 %1148  ;;  %v1159_v28 = vpop.permute.xlu1 %1158 }
 0x570   : > { %v1155_v60 = vmul.f32 %v1154_v39, %v1149_v59  ;;  %v1165_v33 = vmul.f32 %v1164_v55, %v1159_v28 }
 0x572   : > { %v1156_v11 = vadd.f32 %v1155_v60, %v1146_v22 }
 0x573   : > { %v1189_v32 = vpop.permute.xlu0 %1188 }
 0x574   : > { %v1170_v46 = vpop.permute.xlu1 %1169  ;;  %v1195_v12 = vmul.f32 %v1194_v58, %v1189_v32  ;;  %v1166_v15 = vadd.f32 %v1165_v33, %v1156_v11 }
 0x575   : > { %v1176_v7 = vmul.f32 %v1175_v43, %v1170_v46 }
 0x577   : > { %v1230_v2 = vpop.permute.xlu0 %1229 }
 0x578   : > { %v1236_v4 = vmul.f32 %v1235_v49, %v1230_v2 }
 0x579   : > { %v1179_v19 = vpop.permute.xlu1 %1178 }
 0x57a   : > { %v1185_v9 = vmul.f32 %v1184_v17, %v1179_v19 }
 0x57c   : > { %v1186_v13 = vadd.f32 %v1185_v9, %v1176_v7  ;;  %v1199_v48 = vpop.permute.xlu0 %1198 }
 0x57d   : > { %v1205_v14 = vmul.f32 %v1204_v10, %v1199_v48 }
 0x57e   : > { %v1196_v45 = vadd.f32 %v1195_v12, %v1186_v13  ;;  %v1211_v8 = vpop.permute.xlu1 %1210 }
 0x57f   : > { %v1217_v57 = vmul.f32 %v1216_v52, %v1211_v8 }
 0x580   : > { %v1206_v16 = vadd.f32 %v1205_v14, %v1196_v45 }
 0x582   : > { %v2679_v50 = vsub.f32 %v1166_v15, %v1206_v16 }
 0x583   : > { %v1220_v56 = vpop.permute.xlu1 %1219 }
 0x584   : > { %v1226_v18 = vmul.f32 %v1225_v38, %v1220_v56  ;;  %1253 = vperm.xlu1 %1776, %v2679_v50   ;;  %v1268_v20 = vrot.slane %v2679_v50, %v2242_v35  ;;  %v1259_v61 = vrot.slane %v2679_v50, %v2240_v34  ;;  %v1278_v32 = vrot.slane %v2679_v50, %v2252_v41 }
 0x585   : > { %v1288_v46 = vrot.slane %v2679_v50, %v2262_v44 }
 0x586   : > { %v1227_v21 = vadd.f32 %v1226_v18, %v1217_v57 }
 0x588   : > { %v1240_v25 = vpop.permute.xlu1 %1239  ;;  %v1237_v26 = vadd.f32 %v1236_v4, %v1227_v21  ;;  %1777 = vset.pattern.permute.xlu1 %v1961_v5 }
 0x589   : > { %v1246_v30 = vmul.f32 %v1245_v24, %v1240_v25  ;;  %1262 = vperm.xlu1 %1777, %v2679_v50  }
 0x58b   : > { %v1247_v3 = vadd.f32 %v1246_v30, %v1237_v26  ;;  %v496_v26 = vld [vmem:[%s184_s22] sm:$0xf] }
 0x58d   : > { %v1249_v23 = vsub.f32 %v1247_v3, %v1166_v15  ;;  %1778 = vset.pattern.permute.xlu1 %v1959_v0 }
 0x58e   : > { %1272 = vperm.xlu1 %1778, %v2679_v50  }
 0x58f   : > { %v2694_v37 = vsub.f32 %v1249_v23, %v1206_v16  ;;  %v1392_v23 = vrot.slane %v496_v26, %v2242_v35 }
 0x591   : > { %1293 = vperm.xlu0 %1780, %v2694_v37   ;;  %v1331_v51 = vadd.f32 %v2694_v37, %v2679_v50  ;;  %v1308_v17 = vrot.slane %v2694_v37, %v2242_v35  ;;  %v1299_v11 = vrot.slane %v2694_v37, %v2240_v34  ;;  %v1318_v14 = vrot.slane %v2694_v37, %v2252_v41 }
 0x592   : > { %1779 = vset.pattern.permute.xlu1 %v1962_v6  ;;  %v1328_v38 = vrot.slane %v2694_v37, %v2262_v44 }
 0x593   : > { %1282 = vperm.xlu1 %1779, %v2679_v50   ;;  %v1340_v62 = vrot.slane %v1331_v51, %v2240_v34  ;;  %v1349_v36 = vrot.slane %v1331_v51, %v2242_v35  ;;  %v1359_v63 = vrot.slane %v1331_v51, %v2252_v41  ;;  %v1369_v19 = vrot.slane %v1331_v51, %v2262_v44 }
 0x595   : > { %1334 = vperm.xlu0 %1780, %v1331_v51  }
 0x597   : > { %1781 = vset.pattern.permute.xlu1 %v1961_v5 }
 0x598   : > { %1302 = vperm.xlu1 %1781, %v2694_v37  }
 0x599   : > { %1783 = vset.pattern.permute.xlu0 %v1959_v0 }
 0x59a   : > { %1353 = vperm.xlu0 %1783, %v1331_v51  }
 0x59c   : > { %1343 = vperm.xlu1 %1781, %v1331_v51  }
 0x59e   : > { %1784 = vset.pattern.permute.xlu0 %v1962_v6 }
 0x59f   : > { %1363 = vperm.xlu0 %1784, %v1331_v51   ;;  %v1626_v51 = vld [vmem:[%s184_s22 + $0x4] sm:$0xf]  ;;  %s209_s22 = scalar_lea.vmem [#allocation10], %s2173_s25 }
 0x5a0   : > { %1782 = vset.pattern.permute.xlu1 %v1959_v0  ;;  %s1517_s27 = sshll.u32 %s209_s22, 4  ;;  %s2758_s27 = int_to_ptr.vmem [resolvable:$true] %s1517_s27 }
 0x5a1   : > { %1312 = vperm.xlu1 %1782, %v2694_v37   ;;  %s1878_s18 = scalar_lea.vmem %s2758_s27, 128  ;;  %p1885_p1 = scmp.lt.s32.totalorder %s2758_s27, %s1883_s29 }
 0x5a2   : > { %p1879_p7 = scmp.ne.s32.totalorder %s2758_s27, %s1878_s18  ;;  %p1886_p2 = scmp.lt.s32.totalorder %s1884_s10, %s1878_s18 }
 0x5a3   : > { %1787 = vset.pattern.permute.xlu0 %v1961_v5 }
 0x5a4   : > { %p1880_p6 = pnand %p1879_p7, %p2823_p10  ;;  %p1887_p3 = por %p1886_p2, %p1885_p1 }
 0x5a5   : > { %1785 = vset.pattern.permute.xlu1 %v1962_v6 }
 0x5a6   : > { %1322 = vperm.xlu1 %1785, %v2694_v37   ;;  %v1383_v37 = vrot.slane %v496_v26, %v2240_v34  ;;  %p1881_p4 = pneg %p1880_p6 }
 0x5a8   : > { %p1888_p5 = pnand %p1887_p3, %p1881_p4 }
 0x5aa   : > { %1786 = vset.pattern.permute.xlu1 %v1960_v1 }
 0x603   : > { %v1254_v40 = vpop.permute.xlu1 %1253 }
 0x604   : > { %v1260_v39 = vmul.f32 %v1259_v61, %v1254_v40  ;;  %v1402_v40 = vrot.slane %v496_v26, %v2252_v41  ;;  %v1452_v61 = vrot.slane %v1626_v51, %v2262_v44 }
 0x608   : > { %v1263_v27 = vpop.permute.xlu1 %1262 }
 0x609   : > { %v1269_v28 = vmul.f32 %v1268_v20, %v1263_v27 }
 0x60b   : > { %v1270_v22 = vadd.f32 %v1269_v28, %v1260_v39  ;;  %v1412_v28 = vrot.slane %v496_v26, %v2262_v44 }
 0x60d   : > { %v1273_v47 = vpop.permute.xlu1 %1272 }
 0x60e   : > { %v1279_v2 = vmul.f32 %v1278_v32, %v1273_v47 }
 0x610   : > { %v1294_v54 = vpop.permute.xlu0 %1293  ;;  %v1280_v12 = vadd.f32 %v1279_v2, %v1270_v22 }
 0x611   : > { %v1300_v45 = vmul.f32 %v1299_v11, %v1294_v54  ;;  %v1432_v54 = vrot.slane %v1626_v51, %v2242_v35 }
 0x612   : > { %v1283_v53 = vpop.permute.xlu1 %1282 }
 0x613   : > { %v1289_v58 = vmul.f32 %v1288_v46, %v1283_v53 }
 0x614   : > { %v1335_v29 = vpop.permute.xlu0 %1334 }
 0x615   : > { %v1341_v60 = vmul.f32 %v1340_v62, %v1335_v29  ;;  %v1290_v8 = vadd.f32 %v1289_v58, %v1280_v12 }
 0x617   : > { %v1303_v31 = vpop.permute.xlu1 %1302 }
 0x618   : > { %v1309_v13 = vmul.f32 %v1308_v17, %v1303_v31  ;;  %v1442_v31 = vrot.slane %v1626_v51, %v2252_v41 }
 0x619   : > { %v1354_v59 = vpop.permute.xlu0 %1353 }
 0x61a   : > { %v1360_v7 = vmul.f32 %v1359_v63, %v1354_v59  ;;  %v1310_v50 = vadd.f32 %v1309_v13, %v1300_v45 }
 0x61b   : > { %v1344_v42 = vpop.permute.xlu1 %1343 }
 0x61c   : > { %v1350_v43 = vmul.f32 %v1349_v36, %v1344_v42 }
 0x61e   : > { %v1351_v9 = vadd.f32 %v1350_v43, %v1341_v60  ;;  %v1364_v10 = vpop.permute.xlu0 %1363  ;;  %v1456_v60 = vadd.f32 %v1626_v51, %v496_v26 }
 0x61f   : > { %v1370_v55 = vmul.f32 %v1369_v19, %v1364_v10 }
 0x620   : > { %v1361_v48 = vadd.f32 %v1360_v7, %v1351_v9  ;;  %v1313_v33 = vpop.permute.xlu1 %1312  ;;  %v1465_v58 = vrot.slane %v1456_v60, %v2240_v34  ;;  %v1474_v7 = vrot.slane %v1456_v60, %v2242_v35  ;;  %v1484_v9 = vrot.slane %v1456_v60, %v2252_v41 }
 0x621   : > { %v1319_v16 = vmul.f32 %v1318_v14, %v1313_v33  ;;  %v1494_v13 = vrot.slane %v1456_v60, %v2262_v44 }
 0x622   : > { %v1371_v15 = vadd.f32 %v1370_v55, %v1361_v48 }
 0x623   : > { %v1320_v49 = vadd.f32 %v1319_v16, %v1310_v50 }
 0x624   : > { %v1373_v52 = vsub.f32 %v1371_v15, %v1290_v8 }
 0x625   : > { %v1323_v56 = vpop.permute.xlu1 %1322 }
 0x626   : > { %v1329_v57 = vmul.f32 %v1328_v38, %v1323_v56 }
 0x628   : > { %v1330_v18 = vadd.f32 %v1329_v57, %v1320_v49 }
 0x62a   : > { %v1372_v4 = vsub.f32 %v1290_v8, %v1330_v18  ;;  %v1374_v21 = vsub.f32 %v1373_v52, %v1330_v18 }
 0x62c   : > { %1386 = vperm.xlu0 %1787, %v1372_v4   ;;  %1377 = vperm.xlu1 %1786, %v1372_v4   ;;  %v1455_v24 = vadd.f32 %v1374_v21, %v1372_v4 }
 0x630   : > { %1788 = vset.pattern.permute.xlu0 %v1959_v0  ;;  %1789 = vset.pattern.permute.xlu1 %v1962_v6 }
 0x631   : > { %1396 = vperm.xlu0 %1788, %v1372_v4   ;;  %1406 = vperm.xlu1 %1789, %v1372_v4  }
 0x635   : > { %1436 = vperm.xlu0 %1788, %v1374_v21   ;;  %1790 = vset.pattern.permute.xlu1 %v1960_v1 }
 0x636   : > { %1417 = vperm.xlu1 %1790, %v1374_v21  }
 0x639   : > { %1478 = vperm.xlu0 %1788, %v1455_v24  }
 0x63a   : > { %1791 = vset.pattern.permute.xlu1 %v1961_v5 }
 0x63b   : > { %1426 = vperm.xlu1 %1791, %v1374_v21  }
 0x63d   : > { %1795 = vset.pattern.permute.xlu0 %v1962_v6 }
 0x63e   : > { %1446 = vperm.xlu0 %1795, %v1374_v21  }
 0x63f   : > { %1792 = vset.pattern.permute.xlu1 %v1960_v1 }
 0x640   : > { %1459 = vperm.xlu1 %1792, %v1455_v24  }
 0x644   : > { %1793 = vset.pattern.permute.xlu1 %v1961_v5 }
 0x645   : > { %1468 = vperm.xlu1 %1793, %v1455_v24  }
 0x649   : > { %1794 = vset.pattern.permute.xlu1 %v1962_v6  ;;  %v1423_v6 = vrot.slane %v1626_v51, %v2240_v34 }
 0x64a   : > { %1488 = vperm.xlu1 %1794, %v1455_v24  }
 0x6ab   : > { %v1387_v0 = vpop.permute.xlu0 %1386  ;;  %v1378_v25 = vpop.permute.xlu1 %1377 }
 0x6ac   : > { %v1393_v27 = vmul.f32 %v1392_v23, %v1387_v0  ;;  %v1384_v47 = vmul.f32 %v1383_v37, %v1378_v25 }
 0x6ae   : > { %v1394_v59 = vadd.f32 %v1393_v27, %v1384_v47 }
 0x6b0   : > { %v1397_v30 = vpop.permute.xlu0 %1396  ;;  %v1407_v3 = vpop.permute.xlu1 %1406 }
 0x6b1   : > { %v1403_v29 = vmul.f32 %v1402_v40, %v1397_v30  ;;  %v1413_v2 = vmul.f32 %v1412_v28, %v1407_v3 }
 0x6b3   : > { %v1404_v36 = vadd.f32 %v1403_v29, %v1394_v59 }
 0x6b4   : > { %v1437_v1 = vpop.permute.xlu0 %1436 }
 0x6b5   : > { %v1418_v5 = vpop.permute.xlu1 %1417  ;;  %v1443_v46 = vmul.f32 %v1442_v31, %v1437_v1  ;;  %v1414_v19 = vadd.f32 %v1413_v2, %v1404_v36 }
 0x6b6   : > { %v1424_v32 = vmul.f32 %v1423_v6, %v1418_v5 }
 0x6b8   : > { %v1479_v53 = vpop.permute.xlu0 %1478 }
 0x6b9   : > { %v1485_v48 = vmul.f32 %v1484_v9, %v1479_v53 }
 0x6ba   : > { %v1427_v20 = vpop.permute.xlu1 %1426 }
 0x6bb   : > { %v1433_v62 = vmul.f32 %v1432_v54, %v1427_v20 }
 0x6bd   : > { %v1434_v63 = vadd.f32 %v1433_v62, %v1424_v32  ;;  %v1447_v42 = vpop.permute.xlu0 %1446 }
 0x6be   : > { %v1453_v39 = vmul.f32 %v1452_v61, %v1447_v42 }
 0x6bf   : > { %v1444_v43 = vadd.f32 %v1443_v46, %v1434_v63  ;;  %v1460_v17 = vpop.permute.xlu1 %1459 }
 0x6c0   : > { %v1466_v55 = vmul.f32 %v1465_v58, %v1460_v17 }
 0x6c1   : > { %v1454_v22 = vadd.f32 %v1453_v39, %v1444_v43 }
 0x6c3   : > { %v1497_v10 = vsub.f32 %v1414_v19, %v1454_v22 }
 0x6c4   : > { %v1469_v11 = vpop.permute.xlu1 %1468 }
 0x6c5   : > { %1501 = vst.msk [vmem:[%s209_s22] sm:$0xf] %vm1500_vm1, %v1497_v10  ;;  %v1475_v12 = vmul.f32 %v1474_v7, %v1469_v11 }
 0x6c7   : > { %v1476_v14 = vadd.f32 %v1475_v12, %v1466_v55 }
 0x6c9   : > { %v1486_v34 = vadd.f32 %v1485_v48, %v1476_v14  ;;  %v1489_v33 = vpop.permute.xlu1 %1488 }
 0x6ca   : > { %v1495_v35 = vmul.f32 %v1494_v13, %v1489_v33 }
 0x6cc   : > { %v1496_v45 = vadd.f32 %v1495_v35, %v1486_v34 }
 0x6ce   : > { %v1498_v41 = vsub.f32 %v1496_v45, %v1414_v19 }
 0x6d0   : > { %v1499_v44 = vsub.f32 %v1498_v41, %v1454_v22 }
 0x6d2   : > { %1627 = vst.msk [vmem:[%s209_s22 + $0x4] sm:$0xf] %vm1500_vm1, %v1499_v44 }
 0x6d3   : > { %1891 = shalt.err (!%p1888_p5)
}
 0x6d4   : > { %s1892_s17 = scalar_lea.hbm %s2763_s20, 128  ;;  %s1896_s16 = scalar_lea.hbm %s2811_s4, 256 }
 0x6d5   : > { %p1893_p8 = scmp.ne.s32.totalorder %s2763_s20, %s1892_s17  ;;  %p1897_p11 = scmp.lt.u32.totalorder %s2763_s20, %s2811_s4 }
 0x6d6   : > { %p1898_p13 = scmp.lt.u32.totalorder %s1896_s16, %s1892_s17  ;;  %p1900_p7 = scmp.lt.u32.totalorder %s1892_s17, %s2763_s20 }
 0x6d7   : > { %p1894_p12 = pnand %p1893_p8, %p2823_p10 }
 0x6d8   : > { %p1899_p0 = por %p1898_p13, %p1897_p11 }
 0x6d9   : > { %p1895_p9 = pneg %p1894_p12 }
 0x6da   : > { %p1901_p6 = por %p1900_p7, %p1899_p0 }
 0x6dc   : > { %p1902_p4 = pnand %p1901_p6, %p1895_p9 }
 0x6de   : > { %1905 = shalt.err (!%p1902_p4)
}
 0x6df   : > { %s1965_s7 = smov 64   ;;  %s1966_s9 = smov 128  }
 0x6e0   : > { %s1967_s22 = smov 4  }
 0x6e1   : > { %1636 = dma.vmem_to_hbm [thread:$0]  (%p2823_p10), %s2758_s27, 128, %s2763_s20, %s1505_s28, %s1965_s7, %s1966_s9, %s1967_s22  }
 0x6e2 PF: > { %s1532_s12 = sand.u32 1, %s1938_s0   ;;  %p2824_p1 = scmp.ne.s32.totalorder %s2818_s15, 0 }
 0x6e3   : > { %p2825_p2 = scmp.ge.s32.totalorder %s1950_s5, 2  ;;  %s1533_s25 = scalar_lea.sflag [#allocation7], %s1532_s12 }
 0x6e5   : > { %p1646_p3 = pnand %p2825_p2, %p2824_p1 }
 0x6e7   : > { %1933 = dma.done.wait (!%p1646_p3), %s1533_s25, 128  }
 0x6e8   : > { %1935 = vsyncadd (!%p1646_p3), %s1533_s25, 4294967168  ;;  %p28_p5 = scmp.ge.s32.totalorder %s2033_s8, 4   ;;  %s2826_s0 = smov %s1942_s1 }
 0x6e9   : > { %s2827_s1 = smov %s1946_s30  ;;  %s2828_s30 = smov %s2045_s11 }
 0x6ea   : > { %s2829_s5 = smov %s2033_s8  ;;  %30 = sbr.rel (!%p28_p5) target bundleno = 29 (0x1d), region = 89 }
 0x6f1   :  { %1538 = vsyncpa [#allocation6], 1 }
 0x6f2   :  { %1540 = vsyncpa [#allocation6 + $0x1], 1 }
 0x6f3   :  { %1541 = vsyncpa [#allocation9], 1 }
 0x6f4   :  { %1543 = vsyncpa [#allocation9 + $0x1], 1 }
 0x6f5   :  { %1544 = vsyncpa [#allocation7], 1 }
 0x6f6   :  { %1546 = vsyncpa [#allocation7 + $0x1], 1 }

</bundles_post_ra>
